<compile_context>
chip_gen: v7x
topology: tpu7x:2x2x1
jax: 0.10.0
libtpu: 0.0.40
codegen_flags: <defaults>
</compile_context>

<pallas_src>
import math

import jax
import jax.numpy as jnp
import numpy as np
from jax.experimental import pallas as pl
from jax.experimental.pallas import tpu as pltpu

D_K = D_V = 8
N_HEADS = 4
D_MODEL = 128
D_FF = 256
N_LAYERS = 2
MAX_LEN = 50
NEG_INF = -1.0e9
LN_EPS = 1e-5

# TODO(synk): nn.Dropout(p=0.1) inside PositionalEncoding is treated as eval-mode (identity).


# -------------------- Pallas kernel: full decoder (both layers) --------------------
def _layer_norm(v):
    # nn.LayerNorm(d_model) freshly constructed each forward: gamma=1, beta=0, eps=1e-5
    mu = jnp.mean(v, axis=-1, keepdims=True)
    var = jnp.mean((v - mu) ** 2, axis=-1, keepdims=True)
    return (v - mu) * jax.lax.rsqrt(var + LN_EPS)


def _mha(x_q, x_kv, mask, wq, wk, wv, wo):
    """Multi-head attention + residual + LayerNorm.

    x_q: (S_q, D) queries (also the residual).  x_kv: (S_k, D) keys/values.
    mask: (S_q or 1, S_k) bool, True => masked.  1/sqrt(d_k) is pre-folded into wq.
    Returns (out (S_q, D), attn packed as (S_q, H*S_k)).
    """
    # Wide, MXU-friendly projections (all heads at once).
    q = jnp.dot(x_q, wq, preferred_element_type=jnp.float32)    # (S_q, H*Dk)
    k = jnp.dot(x_kv, wk, preferred_element_type=jnp.float32)   # (S_k, H*Dk)
    v = jnp.dot(x_kv, wv, preferred_element_type=jnp.float32)   # (S_k, H*Dv)

    probs, ctxs = [], []
    for h in range(N_HEADS):                                    # tiny per-head score/ctx matmuls
        qh = q[:, h * D_K:(h + 1) * D_K]
        kh = k[:, h * D_K:(h + 1) * D_K]
        vh = v[:, h * D_V:(h + 1) * D_V]
        s = jax.lax.dot_general(qh, kh, (((1,), (1,)), ((), ())),
                                preferred_element_type=jnp.float32)   # (S_q, S_k)
        s = jnp.where(mask, NEG_INF, s)                               # masked_fill_(-1e9)
        m = jnp.max(s, axis=-1, keepdims=True)
        e = jnp.exp(s - m)
        p = e * pl.reciprocal(jnp.sum(e, axis=-1, keepdims=True), approx=True)
        probs.append(p)
        ctxs.append(jnp.dot(p, vh, preferred_element_type=jnp.float32))

    ctx = jnp.concatenate(ctxs, axis=-1)                         # (S_q, H*Dv)
    out = jnp.dot(ctx, wo, preferred_element_type=jnp.float32)   # single wide output projection
    return _layer_norm(out + x_q), jnp.concatenate(probs, axis=-1)


def decoder_kernel(x_ref, enc_ref, dec_pad_ref, enc_pad_ref,
                   sa_wq_ref, sa_wk_ref, sa_wv_ref, sa_wo_ref,
                   ca_wq_ref, ca_wk_ref, ca_wv_ref, ca_wo_ref,
                   w1_ref, w2_ref,
                   out_ref, attn_ref):
    x = x_ref[0]                       # (S_dec, D): dec_inputs + positional encoding
    enc = enc_ref[0]                   # (S_enc, D): encoder outputs
    dec_pad = dec_pad_ref[0] > 0.5     # (1, S_dec)  True where decoder key is padding
    enc_pad = enc_pad_ref[0] > 0.5     # (1, S_enc)  True where encoder key is padding

    s_dec = x.shape[0]
    row = jax.lax.broadcasted_iota(jnp.int32, (s_dec, s_dec), 0)
    col = jax.lax.broadcasted_iota(jnp.int32, (s_dec, s_dec), 1)
    self_mask = jnp.logical_or(dec_pad, col > row)   # pad mask OR subsequence (causal) mask

    attn_blocks = []
    for layer in range(N_LAYERS):      # layers unrolled: activations stay in vregs/VMEM
        # decoder self-attention
        x, a_self = _mha(x, x, self_mask,
                         sa_wq_ref[layer], sa_wk_ref[layer],
                         sa_wv_ref[layer], sa_wo_ref[layer])
        # decoder-encoder cross-attention
        x, a_enc = _mha(x, enc, enc_pad,
                        ca_wq_ref[layer], ca_wk_ref[layer],
                        ca_wv_ref[layer], ca_wo_ref[layer])
        # position-wise feed-forward + residual + LayerNorm
        ff = jnp.maximum(jnp.dot(x, w1_ref[layer], preferred_element_type=jnp.float32), 0.0)
        ff = jnp.dot(ff, w2_ref[layer], preferred_element_type=jnp.float32)
        x = _layer_norm(ff + x)
        attn_blocks += [a_self, a_enc]

    out_ref[0] = x
    attn_ref[0] = jnp.concatenate(attn_blocks, axis=-1)   # single lane-dense (S_dec, 128) store


def decoder_pallas(x, enc_outputs, dec_pad_f, enc_pad_f, stacked):
    B, S_dec, D = x.shape
    S_enc = enc_outputs.shape[1]
    attn_cols = N_LAYERS * N_HEADS * (S_dec + S_enc)     # = 128 at the chosen shapes

    def const_spec(shape):
        return pl.BlockSpec(shape, lambda b, _n=len(shape): (0,) * _n)

    out, attn_packed = pl.pallas_call(
        decoder_kernel,
        out_shape=(jax.ShapeDtypeStruct((B, S_dec, D), jnp.float32),
                   jax.ShapeDtypeStruct((B, S_dec, attn_cols), jnp.float32)),
        grid_spec=pltpu.PrefetchScalarGridSpec(
            num_scalar_prefetch=0,
            grid=(B,),
            in_specs=[
                pl.BlockSpec((1, S_dec, D), lambda b: (b, 0, 0)),    # x = dec_inputs + PE
                pl.BlockSpec((1, S_enc, D), lambda b: (b, 0, 0)),    # enc_outputs
                pl.BlockSpec((1, 1, S_dec), lambda b: (b, 0, 0)),    # dec key-pad row
                pl.BlockSpec((1, 1, S_enc), lambda b: (b, 0, 0)),    # enc key-pad row
                const_spec(stacked["sa_wq"].shape),
                const_spec(stacked["sa_wk"].shape),
                const_spec(stacked["sa_wv"].shape),
                const_spec(stacked["sa_wo"].shape),
                const_spec(stacked["ca_wq"].shape),
                const_spec(stacked["ca_wk"].shape),
                const_spec(stacked["ca_wv"].shape),
                const_spec(stacked["ca_wo"].shape),
                const_spec(stacked["w1"].shape),
                const_spec(stacked["w2"].shape),
            ],
            out_specs=[
                pl.BlockSpec((1, S_dec, D), lambda b: (b, 0, 0)),
                pl.BlockSpec((1, S_dec, attn_cols), lambda b: (b, 0, 0)),
            ],
        ),
        compiler_params=pltpu.CompilerParams(
            dimension_semantics=("parallel",),        # 2-wide parallel grid -> both v7x TCs
            vmem_limit_bytes=32 * 1024 * 1024,
        ),
    )(x, enc_outputs, dec_pad_f, enc_pad_f,
      stacked["sa_wq"], stacked["sa_wk"], stacked["sa_wv"], stacked["sa_wo"],
      stacked["ca_wq"], stacked["ca_wk"], stacked["ca_wv"], stacked["ca_wo"],
      stacked["w1"], stacked["w2"])
    return out, attn_packed


# -------------------- glue: positional encoding, masks, weight prep, unpacking --------------------
def make_positional_encoding(max_len, d_model):
    position = np.arange(max_len, dtype=np.float32)[:, None]
    div_term = np.exp(np.arange(0, d_model, 2, dtype=np.float32)
                      * (-math.log(10000.0) / d_model))
    pe = np.zeros((max_len, d_model), dtype=np.float32)
    pe[:, 0::2] = np.sin(position * div_term)
    pe[:, 1::2] = np.cos(position * div_term)
    return jnp.asarray(pe)


def stack_and_prep_params(layer_params):
    stacked = {k: jnp.stack([p[k] for p in layer_params], axis=0) for k in layer_params[0]}
    inv = 1.0 / math.sqrt(D_K)
    stacked["sa_wq"] = stacked["sa_wq"] * inv    # fold 1/sqrt(d_k) into W_Q once
    stacked["ca_wq"] = stacked["ca_wq"] * inv
    return stacked


def decoder_forward(dec_inputs, enc_inputs, enc_outputs, layer_params):
    B, S_dec, _ = dec_inputs.shape
    S_enc = enc_inputs.shape[1]
    pe = make_positional_encoding(MAX_LEN, D_MODEL)
    # PositionalEncoding on (S,B,1): equivalent to (B,S,1) + (1,S,D) broadcast
    x = (dec_inputs + pe[None, :S_dec, :]).astype(jnp.float32)
    dec_pad_f = (dec_inputs[:, :, 0] == 0.0).astype(jnp.float32)[:, None, :]   # (B,1,S_dec)
    enc_pad_f = (enc_inputs[:, :, 0] == 0.0).astype(jnp.float32)[:, None, :]   # (B,1,S_enc)
    stacked = stack_and_prep_params(layer_params)

    out, attn_packed = decoder_pallas(x, enc_outputs, dec_pad_f, enc_pad_f, stacked)

    # unpack the lane-dense attention slab back to per-layer (B, H, S_q, S_k)
    dec_self_attns, dec_enc_attns = [], []
    off = 0
    for _ in range(N_LAYERS):
        a = attn_packed[:, :, off:off + N_HEADS * S_dec]
        dec_self_attns.append(a.reshape(B, S_dec, N_HEADS, S_dec).transpose(0, 2, 1, 3))
        off += N_HEADS * S_dec
        a = attn_packed[:, :, off:off + N_HEADS * S_enc]
        dec_enc_attns.append(a.reshape(B, S_dec, N_HEADS, S_enc).transpose(0, 2, 1, 3))
        off += N_HEADS * S_enc
    return out, dec_self_attns, dec_enc_attns


# -------------------- pure-JAX reference (for correctness check) --------------------
def ref_decoder(dec_inputs, enc_inputs, enc_outputs, layer_params):
    B, S_dec, _ = dec_inputs.shape
    S_enc = enc_inputs.shape[1]
    pe = make_positional_encoding(MAX_LEN, D_MODEL)
    x = dec_inputs + pe[None, :S_dec, :]

    dec_pad = (dec_inputs[:, :, 0] == 0.0)
    enc_pad = (enc_inputs[:, :, 0] == 0.0)
    causal = jnp.asarray(np.triu(np.ones((S_dec, S_dec), dtype=np.bool_), k=1))
    self_mask = jnp.logical_or(dec_pad[:, None, :], causal[None, :, :])[:, None, :, :]
    enc_mask = enc_pad[:, None, None, :]

    def ln(v):
        mu = jnp.mean(v, -1, keepdims=True)
        var = jnp.mean((v - mu) ** 2, -1, keepdims=True)
        return (v - mu) / jnp.sqrt(var + LN_EPS)

    def mha(q_in, kv_in, mask, wq, wk, wv, wo):
        Sq, Sk = q_in.shape[1], kv_in.shape[1]
        q = (q_in @ wq).reshape(B, Sq, N_HEADS, D_K).transpose(0, 2, 1, 3)
        k = (kv_in @ wk).reshape(B, Sk, N_HEADS, D_K).transpose(0, 2, 1, 3)
        v = (kv_in @ wv).reshape(B, Sk, N_HEADS, D_V).transpose(0, 2, 1, 3)
        scores = jnp.einsum("bhqd,bhkd->bhqk", q, k) / math.sqrt(D_K)
        scores = jnp.where(mask, NEG_INF, scores)
        attn = jax.nn.softmax(scores, axis=-1)
        ctx = jnp.einsum("bhqk,bhkd->bhqd", attn, v)
        ctx = ctx.transpose(0, 2, 1, 3).reshape(B, Sq, N_HEADS * D_V)
        return ln(ctx @ wo + q_in), attn

    self_attns, enc_attns = [], []
    with jax.default_matmul_precision("highest"):
        for p in layer_params:
            x, a1 = mha(x, x, self_mask, p["sa_wq"], p["sa_wk"], p["sa_wv"], p["sa_wo"])
            x, a2 = mha(x, enc_outputs, enc_mask, p["ca_wq"], p["ca_wk"], p["ca_wv"], p["ca_wo"])
            ff = jnp.maximum(x @ p["w1"], 0.0) @ p["w2"]
            x = ln(ff + x)
            self_attns.append(a1)
            enc_attns.append(a2)
    return x, self_attns, enc_attns


# -------------------- deterministic parameter init --------------------
def init_params(key):
    def lin(k, fan_in, fan_out):
        bound = 1.0 / math.sqrt(fan_in)   # torch nn.Linear default init (kaiming_uniform-ish)
        return jax.random.uniform(k, (fan_in, fan_out), jnp.float32, -bound, bound)

    layers = []
    for _ in range(N_LAYERS):
        key, *ks = jax.random.split(key, 11)
        layers.append({
            "sa_wq": lin(ks[0], D_MODEL, N_HEADS * D_K),
            "sa_wk": lin(ks[1], D_MODEL, N_HEADS * D_K),
            "sa_wv": lin(ks[2], D_MODEL, N_HEADS * D_V),
            "sa_wo": lin(ks[3], N_HEADS * D_V, D_MODEL),
            "ca_wq": lin(ks[4], D_MODEL, N_HEADS * D_K),
            "ca_wk": lin(ks[5], D_MODEL, N_HEADS * D_K),
            "ca_wv": lin(ks[6], D_MODEL, N_HEADS * D_V),
            "ca_wo": lin(ks[7], N_HEADS * D_V, D_MODEL),
            "w1": lin(ks[8], D_MODEL, D_FF),
            "w2": lin(ks[9], D_FF, D_MODEL),
        })
    return layers


if __name__ == "__main__":
    B, S_DEC, S_ENC = 2, 8, 8
    key = jax.random.PRNGKey(0)
    k_dec, k_enc_in, k_enc_out, k_par = jax.random.split(key, 4)

    dec_inputs = jax.random.normal(k_dec, (B, S_DEC, 1), jnp.float32)
    dec_inputs = dec_inputs.at[:, -1, :].set(0.0)    # decoder pad token (exercises pad + causal mask)
    enc_inputs = jax.random.normal(k_enc_in, (B, S_ENC, 1), jnp.float32)
    enc_inputs = enc_inputs.at[:, -2, :].set(0.0)    # encoder pad token (exercises cross-attn mask)
    enc_outputs = jax.random.normal(k_enc_out, (B, S_ENC, D_MODEL), jnp.float32)

    params = init_params(k_par)

    out, self_attns, enc_attns = decoder_forward(dec_inputs, enc_inputs, enc_outputs, params)
    out = jax.block_until_ready(out)

    # correctness check against pure-JAX reference
    ref_out, ref_self, ref_enc = ref_decoder(dec_inputs, enc_inputs, enc_outputs, params)
    assert out.shape == (B, S_DEC, D_MODEL)
    assert all(a.shape == (B, N_HEADS, S_DEC, S_DEC) for a in self_attns)
    assert all(a.shape == (B, N_HEADS, S_DEC, S_ENC) for a in enc_attns)
    np.testing.assert_allclose(np.asarray(out), np.asarray(ref_out), rtol=1e-2, atol=1e-2)
    for a, ra in zip(self_attns, ref_self):
        np.testing.assert_allclose(np.asarray(a), np.asarray(ra), rtol=1e-2, atol=1e-2)
    for a, ra in zip(enc_attns, ref_enc):
        np.testing.assert_allclose(np.asarray(a), np.asarray(ra), rtol=1e-2, atol=1e-2)

    print("KERNEL_OK")
</pallas_src>

<mosaic_0001>
module attributes {stable_mosaic.version = 11 : i64} {
  func.func @decoder_kernel(%arg0: i32, %arg1: memref<1x8x128xf32, #tpu.memory_space<vmem>>, %arg2: memref<1x8x128xf32, #tpu.memory_space<vmem>>, %arg3: memref<1x1x8xf32, #tpu.memory_space<vmem>>, %arg4: memref<1x1x8xf32, #tpu.memory_space<vmem>>, %arg5: memref<2x128x32xf32, #tpu.memory_space<vmem>>, %arg6: memref<2x128x32xf32, #tpu.memory_space<vmem>>, %arg7: memref<2x128x32xf32, #tpu.memory_space<vmem>>, %arg8: memref<2x32x128xf32, #tpu.memory_space<vmem>>, %arg9: memref<2x128x32xf32, #tpu.memory_space<vmem>>, %arg10: memref<2x128x32xf32, #tpu.memory_space<vmem>>, %arg11: memref<2x128x32xf32, #tpu.memory_space<vmem>>, %arg12: memref<2x32x128xf32, #tpu.memory_space<vmem>>, %arg13: memref<2x128x256xf32, #tpu.memory_space<vmem>>, %arg14: memref<2x256x128xf32, #tpu.memory_space<vmem>>, %arg15: memref<1x8x128xf32, #tpu.memory_space<vmem>>, %arg16: memref<1x8x128xf32, #tpu.memory_space<vmem>>) attributes {dimension_semantics = [#tpu.dimension_semantics<parallel>], iteration_bounds = array<i64: 2>, scalar_prefetch = 0 : i64, scratch_operands = 0 : i64, tpu.core_type = #tpu.core_type<tc>, window_params = [{transform_indices = @transform_0, window_bounds = array<i64: 1, 8, 128>}, {transform_indices = @transform_1, window_bounds = array<i64: 1, 8, 128>}, {transform_indices = @transform_2, window_bounds = array<i64: 1, 1, 8>}, {transform_indices = @transform_3, window_bounds = array<i64: 1, 1, 8>}, {pipeline_mode = #tpu.pipeline_mode<synchronous>, transform_indices = @transform_4, window_bounds = array<i64: 2, 128, 32>}, {pipeline_mode = #tpu.pipeline_mode<synchronous>, transform_indices = @transform_5, window_bounds = array<i64: 2, 128, 32>}, {pipeline_mode = #tpu.pipeline_mode<synchronous>, transform_indices = @transform_6, window_bounds = array<i64: 2, 128, 32>}, {pipeline_mode = #tpu.pipeline_mode<synchronous>, transform_indices = @transform_7, window_bounds = array<i64: 2, 32, 128>}, {pipeline_mode = #tpu.pipeline_mode<synchronous>, transform_indices = @transform_8, window_bounds = array<i64: 2, 128, 32>}, {pipeline_mode = #tpu.pipeline_mode<synchronous>, transform_indices = @transform_9, window_bounds = array<i64: 2, 128, 32>}, {pipeline_mode = #tpu.pipeline_mode<synchronous>, transform_indices = @transform_10, window_bounds = array<i64: 2, 128, 32>}, {pipeline_mode = #tpu.pipeline_mode<synchronous>, transform_indices = @transform_11, window_bounds = array<i64: 2, 32, 128>}, {pipeline_mode = #tpu.pipeline_mode<synchronous>, transform_indices = @transform_12, window_bounds = array<i64: 2, 128, 256>}, {pipeline_mode = #tpu.pipeline_mode<synchronous>, transform_indices = @transform_13, window_bounds = array<i64: 2, 256, 128>}, {transform_indices = @transform_14, window_bounds = array<i64: 1, 8, 128>}, {transform_indices = @transform_15, window_bounds = array<i64: 1, 8, 128>}]} {
    %c0 = arith.constant 0 : index
    %c0_0 = arith.constant 0 : index
    %c0_1 = arith.constant 0 : index
    %0 = vector.load %arg1[%c0, %c0_0, %c0_1] : memref<1x8x128xf32, #tpu.memory_space<vmem>>, vector<1x8x128xf32>
    %1 = vector.shape_cast %0 : vector<1x8x128xf32> to vector<8x128xf32>
    %c0_2 = arith.constant 0 : index
    %c0_3 = arith.constant 0 : index
    %c0_4 = arith.constant 0 : index
    %2 = vector.load %arg2[%c0_2, %c0_3, %c0_4] : memref<1x8x128xf32, #tpu.memory_space<vmem>>, vector<1x8x128xf32>
    %3 = vector.shape_cast %2 : vector<1x8x128xf32> to vector<8x128xf32>
    %c0_5 = arith.constant 0 : index
    %c0_6 = arith.constant 0 : index
    %c0_7 = arith.constant 0 : index
    %4 = vector.load %arg3[%c0_5, %c0_6, %c0_7] : memref<1x1x8xf32, #tpu.memory_space<vmem>>, vector<1x1x8xf32>
    %5 = vector.shape_cast %4 : vector<1x1x8xf32> to vector<1x8xf32>
    %cst = arith.constant 5.000000e-01 : f32
    %6 = vector.broadcast %cst : f32 to vector<1x8xf32>
    %7 = arith.cmpf ogt, %5, %6 : vector<1x8xf32>
    %c0_8 = arith.constant 0 : index
    %c0_9 = arith.constant 0 : index
    %c0_10 = arith.constant 0 : index
    %8 = vector.load %arg4[%c0_8, %c0_9, %c0_10] : memref<1x1x8xf32, #tpu.memory_space<vmem>>, vector<1x1x8xf32>
    %9 = vector.shape_cast %8 : vector<1x1x8xf32> to vector<1x8xf32>
    %cst_11 = arith.constant 5.000000e-01 : f32
    %10 = vector.broadcast %cst_11 : f32 to vector<1x8xf32>
    %11 = arith.cmpf ogt, %9, %10 : vector<1x8xf32>
    %12 = tpu.iota {dimensions = array<i32: 0>} : vector<8x8xi32>
    %13 = tpu.iota {dimensions = array<i32: 1>} : vector<8x8xi32>
    %14 = arith.cmpi sgt, %13, %12 : vector<8x8xi32>
    %15 = vector.broadcast %7 : vector<1x8xi1> to vector<8x8xi1>
    %16 = arith.ori %15, %14 : vector<8x8xi1>
    %c0_12 = arith.constant 0 : index
    %c0_13 = arith.constant 0 : index
    %c0_14 = arith.constant 0 : index
    %17 = vector.load %arg5[%c0_12, %c0_13, %c0_14] : memref<2x128x32xf32, #tpu.memory_space<vmem>>, vector<1x128x32xf32>
    %18 = vector.shape_cast %17 : vector<1x128x32xf32> to vector<128x32xf32>
    %c0_15 = arith.constant 0 : index
    %c0_16 = arith.constant 0 : index
    %c0_17 = arith.constant 0 : index
    %19 = vector.load %arg6[%c0_15, %c0_16, %c0_17] : memref<2x128x32xf32, #tpu.memory_space<vmem>>, vector<1x128x32xf32>
    %20 = vector.shape_cast %19 : vector<1x128x32xf32> to vector<128x32xf32>
    %c0_18 = arith.constant 0 : index
    %c0_19 = arith.constant 0 : index
    %c0_20 = arith.constant 0 : index
    %21 = vector.load %arg7[%c0_18, %c0_19, %c0_20] : memref<2x128x32xf32, #tpu.memory_space<vmem>>, vector<1x128x32xf32>
    %22 = vector.shape_cast %21 : vector<1x128x32xf32> to vector<128x32xf32>
    %c0_21 = arith.constant 0 : index
    %c0_22 = arith.constant 0 : index
    %c0_23 = arith.constant 0 : index
    %23 = vector.load %arg8[%c0_21, %c0_22, %c0_23] : memref<2x32x128xf32, #tpu.memory_space<vmem>>, vector<1x32x128xf32>
    %24 = vector.shape_cast %23 : vector<1x32x128xf32> to vector<32x128xf32>
    %cst_24 = arith.constant dense<0.000000e+00> : vector<8x32xf32>
    %25 = tpu.matmul %1, %18, %cst_24 {dimension_numbers = #tpu.dot_dimension_numbers<[1], [0], [0], [1], [0, 0, 1, 1], [], []>} : vector<8x128xf32>, vector<128x32xf32>, vector<8x32xf32> -> vector<8x32xf32>
    %cst_25 = arith.constant dense<0.000000e+00> : vector<8x32xf32>
    %26 = tpu.matmul %1, %20, %cst_25 {dimension_numbers = #tpu.dot_dimension_numbers<[1], [0], [0], [1], [0, 0, 1, 1], [], []>} : vector<8x128xf32>, vector<128x32xf32>, vector<8x32xf32> -> vector<8x32xf32>
    %cst_26 = arith.constant dense<0.000000e+00> : vector<8x32xf32>
    %27 = tpu.matmul %1, %22, %cst_26 {dimension_numbers = #tpu.dot_dimension_numbers<[1], [0], [0], [1], [0, 0, 1, 1], [], []>} : vector<8x128xf32>, vector<128x32xf32>, vector<8x32xf32> -> vector<8x32xf32>
    %28 = vector.extract_strided_slice %25 {offsets = [0, 0], sizes = [8, 8], strides = [1, 1]} : vector<8x32xf32> to vector<8x8xf32>
    %29 = vector.extract_strided_slice %26 {offsets = [0, 0], sizes = [8, 8], strides = [1, 1]} : vector<8x32xf32> to vector<8x8xf32>
    %30 = vector.extract_strided_slice %27 {offsets = [0, 0], sizes = [8, 8], strides = [1, 1]} : vector<8x32xf32> to vector<8x8xf32>
    %cst_27 = arith.constant dense<0.000000e+00> : vector<8x8xf32>
    %31 = tpu.matmul %28, %29, %cst_27 {dimension_numbers = #tpu.dot_dimension_numbers<[1], [1], [0], [0], [0, 0, 1, 0], [], []>} : vector<8x8xf32>, vector<8x8xf32>, vector<8x8xf32> -> vector<8x8xf32>
    %cst_28 = arith.constant -1.000000e+09 : f32
    %32 = vector.broadcast %cst_28 : f32 to vector<8x8xf32>
    %33 = arith.select %16, %32, %31 : vector<8x8xi1>, vector<8x8xf32>
    %cst_29 = arith.constant dense<0xFF800000> : vector<8xf32>
    %34 = vector.multi_reduction <maximumf>, %33, %cst_29 [1] : vector<8x8xf32> to vector<8xf32>
    %35 = vector.shape_cast %34 : vector<8xf32> to vector<8x1xf32>
    %36 = vector.broadcast %35 : vector<8x1xf32> to vector<8x8xf32>
    %37 = arith.subf %33, %36 : vector<8x8xf32>
    %38 = math.exp %37 : vector<8x8xf32>
    %cst_30 = arith.constant dense<0.000000e+00> : vector<8xf32>
    %39 = vector.multi_reduction <add>, %38, %cst_30 [1] : vector<8x8xf32> to vector<8xf32>
    %40 = vector.shape_cast %39 : vector<8xf32> to vector<8x1xf32>
    %41 = tpu.reciprocal %40 {approx = true} : vector<8x1xf32> -> vector<8x1xf32>
    %42 = vector.broadcast %41 : vector<8x1xf32> to vector<8x8xf32>
    %43 = arith.mulf %38, %42 : vector<8x8xf32>
    %cst_31 = arith.constant dense<0.000000e+00> : vector<8x8xf32>
    %44 = tpu.matmul %43, %30, %cst_31 {dimension_numbers = #tpu.dot_dimension_numbers<[1], [0], [0], [1], [0, 0, 1, 1], [], []>} : vector<8x8xf32>, vector<8x8xf32>, vector<8x8xf32> -> vector<8x8xf32>
    %45 = vector.extract_strided_slice %25 {offsets = [0, 8], sizes = [8, 8], strides = [1, 1]} : vector<8x32xf32> to vector<8x8xf32>
    %46 = vector.extract_strided_slice %26 {offsets = [0, 8], sizes = [8, 8], strides = [1, 1]} : vector<8x32xf32> to vector<8x8xf32>
    %47 = vector.extract_strided_slice %27 {offsets = [0, 8], sizes = [8, 8], strides = [1, 1]} : vector<8x32xf32> to vector<8x8xf32>
    %cst_32 = arith.constant dense<0.000000e+00> : vector<8x8xf32>
    %48 = tpu.matmul %45, %46, %cst_32 {dimension_numbers = #tpu.dot_dimension_numbers<[1], [1], [0], [0], [0, 0, 1, 0], [], []>} : vector<8x8xf32>, vector<8x8xf32>, vector<8x8xf32> -> vector<8x8xf32>
    %cst_33 = arith.constant -1.000000e+09 : f32
    %49 = vector.broadcast %cst_33 : f32 to vector<8x8xf32>
    %50 = arith.select %16, %49, %48 : vector<8x8xi1>, vector<8x8xf32>
    %cst_34 = arith.constant dense<0xFF800000> : vector<8xf32>
    %51 = vector.multi_reduction <maximumf>, %50, %cst_34 [1] : vector<8x8xf32> to vector<8xf32>
    %52 = vector.shape_cast %51 : vector<8xf32> to vector<8x1xf32>
    %53 = vector.broadcast %52 : vector<8x1xf32> to vector<8x8xf32>
    %54 = arith.subf %50, %53 : vector<8x8xf32>
    %55 = math.exp %54 : vector<8x8xf32>
    %cst_35 = arith.constant dense<0.000000e+00> : vector<8xf32>
    %56 = vector.multi_reduction <add>, %55, %cst_35 [1] : vector<8x8xf32> to vector<8xf32>
    %57 = vector.shape_cast %56 : vector<8xf32> to vector<8x1xf32>
    %58 = tpu.reciprocal %57 {approx = true} : vector<8x1xf32> -> vector<8x1xf32>
    %59 = vector.broadcast %58 : vector<8x1xf32> to vector<8x8xf32>
    %60 = arith.mulf %55, %59 : vector<8x8xf32>
    %cst_36 = arith.constant dense<0.000000e+00> : vector<8x8xf32>
    %61 = tpu.matmul %60, %47, %cst_36 {dimension_numbers = #tpu.dot_dimension_numbers<[1], [0], [0], [1], [0, 0, 1, 1], [], []>} : vector<8x8xf32>, vector<8x8xf32>, vector<8x8xf32> -> vector<8x8xf32>
    %62 = vector.extract_strided_slice %25 {offsets = [0, 16], sizes = [8, 8], strides = [1, 1]} : vector<8x32xf32> to vector<8x8xf32>
    %63 = vector.extract_strided_slice %26 {offsets = [0, 16], sizes = [8, 8], strides = [1, 1]} : vector<8x32xf32> to vector<8x8xf32>
    %64 = vector.extract_strided_slice %27 {offsets = [0, 16], sizes = [8, 8], strides = [1, 1]} : vector<8x32xf32> to vector<8x8xf32>
    %cst_37 = arith.constant dense<0.000000e+00> : vector<8x8xf32>
    %65 = tpu.matmul %62, %63, %cst_37 {dimension_numbers = #tpu.dot_dimension_numbers<[1], [1], [0], [0], [0, 0, 1, 0], [], []>} : vector<8x8xf32>, vector<8x8xf32>, vector<8x8xf32> -> vector<8x8xf32>
    %cst_38 = arith.constant -1.000000e+09 : f32
    %66 = vector.broadcast %cst_38 : f32 to vector<8x8xf32>
    %67 = arith.select %16, %66, %65 : vector<8x8xi1>, vector<8x8xf32>
    %cst_39 = arith.constant dense<0xFF800000> : vector<8xf32>
    %68 = vector.multi_reduction <maximumf>, %67, %cst_39 [1] : vector<8x8xf32> to vector<8xf32>
    %69 = vector.shape_cast %68 : vector<8xf32> to vector<8x1xf32>
    %70 = vector.broadcast %69 : vector<8x1xf32> to vector<8x8xf32>
    %71 = arith.subf %67, %70 : vector<8x8xf32>
    %72 = math.exp %71 : vector<8x8xf32>
    %cst_40 = arith.constant dense<0.000000e+00> : vector<8xf32>
    %73 = vector.multi_reduction <add>, %72, %cst_40 [1] : vector<8x8xf32> to vector<8xf32>
    %74 = vector.shape_cast %73 : vector<8xf32> to vector<8x1xf32>
    %75 = tpu.reciprocal %74 {approx = true} : vector<8x1xf32> -> vector<8x1xf32>
    %76 = vector.broadcast %75 : vector<8x1xf32> to vector<8x8xf32>
    %77 = arith.mulf %72, %76 : vector<8x8xf32>
    %cst_41 = arith.constant dense<0.000000e+00> : vector<8x8xf32>
    %78 = tpu.matmul %77, %64, %cst_41 {dimension_numbers = #tpu.dot_dimension_numbers<[1], [0], [0], [1], [0, 0, 1, 1], [], []>} : vector<8x8xf32>, vector<8x8xf32>, vector<8x8xf32> -> vector<8x8xf32>
    %79 = vector.extract_strided_slice %25 {offsets = [0, 24], sizes = [8, 8], strides = [1, 1]} : vector<8x32xf32> to vector<8x8xf32>
    %80 = vector.extract_strided_slice %26 {offsets = [0, 24], sizes = [8, 8], strides = [1, 1]} : vector<8x32xf32> to vector<8x8xf32>
    %81 = vector.extract_strided_slice %27 {offsets = [0, 24], sizes = [8, 8], strides = [1, 1]} : vector<8x32xf32> to vector<8x8xf32>
    %cst_42 = arith.constant dense<0.000000e+00> : vector<8x8xf32>
    %82 = tpu.matmul %79, %80, %cst_42 {dimension_numbers = #tpu.dot_dimension_numbers<[1], [1], [0], [0], [0, 0, 1, 0], [], []>} : vector<8x8xf32>, vector<8x8xf32>, vector<8x8xf32> -> vector<8x8xf32>
    %cst_43 = arith.constant -1.000000e+09 : f32
    %83 = vector.broadcast %cst_43 : f32 to vector<8x8xf32>
    %84 = arith.select %16, %83, %82 : vector<8x8xi1>, vector<8x8xf32>
    %cst_44 = arith.constant dense<0xFF800000> : vector<8xf32>
    %85 = vector.multi_reduction <maximumf>, %84, %cst_44 [1] : vector<8x8xf32> to vector<8xf32>
    %86 = vector.shape_cast %85 : vector<8xf32> to vector<8x1xf32>
    %87 = vector.broadcast %86 : vector<8x1xf32> to vector<8x8xf32>
    %88 = arith.subf %84, %87 : vector<8x8xf32>
    %89 = math.exp %88 : vector<8x8xf32>
    %cst_45 = arith.constant dense<0.000000e+00> : vector<8xf32>
    %90 = vector.multi_reduction <add>, %89, %cst_45 [1] : vector<8x8xf32> to vector<8xf32>
    %91 = vector.shape_cast %90 : vector<8xf32> to vector<8x1xf32>
    %92 = tpu.reciprocal %91 {approx = true} : vector<8x1xf32> -> vector<8x1xf32>
    %93 = vector.broadcast %92 : vector<8x1xf32> to vector<8x8xf32>
    %94 = arith.mulf %89, %93 : vector<8x8xf32>
    %cst_46 = arith.constant dense<0.000000e+00> : vector<8x8xf32>
    %95 = tpu.matmul %94, %81, %cst_46 {dimension_numbers = #tpu.dot_dimension_numbers<[1], [0], [0], [1], [0, 0, 1, 1], [], []>} : vector<8x8xf32>, vector<8x8xf32>, vector<8x8xf32> -> vector<8x8xf32>
    %96 = tpu.concatenate %44, %61, %78, %95 in 1 : vector<8x8xf32>, vector<8x8xf32>, vector<8x8xf32>, vector<8x8xf32> -> vector<8x32xf32>
    %cst_47 = arith.constant dense<0.000000e+00> : vector<8x128xf32>
    %97 = tpu.matmul %96, %24, %cst_47 {dimension_numbers = #tpu.dot_dimension_numbers<[1], [0], [0], [1], [0, 0, 1, 1], [], []>} : vector<8x32xf32>, vector<32x128xf32>, vector<8x128xf32> -> vector<8x128xf32>
    %98 = arith.addf %97, %1 : vector<8x128xf32>
    %cst_48 = arith.constant dense<0.000000e+00> : vector<8xf32>
    %99 = vector.multi_reduction <add>, %98, %cst_48 [1] : vector<8x128xf32> to vector<8xf32>
    %100 = vector.shape_cast %99 : vector<8xf32> to vector<8x1xf32>
    %cst_49 = arith.constant 1.280000e+02 : f32
    %101 = vector.broadcast %cst_49 : f32 to vector<8x1xf32>
    %102 = arith.divf %100, %101 : vector<8x1xf32>
    %103 = vector.broadcast %102 : vector<8x1xf32> to vector<8x128xf32>
    %104 = arith.subf %98, %103 : vector<8x128xf32>
    %105 = arith.mulf %104, %104 : vector<8x128xf32>
    %cst_50 = arith.constant dense<0.000000e+00> : vector<8xf32>
    %106 = vector.multi_reduction <add>, %105, %cst_50 [1] : vector<8x128xf32> to vector<8xf32>
    %107 = vector.shape_cast %106 : vector<8xf32> to vector<8x1xf32>
    %cst_51 = arith.constant 1.280000e+02 : f32
    %108 = vector.broadcast %cst_51 : f32 to vector<8x1xf32>
    %109 = arith.divf %107, %108 : vector<8x1xf32>
    %110 = vector.broadcast %102 : vector<8x1xf32> to vector<8x128xf32>
    %111 = arith.subf %98, %110 : vector<8x128xf32>
    %cst_52 = arith.constant 9.99999974E-6 : f32
    %112 = vector.broadcast %cst_52 : f32 to vector<8x1xf32>
    %113 = arith.addf %109, %112 : vector<8x1xf32>
    %114 = math.rsqrt %113 : vector<8x1xf32>
    %115 = vector.broadcast %114 : vector<8x1xf32> to vector<8x128xf32>
    %116 = arith.mulf %111, %115 : vector<8x128xf32>
    %117 = tpu.concatenate %43, %60, %77, %94 in 1 : vector<8x8xf32>, vector<8x8xf32>, vector<8x8xf32>, vector<8x8xf32> -> vector<8x32xf32>
    %c0_53 = arith.constant 0 : index
    %c0_54 = arith.constant 0 : index
    %c0_55 = arith.constant 0 : index
    %118 = vector.load %arg9[%c0_53, %c0_54, %c0_55] : memref<2x128x32xf32, #tpu.memory_space<vmem>>, vector<1x128x32xf32>
    %119 = vector.shape_cast %118 : vector<1x128x32xf32> to vector<128x32xf32>
    %c0_56 = arith.constant 0 : index
    %c0_57 = arith.constant 0 : index
    %c0_58 = arith.constant 0 : index
    %120 = vector.load %arg10[%c0_56, %c0_57, %c0_58] : memref<2x128x32xf32, #tpu.memory_space<vmem>>, vector<1x128x32xf32>
    %121 = vector.shape_cast %120 : vector<1x128x32xf32> to vector<128x32xf32>
    %c0_59 = arith.constant 0 : index
    %c0_60 = arith.constant 0 : index
    %c0_61 = arith.constant 0 : index
    %122 = vector.load %arg11[%c0_59, %c0_60, %c0_61] : memref<2x128x32xf32, #tpu.memory_space<vmem>>, vector<1x128x32xf32>
    %123 = vector.shape_cast %122 : vector<1x128x32xf32> to vector<128x32xf32>
    %c0_62 = arith.constant 0 : index
    %c0_63 = arith.constant 0 : index
    %c0_64 = arith.constant 0 : index
    %124 = vector.load %arg12[%c0_62, %c0_63, %c0_64] : memref<2x32x128xf32, #tpu.memory_space<vmem>>, vector<1x32x128xf32>
    %125 = vector.shape_cast %124 : vector<1x32x128xf32> to vector<32x128xf32>
    %cst_65 = arith.constant dense<0.000000e+00> : vector<8x32xf32>
    %126 = tpu.matmul %116, %119, %cst_65 {dimension_numbers = #tpu.dot_dimension_numbers<[1], [0], [0], [1], [0, 0, 1, 1], [], []>} : vector<8x128xf32>, vector<128x32xf32>, vector<8x32xf32> -> vector<8x32xf32>
    %cst_66 = arith.constant dense<0.000000e+00> : vector<8x32xf32>
    %127 = tpu.matmul %3, %121, %cst_66 {dimension_numbers = #tpu.dot_dimension_numbers<[1], [0], [0], [1], [0, 0, 1, 1], [], []>} : vector<8x128xf32>, vector<128x32xf32>, vector<8x32xf32> -> vector<8x32xf32>
    %cst_67 = arith.constant dense<0.000000e+00> : vector<8x32xf32>
    %128 = tpu.matmul %3, %123, %cst_67 {dimension_numbers = #tpu.dot_dimension_numbers<[1], [0], [0], [1], [0, 0, 1, 1], [], []>} : vector<8x128xf32>, vector<128x32xf32>, vector<8x32xf32> -> vector<8x32xf32>
    %129 = vector.extract_strided_slice %126 {offsets = [0, 0], sizes = [8, 8], strides = [1, 1]} : vector<8x32xf32> to vector<8x8xf32>
    %130 = vector.extract_strided_slice %127 {offsets = [0, 0], sizes = [8, 8], strides = [1, 1]} : vector<8x32xf32> to vector<8x8xf32>
    %131 = vector.extract_strided_slice %128 {offsets = [0, 0], sizes = [8, 8], strides = [1, 1]} : vector<8x32xf32> to vector<8x8xf32>
    %cst_68 = arith.constant dense<0.000000e+00> : vector<8x8xf32>
    %132 = tpu.matmul %129, %130, %cst_68 {dimension_numbers = #tpu.dot_dimension_numbers<[1], [1], [0], [0], [0, 0, 1, 0], [], []>} : vector<8x8xf32>, vector<8x8xf32>, vector<8x8xf32> -> vector<8x8xf32>
    %cst_69 = arith.constant -1.000000e+09 : f32
    %133 = vector.shape_cast %11 : vector<1x8xi1> to vector<1x8xi1>
    %134 = vector.broadcast %133 : vector<1x8xi1> to vector<8x8xi1>
    %135 = vector.broadcast %cst_69 : f32 to vector<8x8xf32>
    %136 = arith.select %134, %135, %132 : vector<8x8xi1>, vector<8x8xf32>
    %cst_70 = arith.constant dense<0xFF800000> : vector<8xf32>
    %137 = vector.multi_reduction <maximumf>, %136, %cst_70 [1] : vector<8x8xf32> to vector<8xf32>
    %138 = vector.shape_cast %137 : vector<8xf32> to vector<8x1xf32>
    %139 = vector.broadcast %138 : vector<8x1xf32> to vector<8x8xf32>
    %140 = arith.subf %136, %139 : vector<8x8xf32>
    %141 = math.exp %140 : vector<8x8xf32>
    %cst_71 = arith.constant dense<0.000000e+00> : vector<8xf32>
    %142 = vector.multi_reduction <add>, %141, %cst_71 [1] : vector<8x8xf32> to vector<8xf32>
    %143 = vector.shape_cast %142 : vector<8xf32> to vector<8x1xf32>
    %144 = tpu.reciprocal %143 {approx = true} : vector<8x1xf32> -> vector<8x1xf32>
    %145 = vector.broadcast %144 : vector<8x1xf32> to vector<8x8xf32>
    %146 = arith.mulf %141, %145 : vector<8x8xf32>
    %cst_72 = arith.constant dense<0.000000e+00> : vector<8x8xf32>
    %147 = tpu.matmul %146, %131, %cst_72 {dimension_numbers = #tpu.dot_dimension_numbers<[1], [0], [0], [1], [0, 0, 1, 1], [], []>} : vector<8x8xf32>, vector<8x8xf32>, vector<8x8xf32> -> vector<8x8xf32>
    %148 = vector.extract_strided_slice %126 {offsets = [0, 8], sizes = [8, 8], strides = [1, 1]} : vector<8x32xf32> to vector<8x8xf32>
    %149 = vector.extract_strided_slice %127 {offsets = [0, 8], sizes = [8, 8], strides = [1, 1]} : vector<8x32xf32> to vector<8x8xf32>
    %150 = vector.extract_strided_slice %128 {offsets = [0, 8], sizes = [8, 8], strides = [1, 1]} : vector<8x32xf32> to vector<8x8xf32>
    %cst_73 = arith.constant dense<0.000000e+00> : vector<8x8xf32>
    %151 = tpu.matmul %148, %149, %cst_73 {dimension_numbers = #tpu.dot_dimension_numbers<[1], [1], [0], [0], [0, 0, 1, 0], [], []>} : vector<8x8xf32>, vector<8x8xf32>, vector<8x8xf32> -> vector<8x8xf32>
    %cst_74 = arith.constant -1.000000e+09 : f32
    %152 = vector.shape_cast %11 : vector<1x8xi1> to vector<1x8xi1>
    %153 = vector.broadcast %152 : vector<1x8xi1> to vector<8x8xi1>
    %154 = vector.broadcast %cst_74 : f32 to vector<8x8xf32>
    %155 = arith.select %153, %154, %151 : vector<8x8xi1>, vector<8x8xf32>
    %cst_75 = arith.constant dense<0xFF800000> : vector<8xf32>
    %156 = vector.multi_reduction <maximumf>, %155, %cst_75 [1] : vector<8x8xf32> to vector<8xf32>
    %157 = vector.shape_cast %156 : vector<8xf32> to vector<8x1xf32>
    %158 = vector.broadcast %157 : vector<8x1xf32> to vector<8x8xf32>
    %159 = arith.subf %155, %158 : vector<8x8xf32>
    %160 = math.exp %159 : vector<8x8xf32>
    %cst_76 = arith.constant dense<0.000000e+00> : vector<8xf32>
    %161 = vector.multi_reduction <add>, %160, %cst_76 [1] : vector<8x8xf32> to vector<8xf32>
    %162 = vector.shape_cast %161 : vector<8xf32> to vector<8x1xf32>
    %163 = tpu.reciprocal %162 {approx = true} : vector<8x1xf32> -> vector<8x1xf32>
    %164 = vector.broadcast %163 : vector<8x1xf32> to vector<8x8xf32>
    %165 = arith.mulf %160, %164 : vector<8x8xf32>
    %cst_77 = arith.constant dense<0.000000e+00> : vector<8x8xf32>
    %166 = tpu.matmul %165, %150, %cst_77 {dimension_numbers = #tpu.dot_dimension_numbers<[1], [0], [0], [1], [0, 0, 1, 1], [], []>} : vector<8x8xf32>, vector<8x8xf32>, vector<8x8xf32> -> vector<8x8xf32>
    %167 = vector.extract_strided_slice %126 {offsets = [0, 16], sizes = [8, 8], strides = [1, 1]} : vector<8x32xf32> to vector<8x8xf32>
    %168 = vector.extract_strided_slice %127 {offsets = [0, 16], sizes = [8, 8], strides = [1, 1]} : vector<8x32xf32> to vector<8x8xf32>
    %169 = vector.extract_strided_slice %128 {offsets = [0, 16], sizes = [8, 8], strides = [1, 1]} : vector<8x32xf32> to vector<8x8xf32>
    %cst_78 = arith.constant dense<0.000000e+00> : vector<8x8xf32>
    %170 = tpu.matmul %167, %168, %cst_78 {dimension_numbers = #tpu.dot_dimension_numbers<[1], [1], [0], [0], [0, 0, 1, 0], [], []>} : vector<8x8xf32>, vector<8x8xf32>, vector<8x8xf32> -> vector<8x8xf32>
    %cst_79 = arith.constant -1.000000e+09 : f32
    %171 = vector.shape_cast %11 : vector<1x8xi1> to vector<1x8xi1>
    %172 = vector.broadcast %171 : vector<1x8xi1> to vector<8x8xi1>
    %173 = vector.broadcast %cst_79 : f32 to vector<8x8xf32>
    %174 = arith.select %172, %173, %170 : vector<8x8xi1>, vector<8x8xf32>
    %cst_80 = arith.constant dense<0xFF800000> : vector<8xf32>
    %175 = vector.multi_reduction <maximumf>, %174, %cst_80 [1] : vector<8x8xf32> to vector<8xf32>
    %176 = vector.shape_cast %175 : vector<8xf32> to vector<8x1xf32>
    %177 = vector.broadcast %176 : vector<8x1xf32> to vector<8x8xf32>
    %178 = arith.subf %174, %177 : vector<8x8xf32>
    %179 = math.exp %178 : vector<8x8xf32>
    %cst_81 = arith.constant dense<0.000000e+00> : vector<8xf32>
    %180 = vector.multi_reduction <add>, %179, %cst_81 [1] : vector<8x8xf32> to vector<8xf32>
    %181 = vector.shape_cast %180 : vector<8xf32> to vector<8x1xf32>
    %182 = tpu.reciprocal %181 {approx = true} : vector<8x1xf32> -> vector<8x1xf32>
    %183 = vector.broadcast %182 : vector<8x1xf32> to vector<8x8xf32>
    %184 = arith.mulf %179, %183 : vector<8x8xf32>
    %cst_82 = arith.constant dense<0.000000e+00> : vector<8x8xf32>
    %185 = tpu.matmul %184, %169, %cst_82 {dimension_numbers = #tpu.dot_dimension_numbers<[1], [0], [0], [1], [0, 0, 1, 1], [], []>} : vector<8x8xf32>, vector<8x8xf32>, vector<8x8xf32> -> vector<8x8xf32>
    %186 = vector.extract_strided_slice %126 {offsets = [0, 24], sizes = [8, 8], strides = [1, 1]} : vector<8x32xf32> to vector<8x8xf32>
    %187 = vector.extract_strided_slice %127 {offsets = [0, 24], sizes = [8, 8], strides = [1, 1]} : vector<8x32xf32> to vector<8x8xf32>
    %188 = vector.extract_strided_slice %128 {offsets = [0, 24], sizes = [8, 8], strides = [1, 1]} : vector<8x32xf32> to vector<8x8xf32>
    %cst_83 = arith.constant dense<0.000000e+00> : vector<8x8xf32>
    %189 = tpu.matmul %186, %187, %cst_83 {dimension_numbers = #tpu.dot_dimension_numbers<[1], [1], [0], [0], [0, 0, 1, 0], [], []>} : vector<8x8xf32>, vector<8x8xf32>, vector<8x8xf32> -> vector<8x8xf32>
    %cst_84 = arith.constant -1.000000e+09 : f32
    %190 = vector.shape_cast %11 : vector<1x8xi1> to vector<1x8xi1>
    %191 = vector.broadcast %190 : vector<1x8xi1> to vector<8x8xi1>
    %192 = vector.broadcast %cst_84 : f32 to vector<8x8xf32>
    %193 = arith.select %191, %192, %189 : vector<8x8xi1>, vector<8x8xf32>
    %cst_85 = arith.constant dense<0xFF800000> : vector<8xf32>
    %194 = vector.multi_reduction <maximumf>, %193, %cst_85 [1] : vector<8x8xf32> to vector<8xf32>
    %195 = vector.shape_cast %194 : vector<8xf32> to vector<8x1xf32>
    %196 = vector.broadcast %195 : vector<8x1xf32> to vector<8x8xf32>
    %197 = arith.subf %193, %196 : vector<8x8xf32>
    %198 = math.exp %197 : vector<8x8xf32>
    %cst_86 = arith.constant dense<0.000000e+00> : vector<8xf32>
    %199 = vector.multi_reduction <add>, %198, %cst_86 [1] : vector<8x8xf32> to vector<8xf32>
    %200 = vector.shape_cast %199 : vector<8xf32> to vector<8x1xf32>
    %201 = tpu.reciprocal %200 {approx = true} : vector<8x1xf32> -> vector<8x1xf32>
    %202 = vector.broadcast %201 : vector<8x1xf32> to vector<8x8xf32>
    %203 = arith.mulf %198, %202 : vector<8x8xf32>
    %cst_87 = arith.constant dense<0.000000e+00> : vector<8x8xf32>
    %204 = tpu.matmul %203, %188, %cst_87 {dimension_numbers = #tpu.dot_dimension_numbers<[1], [0], [0], [1], [0, 0, 1, 1], [], []>} : vector<8x8xf32>, vector<8x8xf32>, vector<8x8xf32> -> vector<8x8xf32>
    %205 = tpu.concatenate %147, %166, %185, %204 in 1 : vector<8x8xf32>, vector<8x8xf32>, vector<8x8xf32>, vector<8x8xf32> -> vector<8x32xf32>
    %cst_88 = arith.constant dense<0.000000e+00> : vector<8x128xf32>
    %206 = tpu.matmul %205, %125, %cst_88 {dimension_numbers = #tpu.dot_dimension_numbers<[1], [0], [0], [1], [0, 0, 1, 1], [], []>} : vector<8x32xf32>, vector<32x128xf32>, vector<8x128xf32> -> vector<8x128xf32>
    %207 = arith.addf %206, %116 : vector<8x128xf32>
    %cst_89 = arith.constant dense<0.000000e+00> : vector<8xf32>
    %208 = vector.multi_reduction <add>, %207, %cst_89 [1] : vector<8x128xf32> to vector<8xf32>
    %209 = vector.shape_cast %208 : vector<8xf32> to vector<8x1xf32>
    %cst_90 = arith.constant 1.280000e+02 : f32
    %210 = vector.broadcast %cst_90 : f32 to vector<8x1xf32>
    %211 = arith.divf %209, %210 : vector<8x1xf32>
    %212 = vector.broadcast %211 : vector<8x1xf32> to vector<8x128xf32>
    %213 = arith.subf %207, %212 : vector<8x128xf32>
    %214 = arith.mulf %213, %213 : vector<8x128xf32>
    %cst_91 = arith.constant dense<0.000000e+00> : vector<8xf32>
    %215 = vector.multi_reduction <add>, %214, %cst_91 [1] : vector<8x128xf32> to vector<8xf32>
    %216 = vector.shape_cast %215 : vector<8xf32> to vector<8x1xf32>
    %cst_92 = arith.constant 1.280000e+02 : f32
    %217 = vector.broadcast %cst_92 : f32 to vector<8x1xf32>
    %218 = arith.divf %216, %217 : vector<8x1xf32>
    %219 = vector.broadcast %211 : vector<8x1xf32> to vector<8x128xf32>
    %220 = arith.subf %207, %219 : vector<8x128xf32>
    %cst_93 = arith.constant 9.99999974E-6 : f32
    %221 = vector.broadcast %cst_93 : f32 to vector<8x1xf32>
    %222 = arith.addf %218, %221 : vector<8x1xf32>
    %223 = math.rsqrt %222 : vector<8x1xf32>
    %224 = vector.broadcast %223 : vector<8x1xf32> to vector<8x128xf32>
    %225 = arith.mulf %220, %224 : vector<8x128xf32>
    %226 = tpu.concatenate %146, %165, %184, %203 in 1 : vector<8x8xf32>, vector<8x8xf32>, vector<8x8xf32>, vector<8x8xf32> -> vector<8x32xf32>
    %c0_94 = arith.constant 0 : index
    %c0_95 = arith.constant 0 : index
    %c0_96 = arith.constant 0 : index
    %227 = vector.load %arg13[%c0_94, %c0_95, %c0_96] : memref<2x128x256xf32, #tpu.memory_space<vmem>>, vector<1x128x256xf32>
    %228 = vector.shape_cast %227 : vector<1x128x256xf32> to vector<128x256xf32>
    %cst_97 = arith.constant dense<0.000000e+00> : vector<8x256xf32>
    %229 = tpu.matmul %225, %228, %cst_97 {dimension_numbers = #tpu.dot_dimension_numbers<[1], [0], [0], [1], [0, 0, 1, 1], [], []>} : vector<8x128xf32>, vector<128x256xf32>, vector<8x256xf32> -> vector<8x256xf32>
    %cst_98 = arith.constant 0.000000e+00 : f32
    %230 = vector.broadcast %cst_98 : f32 to vector<8x256xf32>
    %231 = arith.maximumf %229, %230 : vector<8x256xf32>
    %c0_99 = arith.constant 0 : index
    %c0_100 = arith.constant 0 : index
    %c0_101 = arith.constant 0 : index
    %232 = vector.load %arg14[%c0_99, %c0_100, %c0_101] : memref<2x256x128xf32, #tpu.memory_space<vmem>>, vector<1x256x128xf32>
    %233 = vector.shape_cast %232 : vector<1x256x128xf32> to vector<256x128xf32>
    %cst_102 = arith.constant dense<0.000000e+00> : vector<8x128xf32>
    %234 = tpu.matmul %231, %233, %cst_102 {dimension_numbers = #tpu.dot_dimension_numbers<[1], [0], [0], [1], [0, 0, 1, 1], [], []>} : vector<8x256xf32>, vector<256x128xf32>, vector<8x128xf32> -> vector<8x128xf32>
    %235 = arith.addf %234, %225 : vector<8x128xf32>
    %cst_103 = arith.constant dense<0.000000e+00> : vector<8xf32>
    %236 = vector.multi_reduction <add>, %235, %cst_103 [1] : vector<8x128xf32> to vector<8xf32>
    %237 = vector.shape_cast %236 : vector<8xf32> to vector<8x1xf32>
    %cst_104 = arith.constant 1.280000e+02 : f32
    %238 = vector.broadcast %cst_104 : f32 to vector<8x1xf32>
    %239 = arith.divf %237, %238 : vector<8x1xf32>
    %240 = vector.broadcast %239 : vector<8x1xf32> to vector<8x128xf32>
    %241 = arith.subf %235, %240 : vector<8x128xf32>
    %242 = arith.mulf %241, %241 : vector<8x128xf32>
    %cst_105 = arith.constant dense<0.000000e+00> : vector<8xf32>
    %243 = vector.multi_reduction <add>, %242, %cst_105 [1] : vector<8x128xf32> to vector<8xf32>
    %244 = vector.shape_cast %243 : vector<8xf32> to vector<8x1xf32>
    %cst_106 = arith.constant 1.280000e+02 : f32
    %245 = vector.broadcast %cst_106 : f32 to vector<8x1xf32>
    %246 = arith.divf %244, %245 : vector<8x1xf32>
    %247 = vector.broadcast %239 : vector<8x1xf32> to vector<8x128xf32>
    %248 = arith.subf %235, %247 : vector<8x128xf32>
    %cst_107 = arith.constant 9.99999974E-6 : f32
    %249 = vector.broadcast %cst_107 : f32 to vector<8x1xf32>
    %250 = arith.addf %246, %249 : vector<8x1xf32>
    %251 = math.rsqrt %250 : vector<8x1xf32>
    %252 = vector.broadcast %251 : vector<8x1xf32> to vector<8x128xf32>
    %253 = arith.mulf %248, %252 : vector<8x128xf32>
    %c1 = arith.constant 1 : index
    %c0_108 = arith.constant 0 : index
    %c0_109 = arith.constant 0 : index
    %254 = vector.load %arg5[%c1, %c0_108, %c0_109] : memref<2x128x32xf32, #tpu.memory_space<vmem>>, vector<1x128x32xf32>
    %255 = vector.shape_cast %254 : vector<1x128x32xf32> to vector<128x32xf32>
    %c1_110 = arith.constant 1 : index
    %c0_111 = arith.constant 0 : index
    %c0_112 = arith.constant 0 : index
    %256 = vector.load %arg6[%c1_110, %c0_111, %c0_112] : memref<2x128x32xf32, #tpu.memory_space<vmem>>, vector<1x128x32xf32>
    %257 = vector.shape_cast %256 : vector<1x128x32xf32> to vector<128x32xf32>
    %c1_113 = arith.constant 1 : index
    %c0_114 = arith.constant 0 : index
    %c0_115 = arith.constant 0 : index
    %258 = vector.load %arg7[%c1_113, %c0_114, %c0_115] : memref<2x128x32xf32, #tpu.memory_space<vmem>>, vector<1x128x32xf32>
    %259 = vector.shape_cast %258 : vector<1x128x32xf32> to vector<128x32xf32>
    %c1_116 = arith.constant 1 : index
    %c0_117 = arith.constant 0 : index
    %c0_118 = arith.constant 0 : index
    %260 = vector.load %arg8[%c1_116, %c0_117, %c0_118] : memref<2x32x128xf32, #tpu.memory_space<vmem>>, vector<1x32x128xf32>
    %261 = vector.shape_cast %260 : vector<1x32x128xf32> to vector<32x128xf32>
    %cst_119 = arith.constant dense<0.000000e+00> : vector<8x32xf32>
    %262 = tpu.matmul %253, %255, %cst_119 {dimension_numbers = #tpu.dot_dimension_numbers<[1], [0], [0], [1], [0, 0, 1, 1], [], []>} : vector<8x128xf32>, vector<128x32xf32>, vector<8x32xf32> -> vector<8x32xf32>
    %cst_120 = arith.constant dense<0.000000e+00> : vector<8x32xf32>
    %263 = tpu.matmul %253, %257, %cst_120 {dimension_numbers = #tpu.dot_dimension_numbers<[1], [0], [0], [1], [0, 0, 1, 1], [], []>} : vector<8x128xf32>, vector<128x32xf32>, vector<8x32xf32> -> vector<8x32xf32>
    %cst_121 = arith.constant dense<0.000000e+00> : vector<8x32xf32>
    %264 = tpu.matmul %253, %259, %cst_121 {dimension_numbers = #tpu.dot_dimension_numbers<[1], [0], [0], [1], [0, 0, 1, 1], [], []>} : vector<8x128xf32>, vector<128x32xf32>, vector<8x32xf32> -> vector<8x32xf32>
    %265 = vector.extract_strided_slice %262 {offsets = [0, 0], sizes = [8, 8], strides = [1, 1]} : vector<8x32xf32> to vector<8x8xf32>
    %266 = vector.extract_strided_slice %263 {offsets = [0, 0], sizes = [8, 8], strides = [1, 1]} : vector<8x32xf32> to vector<8x8xf32>
    %267 = vector.extract_strided_slice %264 {offsets = [0, 0], sizes = [8, 8], strides = [1, 1]} : vector<8x32xf32> to vector<8x8xf32>
    %cst_122 = arith.constant dense<0.000000e+00> : vector<8x8xf32>
    %268 = tpu.matmul %265, %266, %cst_122 {dimension_numbers = #tpu.dot_dimension_numbers<[1], [1], [0], [0], [0, 0, 1, 0], [], []>} : vector<8x8xf32>, vector<8x8xf32>, vector<8x8xf32> -> vector<8x8xf32>
    %cst_123 = arith.constant -1.000000e+09 : f32
    %269 = vector.broadcast %cst_123 : f32 to vector<8x8xf32>
    %270 = arith.select %16, %269, %268 : vector<8x8xi1>, vector<8x8xf32>
    %cst_124 = arith.constant dense<0xFF800000> : vector<8xf32>
    %271 = vector.multi_reduction <maximumf>, %270, %cst_124 [1] : vector<8x8xf32> to vector<8xf32>
    %272 = vector.shape_cast %271 : vector<8xf32> to vector<8x1xf32>
    %273 = vector.broadcast %272 : vector<8x1xf32> to vector<8x8xf32>
    %274 = arith.subf %270, %273 : vector<8x8xf32>
    %275 = math.exp %274 : vector<8x8xf32>
    %cst_125 = arith.constant dense<0.000000e+00> : vector<8xf32>
    %276 = vector.multi_reduction <add>, %275, %cst_125 [1] : vector<8x8xf32> to vector<8xf32>
    %277 = vector.shape_cast %276 : vector<8xf32> to vector<8x1xf32>
    %278 = tpu.reciprocal %277 {approx = true} : vector<8x1xf32> -> vector<8x1xf32>
    %279 = vector.broadcast %278 : vector<8x1xf32> to vector<8x8xf32>
    %280 = arith.mulf %275, %279 : vector<8x8xf32>
    %cst_126 = arith.constant dense<0.000000e+00> : vector<8x8xf32>
    %281 = tpu.matmul %280, %267, %cst_126 {dimension_numbers = #tpu.dot_dimension_numbers<[1], [0], [0], [1], [0, 0, 1, 1], [], []>} : vector<8x8xf32>, vector<8x8xf32>, vector<8x8xf32> -> vector<8x8xf32>
    %282 = vector.extract_strided_slice %262 {offsets = [0, 8], sizes = [8, 8], strides = [1, 1]} : vector<8x32xf32> to vector<8x8xf32>
    %283 = vector.extract_strided_slice %263 {offsets = [0, 8], sizes = [8, 8], strides = [1, 1]} : vector<8x32xf32> to vector<8x8xf32>
    %284 = vector.extract_strided_slice %264 {offsets = [0, 8], sizes = [8, 8], strides = [1, 1]} : vector<8x32xf32> to vector<8x8xf32>
    %cst_127 = arith.constant dense<0.000000e+00> : vector<8x8xf32>
    %285 = tpu.matmul %282, %283, %cst_127 {dimension_numbers = #tpu.dot_dimension_numbers<[1], [1], [0], [0], [0, 0, 1, 0], [], []>} : vector<8x8xf32>, vector<8x8xf32>, vector<8x8xf32> -> vector<8x8xf32>
    %cst_128 = arith.constant -1.000000e+09 : f32
    %286 = vector.broadcast %cst_128 : f32 to vector<8x8xf32>
    %287 = arith.select %16, %286, %285 : vector<8x8xi1>, vector<8x8xf32>
    %cst_129 = arith.constant dense<0xFF800000> : vector<8xf32>
    %288 = vector.multi_reduction <maximumf>, %287, %cst_129 [1] : vector<8x8xf32> to vector<8xf32>
    %289 = vector.shape_cast %288 : vector<8xf32> to vector<8x1xf32>
    %290 = vector.broadcast %289 : vector<8x1xf32> to vector<8x8xf32>
    %291 = arith.subf %287, %290 : vector<8x8xf32>
    %292 = math.exp %291 : vector<8x8xf32>
    %cst_130 = arith.constant dense<0.000000e+00> : vector<8xf32>
    %293 = vector.multi_reduction <add>, %292, %cst_130 [1] : vector<8x8xf32> to vector<8xf32>
    %294 = vector.shape_cast %293 : vector<8xf32> to vector<8x1xf32>
    %295 = tpu.reciprocal %294 {approx = true} : vector<8x1xf32> -> vector<8x1xf32>
    %296 = vector.broadcast %295 : vector<8x1xf32> to vector<8x8xf32>
    %297 = arith.mulf %292, %296 : vector<8x8xf32>
    %cst_131 = arith.constant dense<0.000000e+00> : vector<8x8xf32>
    %298 = tpu.matmul %297, %284, %cst_131 {dimension_numbers = #tpu.dot_dimension_numbers<[1], [0], [0], [1], [0, 0, 1, 1], [], []>} : vector<8x8xf32>, vector<8x8xf32>, vector<8x8xf32> -> vector<8x8xf32>
    %299 = vector.extract_strided_slice %262 {offsets = [0, 16], sizes = [8, 8], strides = [1, 1]} : vector<8x32xf32> to vector<8x8xf32>
    %300 = vector.extract_strided_slice %263 {offsets = [0, 16], sizes = [8, 8], strides = [1, 1]} : vector<8x32xf32> to vector<8x8xf32>
    %301 = vector.extract_strided_slice %264 {offsets = [0, 16], sizes = [8, 8], strides = [1, 1]} : vector<8x32xf32> to vector<8x8xf32>
    %cst_132 = arith.constant dense<0.000000e+00> : vector<8x8xf32>
    %302 = tpu.matmul %299, %300, %cst_132 {dimension_numbers = #tpu.dot_dimension_numbers<[1], [1], [0], [0], [0, 0, 1, 0], [], []>} : vector<8x8xf32>, vector<8x8xf32>, vector<8x8xf32> -> vector<8x8xf32>
    %cst_133 = arith.constant -1.000000e+09 : f32
    %303 = vector.broadcast %cst_133 : f32 to vector<8x8xf32>
    %304 = arith.select %16, %303, %302 : vector<8x8xi1>, vector<8x8xf32>
    %cst_134 = arith.constant dense<0xFF800000> : vector<8xf32>
    %305 = vector.multi_reduction <maximumf>, %304, %cst_134 [1] : vector<8x8xf32> to vector<8xf32>
    %306 = vector.shape_cast %305 : vector<8xf32> to vector<8x1xf32>
    %307 = vector.broadcast %306 : vector<8x1xf32> to vector<8x8xf32>
    %308 = arith.subf %304, %307 : vector<8x8xf32>
    %309 = math.exp %308 : vector<8x8xf32>
    %cst_135 = arith.constant dense<0.000000e+00> : vector<8xf32>
    %310 = vector.multi_reduction <add>, %309, %cst_135 [1] : vector<8x8xf32> to vector<8xf32>
    %311 = vector.shape_cast %310 : vector<8xf32> to vector<8x1xf32>
    %312 = tpu.reciprocal %311 {approx = true} : vector<8x1xf32> -> vector<8x1xf32>
    %313 = vector.broadcast %312 : vector<8x1xf32> to vector<8x8xf32>
    %314 = arith.mulf %309, %313 : vector<8x8xf32>
    %cst_136 = arith.constant dense<0.000000e+00> : vector<8x8xf32>
    %315 = tpu.matmul %314, %301, %cst_136 {dimension_numbers = #tpu.dot_dimension_numbers<[1], [0], [0], [1], [0, 0, 1, 1], [], []>} : vector<8x8xf32>, vector<8x8xf32>, vector<8x8xf32> -> vector<8x8xf32>
    %316 = vector.extract_strided_slice %262 {offsets = [0, 24], sizes = [8, 8], strides = [1, 1]} : vector<8x32xf32> to vector<8x8xf32>
    %317 = vector.extract_strided_slice %263 {offsets = [0, 24], sizes = [8, 8], strides = [1, 1]} : vector<8x32xf32> to vector<8x8xf32>
    %318 = vector.extract_strided_slice %264 {offsets = [0, 24], sizes = [8, 8], strides = [1, 1]} : vector<8x32xf32> to vector<8x8xf32>
    %cst_137 = arith.constant dense<0.000000e+00> : vector<8x8xf32>
    %319 = tpu.matmul %316, %317, %cst_137 {dimension_numbers = #tpu.dot_dimension_numbers<[1], [1], [0], [0], [0, 0, 1, 0], [], []>} : vector<8x8xf32>, vector<8x8xf32>, vector<8x8xf32> -> vector<8x8xf32>
    %cst_138 = arith.constant -1.000000e+09 : f32
    %320 = vector.broadcast %cst_138 : f32 to vector<8x8xf32>
    %321 = arith.select %16, %320, %319 : vector<8x8xi1>, vector<8x8xf32>
    %cst_139 = arith.constant dense<0xFF800000> : vector<8xf32>
    %322 = vector.multi_reduction <maximumf>, %321, %cst_139 [1] : vector<8x8xf32> to vector<8xf32>
    %323 = vector.shape_cast %322 : vector<8xf32> to vector<8x1xf32>
    %324 = vector.broadcast %323 : vector<8x1xf32> to vector<8x8xf32>
    %325 = arith.subf %321, %324 : vector<8x8xf32>
    %326 = math.exp %325 : vector<8x8xf32>
    %cst_140 = arith.constant dense<0.000000e+00> : vector<8xf32>
    %327 = vector.multi_reduction <add>, %326, %cst_140 [1] : vector<8x8xf32> to vector<8xf32>
    %328 = vector.shape_cast %327 : vector<8xf32> to vector<8x1xf32>
    %329 = tpu.reciprocal %328 {approx = true} : vector<8x1xf32> -> vector<8x1xf32>
    %330 = vector.broadcast %329 : vector<8x1xf32> to vector<8x8xf32>
    %331 = arith.mulf %326, %330 : vector<8x8xf32>
    %cst_141 = arith.constant dense<0.000000e+00> : vector<8x8xf32>
    %332 = tpu.matmul %331, %318, %cst_141 {dimension_numbers = #tpu.dot_dimension_numbers<[1], [0], [0], [1], [0, 0, 1, 1], [], []>} : vector<8x8xf32>, vector<8x8xf32>, vector<8x8xf32> -> vector<8x8xf32>
    %333 = tpu.concatenate %281, %298, %315, %332 in 1 : vector<8x8xf32>, vector<8x8xf32>, vector<8x8xf32>, vector<8x8xf32> -> vector<8x32xf32>
    %cst_142 = arith.constant dense<0.000000e+00> : vector<8x128xf32>
    %334 = tpu.matmul %333, %261, %cst_142 {dimension_numbers = #tpu.dot_dimension_numbers<[1], [0], [0], [1], [0, 0, 1, 1], [], []>} : vector<8x32xf32>, vector<32x128xf32>, vector<8x128xf32> -> vector<8x128xf32>
    %335 = arith.addf %334, %253 : vector<8x128xf32>
    %cst_143 = arith.constant dense<0.000000e+00> : vector<8xf32>
    %336 = vector.multi_reduction <add>, %335, %cst_143 [1] : vector<8x128xf32> to vector<8xf32>
    %337 = vector.shape_cast %336 : vector<8xf32> to vector<8x1xf32>
    %cst_144 = arith.constant 1.280000e+02 : f32
    %338 = vector.broadcast %cst_144 : f32 to vector<8x1xf32>
    %339 = arith.divf %337, %338 : vector<8x1xf32>
    %340 = vector.broadcast %339 : vector<8x1xf32> to vector<8x128xf32>
    %341 = arith.subf %335, %340 : vector<8x128xf32>
    %342 = arith.mulf %341, %341 : vector<8x128xf32>
    %cst_145 = arith.constant dense<0.000000e+00> : vector<8xf32>
    %343 = vector.multi_reduction <add>, %342, %cst_145 [1] : vector<8x128xf32> to vector<8xf32>
    %344 = vector.shape_cast %343 : vector<8xf32> to vector<8x1xf32>
    %cst_146 = arith.constant 1.280000e+02 : f32
    %345 = vector.broadcast %cst_146 : f32 to vector<8x1xf32>
    %346 = arith.divf %344, %345 : vector<8x1xf32>
    %347 = vector.broadcast %339 : vector<8x1xf32> to vector<8x128xf32>
    %348 = arith.subf %335, %347 : vector<8x128xf32>
    %cst_147 = arith.constant 9.99999974E-6 : f32
    %349 = vector.broadcast %cst_147 : f32 to vector<8x1xf32>
    %350 = arith.addf %346, %349 : vector<8x1xf32>
    %351 = math.rsqrt %350 : vector<8x1xf32>
    %352 = vector.broadcast %351 : vector<8x1xf32> to vector<8x128xf32>
    %353 = arith.mulf %348, %352 : vector<8x128xf32>
    %354 = tpu.concatenate %280, %297, %314, %331 in 1 : vector<8x8xf32>, vector<8x8xf32>, vector<8x8xf32>, vector<8x8xf32> -> vector<8x32xf32>
    %c1_148 = arith.constant 1 : index
    %c0_149 = arith.constant 0 : index
    %c0_150 = arith.constant 0 : index
    %355 = vector.load %arg9[%c1_148, %c0_149, %c0_150] : memref<2x128x32xf32, #tpu.memory_space<vmem>>, vector<1x128x32xf32>
    %356 = vector.shape_cast %355 : vector<1x128x32xf32> to vector<128x32xf32>
    %c1_151 = arith.constant 1 : index
    %c0_152 = arith.constant 0 : index
    %c0_153 = arith.constant 0 : index
    %357 = vector.load %arg10[%c1_151, %c0_152, %c0_153] : memref<2x128x32xf32, #tpu.memory_space<vmem>>, vector<1x128x32xf32>
    %358 = vector.shape_cast %357 : vector<1x128x32xf32> to vector<128x32xf32>
    %c1_154 = arith.constant 1 : index
    %c0_155 = arith.constant 0 : index
    %c0_156 = arith.constant 0 : index
    %359 = vector.load %arg11[%c1_154, %c0_155, %c0_156] : memref<2x128x32xf32, #tpu.memory_space<vmem>>, vector<1x128x32xf32>
    %360 = vector.shape_cast %359 : vector<1x128x32xf32> to vector<128x32xf32>
    %c1_157 = arith.constant 1 : index
    %c0_158 = arith.constant 0 : index
    %c0_159 = arith.constant 0 : index
    %361 = vector.load %arg12[%c1_157, %c0_158, %c0_159] : memref<2x32x128xf32, #tpu.memory_space<vmem>>, vector<1x32x128xf32>
    %362 = vector.shape_cast %361 : vector<1x32x128xf32> to vector<32x128xf32>
    %cst_160 = arith.constant dense<0.000000e+00> : vector<8x32xf32>
    %363 = tpu.matmul %353, %356, %cst_160 {dimension_numbers = #tpu.dot_dimension_numbers<[1], [0], [0], [1], [0, 0, 1, 1], [], []>} : vector<8x128xf32>, vector<128x32xf32>, vector<8x32xf32> -> vector<8x32xf32>
    %cst_161 = arith.constant dense<0.000000e+00> : vector<8x32xf32>
    %364 = tpu.matmul %3, %358, %cst_161 {dimension_numbers = #tpu.dot_dimension_numbers<[1], [0], [0], [1], [0, 0, 1, 1], [], []>} : vector<8x128xf32>, vector<128x32xf32>, vector<8x32xf32> -> vector<8x32xf32>
    %cst_162 = arith.constant dense<0.000000e+00> : vector<8x32xf32>
    %365 = tpu.matmul %3, %360, %cst_162 {dimension_numbers = #tpu.dot_dimension_numbers<[1], [0], [0], [1], [0, 0, 1, 1], [], []>} : vector<8x128xf32>, vector<128x32xf32>, vector<8x32xf32> -> vector<8x32xf32>
    %366 = vector.extract_strided_slice %363 {offsets = [0, 0], sizes = [8, 8], strides = [1, 1]} : vector<8x32xf32> to vector<8x8xf32>
    %367 = vector.extract_strided_slice %364 {offsets = [0, 0], sizes = [8, 8], strides = [1, 1]} : vector<8x32xf32> to vector<8x8xf32>
    %368 = vector.extract_strided_slice %365 {offsets = [0, 0], sizes = [8, 8], strides = [1, 1]} : vector<8x32xf32> to vector<8x8xf32>
    %cst_163 = arith.constant dense<0.000000e+00> : vector<8x8xf32>
    %369 = tpu.matmul %366, %367, %cst_163 {dimension_numbers = #tpu.dot_dimension_numbers<[1], [1], [0], [0], [0, 0, 1, 0], [], []>} : vector<8x8xf32>, vector<8x8xf32>, vector<8x8xf32> -> vector<8x8xf32>
    %cst_164 = arith.constant -1.000000e+09 : f32
    %370 = vector.shape_cast %11 : vector<1x8xi1> to vector<1x8xi1>
    %371 = vector.broadcast %370 : vector<1x8xi1> to vector<8x8xi1>
    %372 = vector.broadcast %cst_164 : f32 to vector<8x8xf32>
    %373 = arith.select %371, %372, %369 : vector<8x8xi1>, vector<8x8xf32>
    %cst_165 = arith.constant dense<0xFF800000> : vector<8xf32>
    %374 = vector.multi_reduction <maximumf>, %373, %cst_165 [1] : vector<8x8xf32> to vector<8xf32>
    %375 = vector.shape_cast %374 : vector<8xf32> to vector<8x1xf32>
    %376 = vector.broadcast %375 : vector<8x1xf32> to vector<8x8xf32>
    %377 = arith.subf %373, %376 : vector<8x8xf32>
    %378 = math.exp %377 : vector<8x8xf32>
    %cst_166 = arith.constant dense<0.000000e+00> : vector<8xf32>
    %379 = vector.multi_reduction <add>, %378, %cst_166 [1] : vector<8x8xf32> to vector<8xf32>
    %380 = vector.shape_cast %379 : vector<8xf32> to vector<8x1xf32>
    %381 = tpu.reciprocal %380 {approx = true} : vector<8x1xf32> -> vector<8x1xf32>
    %382 = vector.broadcast %381 : vector<8x1xf32> to vector<8x8xf32>
    %383 = arith.mulf %378, %382 : vector<8x8xf32>
    %cst_167 = arith.constant dense<0.000000e+00> : vector<8x8xf32>
    %384 = tpu.matmul %383, %368, %cst_167 {dimension_numbers = #tpu.dot_dimension_numbers<[1], [0], [0], [1], [0, 0, 1, 1], [], []>} : vector<8x8xf32>, vector<8x8xf32>, vector<8x8xf32> -> vector<8x8xf32>
    %385 = vector.extract_strided_slice %363 {offsets = [0, 8], sizes = [8, 8], strides = [1, 1]} : vector<8x32xf32> to vector<8x8xf32>
    %386 = vector.extract_strided_slice %364 {offsets = [0, 8], sizes = [8, 8], strides = [1, 1]} : vector<8x32xf32> to vector<8x8xf32>
    %387 = vector.extract_strided_slice %365 {offsets = [0, 8], sizes = [8, 8], strides = [1, 1]} : vector<8x32xf32> to vector<8x8xf32>
    %cst_168 = arith.constant dense<0.000000e+00> : vector<8x8xf32>
    %388 = tpu.matmul %385, %386, %cst_168 {dimension_numbers = #tpu.dot_dimension_numbers<[1], [1], [0], [0], [0, 0, 1, 0], [], []>} : vector<8x8xf32>, vector<8x8xf32>, vector<8x8xf32> -> vector<8x8xf32>
    %cst_169 = arith.constant -1.000000e+09 : f32
    %389 = vector.shape_cast %11 : vector<1x8xi1> to vector<1x8xi1>
    %390 = vector.broadcast %389 : vector<1x8xi1> to vector<8x8xi1>
    %391 = vector.broadcast %cst_169 : f32 to vector<8x8xf32>
    %392 = arith.select %390, %391, %388 : vector<8x8xi1>, vector<8x8xf32>
    %cst_170 = arith.constant dense<0xFF800000> : vector<8xf32>
    %393 = vector.multi_reduction <maximumf>, %392, %cst_170 [1] : vector<8x8xf32> to vector<8xf32>
    %394 = vector.shape_cast %393 : vector<8xf32> to vector<8x1xf32>
    %395 = vector.broadcast %394 : vector<8x1xf32> to vector<8x8xf32>
    %396 = arith.subf %392, %395 : vector<8x8xf32>
    %397 = math.exp %396 : vector<8x8xf32>
    %cst_171 = arith.constant dense<0.000000e+00> : vector<8xf32>
    %398 = vector.multi_reduction <add>, %397, %cst_171 [1] : vector<8x8xf32> to vector<8xf32>
    %399 = vector.shape_cast %398 : vector<8xf32> to vector<8x1xf32>
    %400 = tpu.reciprocal %399 {approx = true} : vector<8x1xf32> -> vector<8x1xf32>
    %401 = vector.broadcast %400 : vector<8x1xf32> to vector<8x8xf32>
    %402 = arith.mulf %397, %401 : vector<8x8xf32>
    %cst_172 = arith.constant dense<0.000000e+00> : vector<8x8xf32>
    %403 = tpu.matmul %402, %387, %cst_172 {dimension_numbers = #tpu.dot_dimension_numbers<[1], [0], [0], [1], [0, 0, 1, 1], [], []>} : vector<8x8xf32>, vector<8x8xf32>, vector<8x8xf32> -> vector<8x8xf32>
    %404 = vector.extract_strided_slice %363 {offsets = [0, 16], sizes = [8, 8], strides = [1, 1]} : vector<8x32xf32> to vector<8x8xf32>
    %405 = vector.extract_strided_slice %364 {offsets = [0, 16], sizes = [8, 8], strides = [1, 1]} : vector<8x32xf32> to vector<8x8xf32>
    %406 = vector.extract_strided_slice %365 {offsets = [0, 16], sizes = [8, 8], strides = [1, 1]} : vector<8x32xf32> to vector<8x8xf32>
    %cst_173 = arith.constant dense<0.000000e+00> : vector<8x8xf32>
    %407 = tpu.matmul %404, %405, %cst_173 {dimension_numbers = #tpu.dot_dimension_numbers<[1], [1], [0], [0], [0, 0, 1, 0], [], []>} : vector<8x8xf32>, vector<8x8xf32>, vector<8x8xf32> -> vector<8x8xf32>
    %cst_174 = arith.constant -1.000000e+09 : f32
    %408 = vector.shape_cast %11 : vector<1x8xi1> to vector<1x8xi1>
    %409 = vector.broadcast %408 : vector<1x8xi1> to vector<8x8xi1>
    %410 = vector.broadcast %cst_174 : f32 to vector<8x8xf32>
    %411 = arith.select %409, %410, %407 : vector<8x8xi1>, vector<8x8xf32>
    %cst_175 = arith.constant dense<0xFF800000> : vector<8xf32>
    %412 = vector.multi_reduction <maximumf>, %411, %cst_175 [1] : vector<8x8xf32> to vector<8xf32>
    %413 = vector.shape_cast %412 : vector<8xf32> to vector<8x1xf32>
    %414 = vector.broadcast %413 : vector<8x1xf32> to vector<8x8xf32>
    %415 = arith.subf %411, %414 : vector<8x8xf32>
    %416 = math.exp %415 : vector<8x8xf32>
    %cst_176 = arith.constant dense<0.000000e+00> : vector<8xf32>
    %417 = vector.multi_reduction <add>, %416, %cst_176 [1] : vector<8x8xf32> to vector<8xf32>
    %418 = vector.shape_cast %417 : vector<8xf32> to vector<8x1xf32>
    %419 = tpu.reciprocal %418 {approx = true} : vector<8x1xf32> -> vector<8x1xf32>
    %420 = vector.broadcast %419 : vector<8x1xf32> to vector<8x8xf32>
    %421 = arith.mulf %416, %420 : vector<8x8xf32>
    %cst_177 = arith.constant dense<0.000000e+00> : vector<8x8xf32>
    %422 = tpu.matmul %421, %406, %cst_177 {dimension_numbers = #tpu.dot_dimension_numbers<[1], [0], [0], [1], [0, 0, 1, 1], [], []>} : vector<8x8xf32>, vector<8x8xf32>, vector<8x8xf32> -> vector<8x8xf32>
    %423 = vector.extract_strided_slice %363 {offsets = [0, 24], sizes = [8, 8], strides = [1, 1]} : vector<8x32xf32> to vector<8x8xf32>
    %424 = vector.extract_strided_slice %364 {offsets = [0, 24], sizes = [8, 8], strides = [1, 1]} : vector<8x32xf32> to vector<8x8xf32>
    %425 = vector.extract_strided_slice %365 {offsets = [0, 24], sizes = [8, 8], strides = [1, 1]} : vector<8x32xf32> to vector<8x8xf32>
    %cst_178 = arith.constant dense<0.000000e+00> : vector<8x8xf32>
    %426 = tpu.matmul %423, %424, %cst_178 {dimension_numbers = #tpu.dot_dimension_numbers<[1], [1], [0], [0], [0, 0, 1, 0], [], []>} : vector<8x8xf32>, vector<8x8xf32>, vector<8x8xf32> -> vector<8x8xf32>
    %cst_179 = arith.constant -1.000000e+09 : f32
    %427 = vector.shape_cast %11 : vector<1x8xi1> to vector<1x8xi1>
    %428 = vector.broadcast %427 : vector<1x8xi1> to vector<8x8xi1>
    %429 = vector.broadcast %cst_179 : f32 to vector<8x8xf32>
    %430 = arith.select %428, %429, %426 : vector<8x8xi1>, vector<8x8xf32>
    %cst_180 = arith.constant dense<0xFF800000> : vector<8xf32>
    %431 = vector.multi_reduction <maximumf>, %430, %cst_180 [1] : vector<8x8xf32> to vector<8xf32>
    %432 = vector.shape_cast %431 : vector<8xf32> to vector<8x1xf32>
    %433 = vector.broadcast %432 : vector<8x1xf32> to vector<8x8xf32>
    %434 = arith.subf %430, %433 : vector<8x8xf32>
    %435 = math.exp %434 : vector<8x8xf32>
    %cst_181 = arith.constant dense<0.000000e+00> : vector<8xf32>
    %436 = vector.multi_reduction <add>, %435, %cst_181 [1] : vector<8x8xf32> to vector<8xf32>
    %437 = vector.shape_cast %436 : vector<8xf32> to vector<8x1xf32>
    %438 = tpu.reciprocal %437 {approx = true} : vector<8x1xf32> -> vector<8x1xf32>
    %439 = vector.broadcast %438 : vector<8x1xf32> to vector<8x8xf32>
    %440 = arith.mulf %435, %439 : vector<8x8xf32>
    %cst_182 = arith.constant dense<0.000000e+00> : vector<8x8xf32>
    %441 = tpu.matmul %440, %425, %cst_182 {dimension_numbers = #tpu.dot_dimension_numbers<[1], [0], [0], [1], [0, 0, 1, 1], [], []>} : vector<8x8xf32>, vector<8x8xf32>, vector<8x8xf32> -> vector<8x8xf32>
    %442 = tpu.concatenate %384, %403, %422, %441 in 1 : vector<8x8xf32>, vector<8x8xf32>, vector<8x8xf32>, vector<8x8xf32> -> vector<8x32xf32>
    %cst_183 = arith.constant dense<0.000000e+00> : vector<8x128xf32>
    %443 = tpu.matmul %442, %362, %cst_183 {dimension_numbers = #tpu.dot_dimension_numbers<[1], [0], [0], [1], [0, 0, 1, 1], [], []>} : vector<8x32xf32>, vector<32x128xf32>, vector<8x128xf32> -> vector<8x128xf32>
    %444 = arith.addf %443, %353 : vector<8x128xf32>
    %cst_184 = arith.constant dense<0.000000e+00> : vector<8xf32>
    %445 = vector.multi_reduction <add>, %444, %cst_184 [1] : vector<8x128xf32> to vector<8xf32>
    %446 = vector.shape_cast %445 : vector<8xf32> to vector<8x1xf32>
    %cst_185 = arith.constant 1.280000e+02 : f32
    %447 = vector.broadcast %cst_185 : f32 to vector<8x1xf32>
    %448 = arith.divf %446, %447 : vector<8x1xf32>
    %449 = vector.broadcast %448 : vector<8x1xf32> to vector<8x128xf32>
    %450 = arith.subf %444, %449 : vector<8x128xf32>
    %451 = arith.mulf %450, %450 : vector<8x128xf32>
    %cst_186 = arith.constant dense<0.000000e+00> : vector<8xf32>
    %452 = vector.multi_reduction <add>, %451, %cst_186 [1] : vector<8x128xf32> to vector<8xf32>
    %453 = vector.shape_cast %452 : vector<8xf32> to vector<8x1xf32>
    %cst_187 = arith.constant 1.280000e+02 : f32
    %454 = vector.broadcast %cst_187 : f32 to vector<8x1xf32>
    %455 = arith.divf %453, %454 : vector<8x1xf32>
    %456 = vector.broadcast %448 : vector<8x1xf32> to vector<8x128xf32>
    %457 = arith.subf %444, %456 : vector<8x128xf32>
    %cst_188 = arith.constant 9.99999974E-6 : f32
    %458 = vector.broadcast %cst_188 : f32 to vector<8x1xf32>
    %459 = arith.addf %455, %458 : vector<8x1xf32>
    %460 = math.rsqrt %459 : vector<8x1xf32>
    %461 = vector.broadcast %460 : vector<8x1xf32> to vector<8x128xf32>
    %462 = arith.mulf %457, %461 : vector<8x128xf32>
    %463 = tpu.concatenate %383, %402, %421, %440 in 1 : vector<8x8xf32>, vector<8x8xf32>, vector<8x8xf32>, vector<8x8xf32> -> vector<8x32xf32>
    %c1_189 = arith.constant 1 : index
    %c0_190 = arith.constant 0 : index
    %c0_191 = arith.constant 0 : index
    %464 = vector.load %arg13[%c1_189, %c0_190, %c0_191] : memref<2x128x256xf32, #tpu.memory_space<vmem>>, vector<1x128x256xf32>
    %465 = vector.shape_cast %464 : vector<1x128x256xf32> to vector<128x256xf32>
    %cst_192 = arith.constant dense<0.000000e+00> : vector<8x256xf32>
    %466 = tpu.matmul %462, %465, %cst_192 {dimension_numbers = #tpu.dot_dimension_numbers<[1], [0], [0], [1], [0, 0, 1, 1], [], []>} : vector<8x128xf32>, vector<128x256xf32>, vector<8x256xf32> -> vector<8x256xf32>
    %cst_193 = arith.constant 0.000000e+00 : f32
    %467 = vector.broadcast %cst_193 : f32 to vector<8x256xf32>
    %468 = arith.maximumf %466, %467 : vector<8x256xf32>
    %c1_194 = arith.constant 1 : index
    %c0_195 = arith.constant 0 : index
    %c0_196 = arith.constant 0 : index
    %469 = vector.load %arg14[%c1_194, %c0_195, %c0_196] : memref<2x256x128xf32, #tpu.memory_space<vmem>>, vector<1x256x128xf32>
    %470 = vector.shape_cast %469 : vector<1x256x128xf32> to vector<256x128xf32>
    %cst_197 = arith.constant dense<0.000000e+00> : vector<8x128xf32>
    %471 = tpu.matmul %468, %470, %cst_197 {dimension_numbers = #tpu.dot_dimension_numbers<[1], [0], [0], [1], [0, 0, 1, 1], [], []>} : vector<8x256xf32>, vector<256x128xf32>, vector<8x128xf32> -> vector<8x128xf32>
    %472 = arith.addf %471, %462 : vector<8x128xf32>
    %cst_198 = arith.constant dense<0.000000e+00> : vector<8xf32>
    %473 = vector.multi_reduction <add>, %472, %cst_198 [1] : vector<8x128xf32> to vector<8xf32>
    %474 = vector.shape_cast %473 : vector<8xf32> to vector<8x1xf32>
    %cst_199 = arith.constant 1.280000e+02 : f32
    %475 = vector.broadcast %cst_199 : f32 to vector<8x1xf32>
    %476 = arith.divf %474, %475 : vector<8x1xf32>
    %477 = vector.broadcast %476 : vector<8x1xf32> to vector<8x128xf32>
    %478 = arith.subf %472, %477 : vector<8x128xf32>
    %479 = arith.mulf %478, %478 : vector<8x128xf32>
    %cst_200 = arith.constant dense<0.000000e+00> : vector<8xf32>
    %480 = vector.multi_reduction <add>, %479, %cst_200 [1] : vector<8x128xf32> to vector<8xf32>
    %481 = vector.shape_cast %480 : vector<8xf32> to vector<8x1xf32>
    %cst_201 = arith.constant 1.280000e+02 : f32
    %482 = vector.broadcast %cst_201 : f32 to vector<8x1xf32>
    %483 = arith.divf %481, %482 : vector<8x1xf32>
    %484 = vector.broadcast %476 : vector<8x1xf32> to vector<8x128xf32>
    %485 = arith.subf %472, %484 : vector<8x128xf32>
    %cst_202 = arith.constant 9.99999974E-6 : f32
    %486 = vector.broadcast %cst_202 : f32 to vector<8x1xf32>
    %487 = arith.addf %483, %486 : vector<8x1xf32>
    %488 = math.rsqrt %487 : vector<8x1xf32>
    %489 = vector.broadcast %488 : vector<8x1xf32> to vector<8x128xf32>
    %490 = arith.mulf %485, %489 : vector<8x128xf32>
    %c0_203 = arith.constant 0 : index
    %c0_204 = arith.constant 0 : index
    %c0_205 = arith.constant 0 : index
    %491 = vector.load %arg15[%c0_203, %c0_204, %c0_205] : memref<1x8x128xf32, #tpu.memory_space<vmem>>, vector<1x8x128xf32>
    %492 = vector.shape_cast %491 : vector<1x8x128xf32> to vector<8x128xf32>
    %493 = vector.shape_cast %490 : vector<8x128xf32> to vector<1x8x128xf32>
    tpu.vector_store %arg15[%c0_203, %c0_204, %c0_205], %493 {strides = array<i32>} : memref<1x8x128xf32, #tpu.memory_space<vmem>>, vector<1x8x128xf32>,
    %494 = tpu.concatenate %117, %226, %354, %463 in 1 : vector<8x32xf32>, vector<8x32xf32>, vector<8x32xf32>, vector<8x32xf32> -> vector<8x128xf32>
    %c0_206 = arith.constant 0 : index
    %c0_207 = arith.constant 0 : index
    %c0_208 = arith.constant 0 : index
    %495 = vector.load %arg16[%c0_206, %c0_207, %c0_208] : memref<1x8x128xf32, #tpu.memory_space<vmem>>, vector<1x8x128xf32>
    %496 = vector.shape_cast %495 : vector<1x8x128xf32> to vector<8x128xf32>
    %497 = vector.shape_cast %494 : vector<8x128xf32> to vector<1x8x128xf32>
    tpu.vector_store %arg16[%c0_206, %c0_207, %c0_208], %497 {strides = array<i32>} : memref<1x8x128xf32, #tpu.memory_space<vmem>>, vector<1x8x128xf32>,
    return
  }
  func.func @transform_0(%arg0: i32) -> (i32, i32, i32) {
    %c0_i32 = arith.constant 0 : i32
    %c0_i32_0 = arith.constant 0 : i32
    %c0_i32_1 = arith.constant 0 : i32
    return %arg0, %c0_i32, %c0_i32_0 : i32, i32, i32
  }
  func.func @transform_1(%arg0: i32) -> (i32, i32, i32) {
    %c0_i32 = arith.constant 0 : i32
    %c0_i32_0 = arith.constant 0 : i32
    %c0_i32_1 = arith.constant 0 : i32
    return %arg0, %c0_i32, %c0_i32_0 : i32, i32, i32
  }
  func.func @transform_2(%arg0: i32) -> (i32, i32, i32) {
    %c0_i32 = arith.constant 0 : i32
    %c0_i32_0 = arith.constant 0 : i32
    %c0_i32_1 = arith.constant 0 : i32
    return %arg0, %c0_i32, %c0_i32_0 : i32, i32, i32
  }
  func.func @transform_3(%arg0: i32) -> (i32, i32, i32) {
    %c0_i32 = arith.constant 0 : i32
    %c0_i32_0 = arith.constant 0 : i32
    %c0_i32_1 = arith.constant 0 : i32
    return %arg0, %c0_i32, %c0_i32_0 : i32, i32, i32
  }
  func.func @transform_4(%arg0: i32) -> (i32, i32, i32) {
    %c0_i32 = arith.constant 0 : i32
    %c0_i32_0 = arith.constant 0 : i32
    %c0_i32_1 = arith.constant 0 : i32
    %c0_i32_2 = arith.constant 0 : i32
    return %c0_i32, %c0_i32_0, %c0_i32_1 : i32, i32, i32
  }
  func.func @transform_5(%arg0: i32) -> (i32, i32, i32) {
    %c0_i32 = arith.constant 0 : i32
    %c0_i32_0 = arith.constant 0 : i32
    %c0_i32_1 = arith.constant 0 : i32
    %c0_i32_2 = arith.constant 0 : i32
    return %c0_i32, %c0_i32_0, %c0_i32_1 : i32, i32, i32
  }
  func.func @transform_6(%arg0: i32) -> (i32, i32, i32) {
    %c0_i32 = arith.constant 0 : i32
    %c0_i32_0 = arith.constant 0 : i32
    %c0_i32_1 = arith.constant 0 : i32
    %c0_i32_2 = arith.constant 0 : i32
    return %c0_i32, %c0_i32_0, %c0_i32_1 : i32, i32, i32
  }
  func.func @transform_7(%arg0: i32) -> (i32, i32, i32) {
    %c0_i32 = arith.constant 0 : i32
    %c0_i32_0 = arith.constant 0 : i32
    %c0_i32_1 = arith.constant 0 : i32
    %c0_i32_2 = arith.constant 0 : i32
    return %c0_i32, %c0_i32_0, %c0_i32_1 : i32, i32, i32
  }
  func.func @transform_8(%arg0: i32) -> (i32, i32, i32) {
    %c0_i32 = arith.constant 0 : i32
    %c0_i32_0 = arith.constant 0 : i32
    %c0_i32_1 = arith.constant 0 : i32
    %c0_i32_2 = arith.constant 0 : i32
    return %c0_i32, %c0_i32_0, %c0_i32_1 : i32, i32, i32
  }
  func.func @transform_9(%arg0: i32) -> (i32, i32, i32) {
    %c0_i32 = arith.constant 0 : i32
    %c0_i32_0 = arith.constant 0 : i32
    %c0_i32_1 = arith.constant 0 : i32
    %c0_i32_2 = arith.constant 0 : i32
    return %c0_i32, %c0_i32_0, %c0_i32_1 : i32, i32, i32
  }
  func.func @transform_10(%arg0: i32) -> (i32, i32, i32) {
    %c0_i32 = arith.constant 0 : i32
    %c0_i32_0 = arith.constant 0 : i32
    %c0_i32_1 = arith.constant 0 : i32
    %c0_i32_2 = arith.constant 0 : i32
    return %c0_i32, %c0_i32_0, %c0_i32_1 : i32, i32, i32
  }
  func.func @transform_11(%arg0: i32) -> (i32, i32, i32) {
    %c0_i32 = arith.constant 0 : i32
    %c0_i32_0 = arith.constant 0 : i32
    %c0_i32_1 = arith.constant 0 : i32
    %c0_i32_2 = arith.constant 0 : i32
    return %c0_i32, %c0_i32_0, %c0_i32_1 : i32, i32, i32
  }
  func.func @transform_12(%arg0: i32) -> (i32, i32, i32) {
    %c0_i32 = arith.constant 0 : i32
    %c0_i32_0 = arith.constant 0 : i32
    %c0_i32_1 = arith.constant 0 : i32
    %c0_i32_2 = arith.constant 0 : i32
    return %c0_i32, %c0_i32_0, %c0_i32_1 : i32, i32, i32
  }
  func.func @transform_13(%arg0: i32) -> (i32, i32, i32) {
    %c0_i32 = arith.constant 0 : i32
    %c0_i32_0 = arith.constant 0 : i32
    %c0_i32_1 = arith.constant 0 : i32
    %c0_i32_2 = arith.constant 0 : i32
    return %c0_i32, %c0_i32_0, %c0_i32_1 : i32, i32, i32
  }
  func.func @transform_14(%arg0: i32) -> (i32, i32, i32) {
    %c0_i32 = arith.constant 0 : i32
    %c0_i32_0 = arith.constant 0 : i32
    %c0_i32_1 = arith.constant 0 : i32
    return %arg0, %c0_i32, %c0_i32_0 : i32, i32, i32
  }
  func.func @transform_15(%arg0: i32) -> (i32, i32, i32) {
    %c0_i32 = arith.constant 0 : i32
    %c0_i32_0 = arith.constant 0 : i32
    %c0_i32_1 = arith.constant 0 : i32
    return %arg0, %c0_i32, %c0_i32_0 : i32, i32, i32
  }
}

</mosaic_0001>

<bundles_post_ra>
// kernel: tpu_custom_call.1
= control target key start
LH: loop header
LB: loop body
LE: loop exit
PB: predicated region body
PF: predicated region fallthrough
CT: control target
= control target key end

     0   :  { %s9104_s0 = inlined_call_operand.vmem [shape: f32[2,8,128], index: 0, kind: input, shape index: {}]   ;;  %s9105_s1 = inlined_call_operand.vmem [shape: f32[2,8,128], index: 1, kind: input, shape index: {}]   ;;  %s9106_s2 = inlined_call_operand.vmem [shape: f32[2,1,8], index: 2, kind: input, shape index: {}]   ;;  %s9107_s3 = inlined_call_operand.vmem [shape: f32[2,1,8], index: 3, kind: input, shape index: {}]   ;;  %s9108_s4 = inlined_call_operand.vmem [shape: f32[2,128,32], index: 4, kind: input, shape index: {}]   ;;  %s9109_s5 = inlined_call_operand.vmem [shape: f32[2,128,32], index: 5, kind: input, shape index: {}]   ;;  %s9110_s6 = inlined_call_operand.vmem [shape: f32[2,128,32], index: 6, kind: input, shape index: {}]   ;;  %s9111_s7 = inlined_call_operand.vmem [shape: f32[2,32,128], index: 7, kind: input, shape index: {}]   ;;  %s9112_s8 = inlined_call_operand.vmem [shape: f32[2,128,32], index: 8, kind: input, shape index: {}]   ;;  %s9113_s9 = inlined_call_operand.vmem [shape: f32[2,128,32], index: 9, kind: input, shape index: {}]   ;;  %s9114_s10 = inlined_call_operand.vmem [shape: f32[2,128,32], index: 10, kind: input, shape index: {}]   ;;  %s9115_s11 = inlined_call_operand.vmem [shape: f32[2,32,128], index: 11, kind: input, shape index: {}]   ;;  %s9116_s12 = inlined_call_operand.vmem [shape: f32[2,128,256], index: 12, kind: input, shape index: {}]   ;;  %s9117_s13 = inlined_call_operand.vmem [shape: f32[2,256,128], index: 13, kind: input, shape index: {}]   ;;  %s9118_s14 = inlined_call_operand.hbm [shape: f32[2,8,128], index: 14, kind: output, shape index: {0}]   ;;  %s9119_s15 = inlined_call_operand.hbm [shape: f32[2,8,128], index: 15, kind: output, shape index: {1}]  }
   0x1   :  { %9141 = sst [smem:[#allocation14_spill]] %s9104_s0 }
   0x2   :  { %9142 = sst [smem:[#allocation15_spill]] %s9105_s1 }
   0x3   :  { %9143 = sst [smem:[#allocation16_spill]] %s9106_s2 }
   0x4   :  { %9144 = sst [smem:[#allocation17_spill]] %s9107_s3 }
   0x5   :  { %9145 = sst [smem:[#allocation18_spill]] %s9118_s14 }
   0x6   :  { %9146 = sst [smem:[#allocation19_spill]] %s9119_s15 }
   0x7   :  { %21 = vsyncpa [#allocation3], 0 }
   0x8   :  { %23 = vsyncpa [#allocation3 + $0x1], 0 }
   0x9   :  { %24 = vsyncpa [#allocation5], 0 }
   0xa   :  { %26 = vsyncpa [#allocation5 + $0x1], 0  ;;  %s7306_s18 = smov 0   ;;  %s7308_s19 = smov 0  }
   0xb   :  { %s7310_s20 = smov 0   ;;  %s7312_s21 = smov 0  }
   0xc LB: > { %9147 = sst [smem:[#allocation8_spill]] %s7197_s18  ;;  %s7327_s22 = sadd.s32 4294967295, %s7209_s21   ;;  %s7209_s21 = sphi %s7312_s21, %s9173_s21   ;;  %s7205_s20 = sphi %s7310_s20, %s9175_s20   ;;  %s7201_s19 = sphi %s7308_s19, %s9177_s19   ;;  %s7197_s18 = sphi %s7306_s18, %s9176_s18  }
   0xd   : > { %9148 = sst [smem:[#allocation9_spill]] %s7205_s20  ;;  %s5325_s23 = sadd.s32 4294967294, %s7209_s21  }
   0xe   : > { %9149 = sst [smem:[#allocation10_spill]] %s7209_s21  ;;  %s7331_s24 = sadd.s32 1, %s7209_s21  }
   0xf   : > { %9150 = sst [smem:[#allocation11_spill]] %s7331_s24  ;;  %s353_s25 = sadd.s32 1, %s7205_s20 }
  0x10   : > { %s350_s26 = ssub.s32 %s7209_s21, %s7331_s24  ;;  %p363_p0 = scmp.ne.s32.totalorder %s7205_s20, %s7201_s19 }
  0x11   : > { %p351_p1 = scmp.eq.s32.totalorder %s350_s26, 0  ;;  %p364_p2 = scmp.eq.s32.totalorder %s7327_s22, 1 }
  0x12   : > { %p369_p3 = scmp.ne.s32.totalorder %s7201_s19, %s7197_s18  ;;  %p370_p4 = scmp.eq.s32.totalorder %s5325_s23, 1 }
  0x13   : > { %s7342_s27 = scalar_select %p351_p1, %s7205_s20, %s353_s25  }
  0x14   : > { %p7344_p5 = por %p364_p2, %p363_p0  ;;  %p7348_p6 = por %p370_p4, %p369_p3 }
  0x15   : > { %9151 = sst [smem:[#allocation12_spill]] %s7342_s27  ;;  %p5328_p7 = scmp.ge.s32.totalorder %s7209_s21, 1 }
  0x16   : > { %s9153_s29 = scalar_select %p7348_p6, 1, 0 }
  0x17   : > { %p470_p8 = scmp.lt.s32.totalorder %s7209_s21, 3 }
  0x18   : > { %9154 = sst [smem:[#allocation13_spill]] %s9153_s29 }
  0x19   : > { %p471_p9 = pnand %p5328_p7, %p470_p8 }
  0x1a   : > { %v580_v0 = vld [vmem:[%s9109_s5] sm:$0xff] (!%p471_p9)  ;;  %v581_v1 = vld [vmem:[%s9109_s5 + $0x8] sm:$0xff] (!%p471_p9)  ;;  %v7211_v3 = vmov (!%p471_p9), 0.0|0.0   ;;  %v582_v6 = vld [vmem:[%s9109_s5 + $0x10] sm:$0xff] (!%p471_p9)  ;;  %vm7212_vm0 = vmmov (!%p471_p9), 0   ;;  %v7213_v11 = vmov (!%p471_p9), 0.0   ;;  %v552_v16 = vlaneseq (!%p471_p9) }
  0x1b   : > { %474 = sbr.rel (%p471_p9) target bundleno = 14284 (0x37cc), region = 76  ;;  %v564_v2 = vld [vmem:[%s9108_s4] sm:$0xff] (!%p471_p9)  ;;  %6565 = vmatprep.subr.bf16.mxu1 (!%p471_p9), %v7211_v3  ;;  %v6566_v4 = vpack.c.bf16 (!%p471_p9), %v581_v1, %v580_v0  ;;  %6541 = vmatprep.subr.bf16.mxu0 (!%p471_p9), %v7211_v3  ;;  %v565_v5 = vld [vmem:[%s9108_s4 + $0x8] sm:$0xff] (!%p471_p9)  ;;  %v583_v7 = vld [vmem:[%s9109_s5 + $0x18] sm:$0xff] (!%p471_p9)  ;;  %p532_p10 = scmp.lt.s32.totalorder (!%p471_p9), %s7327_s22, 1  ;;  %v7214_v34 = vmov (!%p471_p9), 0  }
  0x1c   : > { %v6542_v8 = vpack.c.bf16 (!%p471_p9), %v565_v5, %v564_v2  ;;  %v566_v9 = vld [vmem:[%s9108_s4 + $0x10] sm:$0xff] (!%p471_p9)  ;;  %v567_v10 = vld [vmem:[%s9108_s4 + $0x18] sm:$0xff] (!%p471_p9)  ;;  %5984 = vmatprep.mubr.msk.f32.mxu1 (!%p471_p9), %vm7212_vm0, %v7213_v11  ;;  %5949 = vmatprep.mubr.msk.f32.mxu0 (!%p471_p9), %vm7212_vm0, %v7213_v11  ;;  %v6569_v12 = vpack.c.bf16 (!%p471_p9), %v583_v7, %v582_v6  ;;  %v584_v14 = vld [vmem:[%s9109_s5 + $0x20] sm:$0xff] (!%p471_p9)  ;;  %s9155_s3 = sld [smem:[#allocation17_spill]] (!%p471_p9)  ;;  %v7414_v23 = vshrl.u32 (!%p471_p9), %v552_v16, 7  ;;  %s9156_s0 = sld [smem:[#allocation14_spill]] (!%p471_p9) }
  0x1d   : > { %6567 = vmatpush3.bf16.msra.mxu1 (!%p471_p9), %v6566_v4  ;;  %v6545_v13 = vpack.c.bf16 (!%p471_p9), %v567_v10, %v566_v9  ;;  %v585_v15 = vld [vmem:[%s9109_s5 + $0x28] sm:$0xff] (!%p471_p9)  ;;  %v568_v17 = vld [vmem:[%s9108_s4 + $0x20] sm:$0xff] (!%p471_p9)  ;;  %v586_v21 = vld [vmem:[%s9109_s5 + $0x30] sm:$0xff] (!%p471_p9)  ;;  %vm826_vm2 = vcmask (!%p471_p9), 64512   ;;  %s9157_s2 = sld [smem:[#allocation16_spill]] (!%p471_p9)  ;;  %s9130_s17 = smov (!%p471_p9), 104  }
  0x1e   : > { %6543 = vmatpush3.bf16.msra.mxu0 (!%p471_p9), %v6542_v8  ;;  %6568 = vmatprep.subr.bf16.mxu1 (!%p471_p9), %v7211_v3  ;;  %v569_v18 = vld [vmem:[%s9108_s4 + $0x28] sm:$0xff] (!%p471_p9)  ;;  %v6572_v19 = vpack.c.bf16 (!%p471_p9), %v585_v15, %v584_v14  ;;  %v587_v22 = vld [vmem:[%s9109_s5 + $0x38] sm:$0xff] (!%p471_p9)  ;;  %v570_v24 = vld [vmem:[%s9108_s4 + $0x30] sm:$0xff] (!%p471_p9)  ;;  %v560_v31 = vsub.s32 (!%p471_p9), 0, %v7414_v23  ;;  %s9128_s23 = smov (!%p471_p9), 8   ;;  %s9126_s26 = smov (!%p471_p9), 16  }
  0x1f   : > { %6544 = vmatprep.subr.bf16.mxu0 (!%p471_p9), %v7211_v3  ;;  %v6548_v20 = vpack.c.bf16 (!%p471_p9), %v569_v18, %v568_v17  ;;  %v571_v25 = vld [vmem:[%s9108_s4 + $0x38] sm:$0xff] (!%p471_p9)  ;;  %v6575_v26 = vpack.c.bf16 (!%p471_p9), %v587_v22, %v586_v21  ;;  %v588_v29 = vld [vmem:[%s9109_s5 + $0x40] sm:$0xff] (!%p471_p9)  ;;  %v589_v30 = vld [vmem:[%s9109_s5 + $0x48] sm:$0xff] (!%p471_p9)  ;;  %s9132_s20 = smov (!%p471_p9), 24   ;;  %vm1500_vm7 = vcmask (!%p471_p9), 130048   ;;  %vm1502_vm8 = vcmask (!%p471_p9), 195584  }
  0x20   : > { %v6551_v28 = vpack.c.bf16 (!%p471_p9), %v571_v25, %v570_v24  ;;  %v572_v32 = vld [vmem:[%s9108_s4 + $0x40] sm:$0xff] (!%p471_p9)  ;;  %v573_v33 = vld [vmem:[%s9108_s4 + $0x48] sm:$0xff] (!%p471_p9)  ;;  %v6578_v37 = vpack.c.bf16 (!%p471_p9), %v589_v30, %v588_v29  ;;  %v590_v39 = vld [vmem:[%s9109_s5 + $0x50] sm:$0xff] (!%p471_p9)  ;;  %v555_v29 = vand.u32 (!%p471_p9), 127, %v552_v16  ;;  %vm1504_vm9 = vcmask (!%p471_p9), 261120   ;;  %s9161_s1 = sld [smem:[#allocation15_spill]] (!%p471_p9) }
  0x21   : > { %6570 = vmatpush3.bf16.msra.mxu1 (!%p471_p9), %v6569_v12  ;;  %v6554_v38 = vpack.c.bf16 (!%p471_p9), %v573_v33, %v572_v32  ;;  %v591_v40 = vld [vmem:[%s9109_s5 + $0x58] sm:$0xff] (!%p471_p9)  ;;  %v574_v41 = vld [vmem:[%s9108_s4 + $0x50] sm:$0xff] (!%p471_p9)  ;;  %v592_v45 = vld [vmem:[%s9109_s5 + $0x60] sm:$0xff] (!%p471_p9)  ;;  %s9165_s27 = smov (!%p471_p9), 8   ;;  %s9166_s29 = smov (!%p471_p9), 16   ;;  %vm5167_vm11 = vcmask (!%p471_p9), 523264  }
  0x22   : > { %s7400_s25 = scalar_select %p532_p10, %s7327_s22, 1  ;;  %6546 = vmatpush3.bf16.msra.mxu0 %v6545_v13  ;;  %6571 = vmatprep.subr.bf16.mxu1 %v7211_v3  ;;  %v575_v42 = vld [vmem:[%s9108_s4 + $0x58] sm:$0xff]  ;;  %v6581_v43 = vpack.c.bf16 %v591_v40, %v590_v39  ;;  %v593_v46 = vld [vmem:[%s9109_s5 + $0x68] sm:$0xff]  ;;  %v576_v47 = vld [vmem:[%s9108_s4 + $0x60] sm:$0xff]  ;;  %vm556_vm5 = vcmp.gt.s32.totalorder %v555_v29, %v7414_v23  ;;  %vm5169_vm12 = vcmask 785408  }
  0x23   : > { %6547 = vmatprep.subr.bf16.mxu0 %v7211_v3  ;;  %v6557_v44 = vpack.c.bf16 %v575_v42, %v574_v41  ;;  %v577_v48 = vld [vmem:[%s9108_s4 + $0x68] sm:$0xff]  ;;  %v6584_v49 = vpack.c.bf16 %v593_v46, %v592_v45  ;;  %v594_v51 = vld [vmem:[%s9109_s5 + $0x70] sm:$0xff]  ;;  %v595_v52 = vld [vmem:[%s9109_s5 + $0x78] sm:$0xff]  ;;  %s5555_s14 = sshll.u32 %s7327_s22, 7 }
  0x24   : > { %s545_s16 = scalar_lea.vmem %s9155_s3, %s7400_s25  ;;  %v6560_v50 = vpack.c.bf16 %v577_v48, %v576_v47  ;;  %v578_v53 = vld [vmem:[%s9108_s4 + $0x70] sm:$0xff]  ;;  %v579_v54 = vld [vmem:[%s9108_s4 + $0x78] sm:$0xff]  ;;  %s9125_s24 = sshll.u32 %s7400_s25, 3  ;;  %v6587_v55 = vpack.c.bf16 %v595_v52, %v594_v51  ;;  %v596_v62 = vld [vmem:[%s9110_s6] sm:$0xff] }
  0x25   : > { %6573 = vmatpush3.bf16.msra.mxu1 %v6572_v19  ;;  %v550_v27 = vld [vmem:[%s545_s16] sm:$0x1]  ;;  %v6563_v56 = vpack.c.bf16 %v579_v54, %v578_v53  ;;  %s535_s30 = scalar_lea.vmem %s9156_s0, %s9125_s24  ;;  %s9136_s16 = smov 120   ;;  %v597_v63 = vld [vmem:[%s9110_s6 + $0x8] sm:$0xff]  ;;  %v598_v0 = vld [vmem:[%s9110_s6 + $0x10] sm:$0xff] }
  0x26   : > { %6549 = vmatpush3.bf16.msra.mxu0 %v6548_v20  ;;  %6574 = vmatprep.subr.bf16.mxu1 %v7211_v3  ;;  %vm551_vm1 = vcmp.gt.f32.partialorder %v550_v27, 0.5  ;;  %v7493_v57 = vld [vmem:[%s535_s30] sm:$0xff]  ;;  %v6590_v1 = vpack.c.bf16 %v597_v63, %v596_v62  ;;  %v599_v2 = vld [vmem:[%s9110_s6 + $0x18] sm:$0xff]  ;;  %v601_v6 = vld [vmem:[%s9110_s6 + $0x28] sm:$0xff]  ;;  %s542_s24 = scalar_lea.vmem %s9157_s2, %s7400_s25  ;;  %s9134_s30 = smov 112  }
  0x27   : > { %6550 = vmatprep.subr.bf16.mxu0 %v7211_v3  ;;  %v1940_v35 = vsel %vm551_vm1, 1, %v7214_v34  ;;  %v6593_v4 = vpack.c.bf16 %v599_v2, %v598_v0  ;;  %v600_v5 = vld [vmem:[%s9110_s6 + $0x20] sm:$0xff]  ;;  %v602_v8 = vld [vmem:[%s9110_s6 + $0x30] sm:$0xff]  ;;  %v603_v9 = vld [vmem:[%s9110_s6 + $0x38] sm:$0xff]  ;;  %s9160_s18 = sshll.u32 %s7400_s25, 3  ;;  %s9163_s25 = smov 112  }
  0x28   : > { %v7441_v36 = vrot.slane %v1940_v35, %v560_v31  ;;  %v6596_v7 = vpack.c.bf16 %v601_v6, %v600_v5  ;;  %v6599_v10 = vpack.c.bf16 %v603_v9, %v602_v8  ;;  %v604_v12 = vld [vmem:[%s9110_s6 + $0x40] sm:$0xff]  ;;  %v605_v13 = vld [vmem:[%s9110_s6 + $0x48] sm:$0xff]  ;;  %v606_v15 = vld [vmem:[%s9110_s6 + $0x50] sm:$0xff]  ;;  %s7224_s0 = smov [#allocation4]  }
  0x29   : > { %6576 = vmatpush3.bf16.msra.mxu1 %v6575_v26  ;;  %v6602_v14 = vpack.c.bf16 %v605_v13, %v604_v12  ;;  %v607_v17 = vld [vmem:[%s9110_s6 + $0x58] sm:$0xff]  ;;  %v608_v19 = vld [vmem:[%s9110_s6 + $0x60] sm:$0xff]  ;;  %v609_v20 = vld [vmem:[%s9110_s6 + $0x68] sm:$0xff] }
  0x2a   : > { %6552 = vmatpush3.bf16.msra.mxu0 %v6551_v28  ;;  %6577 = vmatprep.subr.bf16.mxu1 %v7211_v3  ;;  %v6605_v18 = vpack.c.bf16 %v607_v17, %v606_v15  ;;  %v6608_v21 = vpack.c.bf16 %v609_v20, %v608_v19  ;;  %v610_v22 = vld [vmem:[%s9110_s6 + $0x70] sm:$0xff]  ;;  %v611_v24 = vld [vmem:[%s9110_s6 + $0x78] sm:$0xff]  ;;  %v548_v26 = vld [vmem:[%s542_s24] sm:$0x1]  ;;  %vm1945_vm10 = vcmp.eq.s32.totalorder %v7441_v36, 1  ;;  %s9168_s24 = sld [smem:[#allocation19_spill]] }
  0x2b   : > { %6553 = vmatprep.subr.bf16.mxu0 %v7211_v3  ;;  %v6611_v25 = vpack.c.bf16 %v611_v24, %v610_v22  ;;  %vm549_vm3 = vcmp.gt.f32.partialorder %v548_v26, 0.5 }
  0x2c   : > { %v557_v27 = vsel %vm549_vm3, 1, %v7214_v34 }
  0x2d   : > { %6579 = vmatpush3.bf16.msra.mxu1 %v6578_v37  ;;  %v561_v28 = vrot.slane %v557_v27, %v560_v31 }
  0x2e   : > { %6555 = vmatpush3.bf16.msra.mxu0 %v6554_v38  ;;  %6580 = vmatprep.subr.bf16.mxu1 %v7211_v3 }
  0x2f   : > { %6556 = vmatprep.subr.bf16.mxu0 %v7211_v3  ;;  %vm562_vm4 = vcmp.eq.s32.totalorder %v561_v28, 1 }
  0x30   : > { %vm7586_vm6 = vmor %vm562_vm4, %vm556_vm5 }
  0x31   : > { %6582 = vmatpush3.bf16.msra.mxu1 %v6581_v43 }
  0x32   : > { %6558 = vmatpush3.bf16.msra.mxu0 %v6557_v44  ;;  %6583 = vmatprep.subr.bf16.mxu1 %v7211_v3 }
  0x33   : > { %6559 = vmatprep.subr.bf16.mxu0 %v7211_v3 }
  0x35   : > { %6585 = vmatpush3.bf16.msra.mxu1 %v6584_v49 }
  0x36   : > { %6561 = vmatpush3.bf16.msra.mxu0 %v6560_v50  ;;  %6586 = vmatprep.subr.bf16.mxu1 %v7211_v3 }
  0x37   : > { %6562 = vmatprep.subr.bf16.mxu0 %v7211_v3 }
  0x39   : > { %6588 = vmatpush3.bf16.msra.mxu1 %v6587_v55 }
  0x3a   : > { %6564 = vmatpush3.bf16.msra.mxu0 %v6563_v56  ;;  %6022 = vmatprep.subr.mxu1 %v7213_v11 }
  0x3b   : > { %6589 = vmatprep.subr.bf16.mxu0 %v7211_v3 }
  0x3c   : > { %5985 = vmatmul.mubr.f32.vlgmr.msra.gmra.mrb[0].mxu1 %v7493_v57 }
  0x3d   : > { %5950 = vmatmul.mubr.f32.vlgmr.msra.gmra.mrb[0].mxu0 %v7493_v57  ;;  %6024 = vmatprep.mubr.msk.f32.mxu1 %vm7212_vm0, %v7213_v11 }
  0x3e   : > { %6019 = vmatprep.mubr.msk.f32.mxu0 %vm7212_vm0, %v7213_v11  ;;  %6591 = vmatpush3.bf16.msra.mxu0 %v6590_v1 }
  0x3f   : > { %6592 = vmatprep.subr.bf16.mxu0 %v7211_v3 }
  0x42   : > { %6594 = vmatpush3.bf16.msra.mxu0 %v6593_v4 }
  0x43   : > { %6595 = vmatprep.subr.bf16.mxu0 %v7211_v3 }
  0x46   : > { %6597 = vmatpush3.bf16.msra.mxu0 %v6596_v7 }
  0x47   : > { %6598 = vmatprep.subr.bf16.mxu0 %v7211_v3 }
  0x4a   : > { %6600 = vmatpush3.bf16.msra.mxu0 %v6599_v10 }
  0x4b   : > { %6601 = vmatprep.subr.bf16.mxu0 %v7211_v3 }
  0x4e   : > { %6603 = vmatpush3.bf16.msra.mxu0 %v6602_v14 }
  0x4f   : > { %6604 = vmatprep.subr.bf16.mxu0 %v7211_v3 }
  0x52   : > { %6606 = vmatpush3.bf16.msra.mxu0 %v6605_v18 }
  0x53   : > { %6607 = vmatprep.subr.bf16.mxu0 %v7211_v3 }
  0x56   : > { %6609 = vmatpush3.bf16.msra.mxu0 %v6608_v21 }
  0x57   : > { %6610 = vmatprep.subr.bf16.mxu0 %v7211_v3 }
  0x5a   : > { %6612 = vmatpush3.bf16.msra.mxu0 %v6611_v25 }
  0x5b   : > { %6613 = vmatprep.subr.bf16.mxu0 %v7211_v3 }
  0x5d   : > { %6020 = vmatmul.mubr.f32.vlgmr.msra.gmra.mrb[2].mxu0 %v7493_v57 }
  0x5e   : > { %6070 = vmatprep.mubr.msk.f32.mxu0 %vm7212_vm0, %v7213_v11 }
 0x10f   : > { %v7503_v58 = vpop.f32.mrb[0].mxu1 }
 0x110   : > { %990 = vrot.lane.b32.xlu1 %v7503_v58, %s9136_s16  ;;  %v5986_v59 = vpop.f32.mrb[1].mxu1  ;;  %6023 = vmatpush3.xpose.msk.msra.mxu1 %vm826_vm2, %v7503_v58  ;;  %v7509_v60 = vpop.f32.mrb[0].mxu0 }
 0x111   : > { %v5951_v61 = vpop.f32.mrb[1].mxu0  ;;  %6027 = vmatprep.subr.mxu1 %v7213_v11 }
 0x113   : > { %6025 = vmatmul.mubr.msk.f32.vlgmr.msra.gmra.mrb[2].mxu1 %vm826_vm2, %v7509_v60 }
 0x114   : > { %988 = vrot.lane.b32.xlu1 %v7509_v60, %s9136_s16  ;;  %6029 = vmatprep.mubr.msk.f32.mxu1 %vm7212_vm0, %v7213_v11 }
 0x130   : > { %v7594_v23 = vpop.f32.mrb[2].mxu0 }
 0x131   : > { %v6021_v40 = vpop.f32.mrb[3].mxu0  ;;  %6028 = vmatpush3.msra.mxu1 %v7594_v23 }
 0x132   : > { %6032 = vmatprep.subr.mxu1 %v7213_v11  ;;  %v615_v40 = vld [vmem:[%s9111_s7 + $0x18] sm:$0xff] }
 0x182   : > { %v991_v43 = vpop.permute.xlu1 %990 }
 0x186   : > { %v989_v45 = vpop.permute.xlu1 %988 }
 0x1e6   : > { %v899_v32 = vpop.f32.mrb[2].mxu1 }
 0x1e7   : > { %v903_v33 = vsel %vm7586_vm6, -1e+09, %v899_v32  ;;  %v6026_v35 = vpop.f32.mrb[3].mxu1 }
 0x1e8   : > { %v904_v37 = vsel %vm826_vm2, %v903_v33, -inf }
 0x1e9   : > { %905 = vmax.xlane.f32.xlu0 %v904_v37 }
 0x276   : > { %v906_v34 = vpop.xlane.xlu0 %905 }
 0x277   : > { %v907_v38 = vsub.f32 %v903_v33, %v906_v34 }
 0x279   : > { %v908_v31 = vmul.f32 1.442695, %v907_v38 }
 0x27b   : > { %7038 = vpow2.f32 %v908_v31  ;;  %v612_v31 = vld [vmem:[%s9111_s7] sm:$0xff] }
 0x285   : > { %v7039_v16 = vpop.eup %7038 }
 0x286   : > { %v910_v39 = vsel %vm826_vm2, %v7039_v16, 0.0 }
 0x287   : > { %911 = vadd.xlane.f32.xlu0 %v910_v39  ;;  %v614_v39 = vld [vmem:[%s9111_s7 + $0x10] sm:$0xff] }
 0x314   : > { %v912_v41 = vpop.xlane.xlu0 %911 }
 0x315   : > { %7040 = vrcp.f32 %v912_v41  ;;  %v6617_v41 = vpack.c.bf16 %v615_v40, %v614_v39  ;;  %v1631_v39 = vld [vmem:[%s9113_s9 + $0x68] sm:$0xff] }
 0x316   : > { %v1615_v40 = vld [vmem:[%s9112_s8 + $0x68] sm:$0xff] }
 0x31f   : > { %v7041_v42 = vpop.eup %7040 }
 0x320   : > { %v7598_v44 = vmul.f32 %v7041_v42, %v7039_v16  ;;  %v613_v16 = vld [vmem:[%s9111_s7 + $0x8] sm:$0xff] }
 0x322   : > { %6030 = vmatmul.mubr.msk.f32.vlgmr.msra.gmra.mrb[4].mxu1 %vm826_vm2, %v7598_v44 }
 0x323   : > { %6033 = vmatpush3.xpose.msk.msra.mxu1 %vm826_vm2, %v991_v43  ;;  %6034 = vmatprep.mubr.msk.f32.mxu1 %vm7212_vm0, %v7213_v11 }
 0x324   : > { %6037 = vmatprep.subr.mxu1 %v7213_v11 }
 0x326   : > { %6035 = vmatmul.mubr.msk.f32.vlgmr.msra.gmra.mrb[6].mxu1 %vm826_vm2, %v989_v45 }
 0x327   : > { %6039 = vmatprep.mubr.msk.f32.mxu1 %vm7212_vm0, %v7213_v11 }
 0x3f5   : > { %v7609_v46 = vpop.f32.mrb[4].mxu1 }
 0x3f6   : > { %v6031_v47 = vpop.f32.mrb[5].mxu1 }
 0x3f9   : > { %v1062_v48 = vpop.f32.mrb[6].mxu1 }
 0x3fa   : > { %v1066_v49 = vsel %vm7586_vm6, -1e+09, %v1062_v48  ;;  %v6036_v50 = vpop.f32.mrb[7].mxu1 }
 0x3fb   : > { %v1067_v51 = vsel %vm826_vm2, %v1066_v49, -inf }
 0x3fc   : > { %1068 = vmax.xlane.f32.xlu0 %v1067_v51 }
 0x412   : > { %1079 = vrot.lane.b32.xlu0 %v7594_v23, %s9136_s16  ;;  %s9167_s16 = smov 24  }
 0x416   : > { %1157 = vrot.lane.b32.xlu0 %v7503_v58, %s9134_s30 }
 0x41a   : > { %1155 = vrot.lane.b32.xlu0 %v7509_v60, %s9134_s30 }
 0x489   : > { %v1069_v52 = vpop.xlane.xlu0 %1068 }
 0x48a   : > { %v1070_v53 = vsub.f32 %v1066_v49, %v1069_v52 }
 0x48c   : > { %v1071_v54 = vmul.f32 1.442695, %v1070_v53 }
 0x48d   : > { %v1080_v55 = vpop.permute.xlu0 %1079 }
 0x48e   : > { %7042 = vpow2.f32 %v1071_v54  ;;  %6038 = vmatpush3.msra.mxu1 %v1080_v55  ;;  %v1619_v55 = vld [vmem:[%s9113_s9 + $0x8] sm:$0xff] }
 0x48f   : > { %6042 = vmatprep.subr.mxu1 %v7213_v11 }
 0x491   : > { %v1158_v63 = vpop.permute.xlu0 %1157 }
 0x495   : > { %v1156_v1 = vpop.permute.xlu0 %1155 }
 0x498   : > { %v7043_v56 = vpop.eup %7042 }
 0x499   : > { %v1073_v59 = vsel %vm826_vm2, %v7043_v56, 0.0 }
 0x49a   : > { %1074 = vadd.xlane.f32.xlu1 %v1073_v59 }
 0x4ab   : > { %1245 = vrot.lane.b32.xlu1 %v7594_v23, %s9134_s30 }
 0x4af   : > { %1323 = vrot.lane.b32.xlu1 %v7503_v58, %s9130_s17 }
 0x527   : > { %v1075_v61 = vpop.xlane.xlu1 %1074 }
 0x528   : > { %7044 = vrcp.f32 %v1075_v61  ;;  %v1603_v61 = vld [vmem:[%s9112_s8 + $0x8] sm:$0xff] }
 0x52b   : > { %v1246_v2 = vpop.permute.xlu1 %1245 }
 0x52f   : > { %v1324_v15 = vpop.permute.xlu1 %1323 }
 0x532   : > { %v7045_v62 = vpop.eup %7044 }
 0x533   : > { %v7626_v0 = vmul.f32 %v7045_v62, %v7043_v56  ;;  %v1602_v56 = vld [vmem:[%s9112_s8] sm:$0xff]  ;;  %v1621_v62 = vld [vmem:[%s9113_s9 + $0x18] sm:$0xff] }
 0x535   : > { %6040 = vmatmul.mubr.msk.f32.vlgmr.msra.gmra.mrb[8].mxu1 %vm826_vm2, %v7626_v0 }
 0x536   : > { %6043 = vmatpush3.xpose.msk.msra.mxu1 %vm826_vm2, %v1158_v63  ;;  %6044 = vmatprep.mubr.msk.f32.mxu1 %vm7212_vm0, %v7213_v11  ;;  %v6620_v63 = vpack.c.bf16 %v1603_v61, %v1602_v56 }
 0x537   : > { %6047 = vmatprep.subr.mxu1 %v7213_v11 }
 0x539   : > { %6045 = vmatmul.mubr.msk.f32.vlgmr.msra.gmra.mrb[10].mxu1 %vm826_vm2, %v1156_v1  ;;  %v1604_v1 = vld [vmem:[%s9112_s8 + $0x10] sm:$0xff] }
 0x53a   : > { %6048 = vmatpush3.msra.mxu1 %v1246_v2  ;;  %6049 = vmatprep.mubr.msk.f32.mxu1 %vm7212_vm0, %v7213_v11  ;;  %v1605_v2 = vld [vmem:[%s9112_s8 + $0x18] sm:$0xff] }
 0x53b   : > { %6052 = vmatprep.subr.mxu1 %v7213_v11 }
 0x608   : > { %v1151_v58 = vpop.f32.mrb[8].mxu1 }
 0x609   : > { %v6041_v4 = vpop.f32.mrb[9].mxu1 }
 0x60a   : > { %v6623_v4 = vpack.c.bf16 %v1605_v2, %v1604_v1  ;;  %v1638_v1 = vld [vmem:[%s9114_s10 + $0x20] sm:$0xff]  ;;  %v1639_v2 = vld [vmem:[%s9114_s10 + $0x28] sm:$0xff] }
 0x60c   : > { %v1229_v5 = vpop.f32.mrb[10].mxu1 }
 0x60d   : > { %v1233_v6 = vsel %vm7586_vm6, -1e+09, %v1229_v5  ;;  %v6046_v7 = vpop.f32.mrb[11].mxu1  ;;  %v1622_v5 = vld [vmem:[%s9113_s9 + $0x20] sm:$0xff] }
 0x60e   : > { %v1234_v8 = vsel %vm826_vm2, %v1233_v6, -inf  ;;  %v1606_v7 = vld [vmem:[%s9112_s8 + $0x20] sm:$0xff] }
 0x60f   : > { %1235 = vmax.xlane.f32.xlu0 %v1234_v8  ;;  %v1607_v8 = vld [vmem:[%s9112_s8 + $0x28] sm:$0xff] }
 0x69c   : > { %v1236_v9 = vpop.xlane.xlu0 %1235 }
 0x69d   : > { %v1237_v10 = vsub.f32 %v1233_v6, %v1236_v9  ;;  %v1623_v6 = vld [vmem:[%s9113_s9 + $0x28] sm:$0xff] }
 0x69e   : > { %v6650_v9 = vpack.c.bf16 %v1623_v6, %v1622_v5  ;;  %v1641_v5 = vld [vmem:[%s9114_s10 + $0x38] sm:$0xff] }
 0x69f   : > { %v1238_v12 = vmul.f32 1.442695, %v1237_v10  ;;  %v6626_v10 = vpack.c.bf16 %v1607_v8, %v1606_v7  ;;  %v1642_v7 = vld [vmem:[%s9114_s10 + $0x40] sm:$0xff]  ;;  %v1643_v8 = vld [vmem:[%s9114_s10 + $0x48] sm:$0xff] }
 0x6a1   : > { %7046 = vpow2.f32 %v1238_v12  ;;  %v1624_v12 = vld [vmem:[%s9113_s9 + $0x30] sm:$0xff] }
 0x6ab   : > { %v7047_v13 = vpop.eup %7046 }
 0x6ac   : > { %v1240_v14 = vsel %vm826_vm2, %v7047_v13, 0.0 }
 0x6ad   : > { %1241 = vadd.xlane.f32.xlu1 %v1240_v14  ;;  %v1608_v14 = vld [vmem:[%s9112_s8 + $0x30] sm:$0xff] }
 0x6be   : > { %1321 = vrot.lane.b32.xlu1 %v7509_v60, %s9130_s17 }
 0x73a   : > { %v1242_v17 = vpop.xlane.xlu1 %1241 }
 0x73b   : > { %7048 = vrcp.f32 %v1242_v17 }
 0x73e   : > { %v1322_v20 = vpop.permute.xlu1 %1321 }
 0x745   : > { %v7049_v18 = vpop.eup %7048 }
 0x746   : > { %v7644_v19 = vmul.f32 %v7049_v18, %v7047_v13  ;;  %v1625_v13 = vld [vmem:[%s9113_s9 + $0x38] sm:$0xff] }
 0x747   : > { %v6653_v17 = vpack.c.bf16 %v1625_v13, %v1624_v12  ;;  %v1645_v12 = vld [vmem:[%s9114_s10 + $0x58] sm:$0xff] }
 0x748   : > { %6050 = vmatmul.mubr.msk.f32.vlgmr.msra.gmra.mrb[12].mxu1 %vm826_vm2, %v7644_v19 }
 0x749   : > { %6053 = vmatpush3.xpose.msk.msra.mxu1 %vm826_vm2, %v1324_v15  ;;  %6054 = vmatprep.mubr.msk.f32.mxu1 %vm7212_vm0, %v7213_v11  ;;  %v1609_v15 = vld [vmem:[%s9112_s8 + $0x38] sm:$0xff] }
 0x74a   : > { %6057 = vmatprep.subr.mxu1 %v7213_v11  ;;  %v6629_v18 = vpack.c.bf16 %v1609_v15, %v1608_v14  ;;  %v1646_v14 = vld [vmem:[%s9114_s10 + $0x60] sm:$0xff]  ;;  %v1647_v15 = vld [vmem:[%s9114_s10 + $0x68] sm:$0xff] }
 0x74c   : > { %6055 = vmatmul.mubr.msk.f32.vlgmr.msra.gmra.mrb[14].mxu1 %vm826_vm2, %v1322_v20  ;;  %v1626_v20 = vld [vmem:[%s9113_s9 + $0x40] sm:$0xff] }
 0x74d   : > { %6059 = vmatprep.mubr.msk.f32.mxu1 %vm7212_vm0, %v7213_v11 }
 0x81b   : > { %v1317_v60 = vpop.f32.mrb[12].mxu1 }
 0x81c   : > { %v6051_v21 = vpop.f32.mrb[13].mxu1 }
 0x81f   : > { %v1395_v22 = vpop.f32.mrb[14].mxu1 }
 0x820   : > { %v1399_v24 = vsel %vm7586_vm6, -1e+09, %v1395_v22  ;;  %v6056_v25 = vpop.f32.mrb[15].mxu1 }
 0x821   : > { %v1400_v26 = vsel %vm826_vm2, %v1399_v24, -inf }
 0x822   : > { %1401 = vmax.xlane.f32.xlu0 %v1400_v26 }
 0x838   : > { %1411 = vrot.lane.b32.xlu0 %v7594_v23, %s9130_s17  ;;  %v6614_v23 = vpack.c.bf16 %v613_v16, %v612_v31  ;;  %v1630_v31 = vld [vmem:[%s9113_s9 + $0x60] sm:$0xff]  ;;  %s9162_s17 = smov 120  }
 0x83a   : > { %6615 = vmatpush3.bf16.msra.mxu0 %v6614_v23  ;;  %v1614_v23 = vld [vmem:[%s9112_s8 + $0x60] sm:$0xff] }
 0x83b   : > { %6616 = vmatprep.subr.bf16.mxu0 %v7211_v3 }
 0x83c   : > { %1488 = vrot.lane.b32.xlu0 %v1151_v58, %s9128_s23  ;;  %s7807_s23 = scalar_lea.vmem %s9161_s1, %s9160_s18  ;;  %s9027_s1 = scalar_lea.hbm %s9168_s24, %s5555_s14 }
 0x83e   : > { %6618 = vmatpush3.bf16.msra.mxu0 %v6617_v41  ;;  %v6662_v41 = vpack.c.bf16 %v1631_v39, %v1630_v31 }
 0x83f   : > { %6643 = vmatprep.subr.bf16.mxu0 %v7211_v3 }
 0x840   : > { %1492 = vrot.lane.b32.xlu0 %v1317_v60, %s9126_s26  ;;  %v1627_v60 = vld [vmem:[%s9113_s9 + $0x48] sm:$0xff]  ;;  %s9164_s26 = smov 104  }
 0x841   : > { %v6656_v21 = vpack.c.bf16 %v1627_v60, %v1626_v20  ;;  %v1649_v20 = vld [vmem:[%s9114_s10 + $0x78] sm:$0xff] }
 0x8af   : > { %v1402_v27 = vpop.xlane.xlu0 %1401 }
 0x8b0   : > { %v1403_v28 = vsub.f32 %v1399_v24, %v1402_v27  ;;  %v1610_v27 = vld [vmem:[%s9112_s8 + $0x40] sm:$0xff] }
 0x8b2   : > { %v1404_v29 = vmul.f32 1.442695, %v1403_v28  ;;  %v1611_v28 = vld [vmem:[%s9112_s8 + $0x48] sm:$0xff] }
 0x8b3   : > { %v1412_v32 = vpop.permute.xlu0 %1411 }
 0x8b4   : > { %7050 = vpow2.f32 %v1404_v29  ;;  %6058 = vmatpush3.msra.mxu1 %v1412_v32  ;;  %v1628_v29 = vld [vmem:[%s9113_s9 + $0x50] sm:$0xff]  ;;  %v6632_v32 = vpack.c.bf16 %v1611_v28, %v1610_v27 }
 0x8b5   : > { %6619 = vmatprep.subr.bf16.mxu1 %v7211_v3 }
 0x8b7   : > { %v1489_v45 = vpop.permute.xlu0 %1488 }
 0x8b8   : > { %v1499_v48 = vsel %vm826_vm2, %v7609_v46, %v1489_v45  ;;  %v1618_v46 = vld [vmem:[%s9113_s9] sm:$0xff]  ;;  %v6638_v45 = vpack.c.bf16 %v1615_v40, %v1614_v23 }
 0x8b9   : > { %v6644_v59 = vpack.c.bf16 %v1619_v55, %v1618_v46  ;;  %v1634_v46 = vld [vmem:[%s9114_s10] sm:$0xff]  ;;  %v1635_v55 = vld [vmem:[%s9114_s10 + $0x8] sm:$0xff] }
 0x8bb   : > { %v1493_v47 = vpop.permute.xlu0 %1492 }
 0x8bc   : > { %v1501_v49 = vsel %vm1500_vm7, %v1499_v48, %v1493_v47  ;;  %v1616_v48 = vld [vmem:[%s9112_s8 + $0x70] sm:$0xff] }
 0x8be   : > { %v7051_v33 = vpop.eup %7050 }
 0x8bf   : > { %v1406_v35 = vsel %vm826_vm2, %v7051_v33, 0.0 }
 0x8c0   : > { %1407 = vadd.xlane.f32.xlu1 %v1406_v35 }
 0x94d   : > { %v1408_v37 = vpop.xlane.xlu1 %1407 }
 0x94e   : > { %7052 = vrcp.f32 %v1408_v37  ;;  %v1612_v37 = vld [vmem:[%s9112_s8 + $0x50] sm:$0xff] }
 0x958   : > { %v7053_v34 = vpop.eup %7052 }
 0x959   : > { %v7664_v38 = vmul.f32 %v7053_v34, %v7051_v33  ;;  %v1629_v33 = vld [vmem:[%s9113_s9 + $0x58] sm:$0xff] }
 0x95a   : > { %v6659_v35 = vpack.c.bf16 %v1629_v33, %v1628_v29  ;;  %v1613_v34 = vld [vmem:[%s9112_s8 + $0x58] sm:$0xff] }
 0x95b   : > { %6060 = vmatmul.mubr.msk.f32.vlgmr.msra.gmra.mrb[16].mxu1 %vm826_vm2, %v7664_v38  ;;  %v6635_v16 = vpack.c.bf16 %v1613_v34, %v1612_v37 }
 0x95c   : > { %6105 = vmatprep.mubr.msk.f32.mxu1 %vm7212_vm0, %v7213_v11  ;;  %6621 = vmatpush3.bf16.msra.mxu1 %v6620_v63 }
 0x95d   : > { %6622 = vmatprep.subr.bf16.mxu1 %v7211_v3 }
 0x960   : > { %6624 = vmatpush3.bf16.msra.mxu1 %v6623_v4  ;;  %v1640_v4 = vld [vmem:[%s9114_s10 + $0x30] sm:$0xff] }
 0x961   : > { %6625 = vmatprep.subr.bf16.mxu1 %v7211_v3  ;;  %v6677_v6 = vpack.c.bf16 %v1641_v5, %v1640_v4 }
 0x964   : > { %6627 = vmatpush3.bf16.msra.mxu1 %v6626_v10  ;;  %v1644_v10 = vld [vmem:[%s9114_s10 + $0x50] sm:$0xff] }
 0x965   : > { %6628 = vmatprep.subr.bf16.mxu1 %v7211_v3  ;;  %v6683_v13 = vpack.c.bf16 %v1645_v12, %v1644_v10 }
 0x968   : > { %6630 = vmatpush3.bf16.msra.mxu1 %v6629_v18  ;;  %v1648_v18 = vld [vmem:[%s9114_s10 + $0x70] sm:$0xff] }
 0x969   : > { %6631 = vmatprep.subr.bf16.mxu1 %v7211_v3  ;;  %v6689_v60 = vpack.c.bf16 %v1649_v20, %v1648_v18 }
 0x96c   : > { %6633 = vmatpush3.bf16.msra.mxu1 %v6632_v32 }
 0x96d   : > { %6634 = vmatprep.subr.bf16.mxu1 %v7211_v3 }
 0x970   : > { %6636 = vmatpush3.bf16.msra.mxu1 %v6635_v16 }
 0x971   : > { %6637 = vmatprep.subr.bf16.mxu1 %v7211_v3 }
 0x974   : > { %6639 = vmatpush3.bf16.msra.mxu1 %v6638_v45 }
 0x975   : > { %6640 = vmatprep.subr.bf16.mxu1 %v7211_v3 }
 0xa2e   : > { %v1483_v42 = vpop.f32.mrb[16].mxu1 }
 0xa2f   : > { %1496 = vrot.lane.b32.xlu0 %v1483_v42, %s9132_s20  ;;  %v6061_v43 = vpop.f32.mrb[17].mxu1  ;;  %v1632_v42 = vld [vmem:[%s9113_s9 + $0x70] sm:$0xff]  ;;  %s7119_s20 = sshll.u32 %s7224_s0, 4  ;;  %s7120_s20 = int_to_ptr.vmem [resolvable:$false] %s7119_s20 }
 0xa30   : > { %v1633_v43 = vld [vmem:[%s9113_s9 + $0x78] sm:$0xff]  ;;  %s7121_s3 = scalar_lea.vmem %s7120_s20, 256 }
 0xa31   : > { %v6665_v47 = vpack.c.bf16 %v1633_v43, %v1632_v42 }
 0xaa1   : > { %v1497_v50 = vpop.permute.xlu0 %1496 }
 0xaa2   : > { %v1503_v51 = vsel %vm1502_vm8, %v1501_v49, %v1497_v50  ;;  %v1617_v49 = vld [vmem:[%s9112_s8 + $0x78] sm:$0xff] }
 0xaa3   : > { %6071 = vmatmul.mubr.msk.f32.vlgmr.msra.gmra.mrb[4].mxu0 %vm1504_vm9, %v1503_v51  ;;  %v6641_v50 = vpack.c.bf16 %v1617_v49, %v1616_v48  ;;  %v547_v51 = vld [vmem:[%s7807_s23] sm:$0xff] }
 0xaa4   : > { %6140 = vmatprep.mubr.msk.f32.mxu0 %vm7212_vm0, %v7213_v11  ;;  %6645 = vmatpush3.bf16.msra.mxu0 %v6644_v59  ;;  %v6668_v59 = vpack.c.bf16 %v1635_v55, %v1634_v46 }
 0xaa5   : > { %6646 = vmatprep.subr.bf16.mxu0 %v7211_v3  ;;  %6642 = vmatpush3.bf16.msra.mxu1 %v6641_v50 }
 0xaa6   : > { %6667 = vmatprep.subr.bf16.mxu1 %v7211_v3 }
 0xb76   : > { %v1574_v52 = vpop.f32.mrb[4].mxu0 }
 0xb77   : > { %v1575_v53 = vadd.f32 %v1574_v52, %v7493_v57  ;;  %v6072_v54 = vpop.f32.mrb[5].mxu0  ;;  %v1620_v57 = vld [vmem:[%s9113_s9 + $0x10] sm:$0xff] }
 0xb78   : > { %v6647_v58 = vpack.c.bf16 %v1621_v62, %v1620_v57  ;;  %v1636_v57 = vld [vmem:[%s9114_s10 + $0x10] sm:$0xff]  ;;  %v1637_v62 = vld [vmem:[%s9114_s10 + $0x18] sm:$0xff] }
 0xb79   : > { %1578 = vadd.xlane.f32.xlu1 %v1575_v53  ;;  %v6671_v63 = vpack.c.bf16 %v1637_v62, %v1636_v57 }
 0xb7a   : > { %6648 = vmatpush3.bf16.msra.mxu0 %v6647_v58  ;;  %v6674_v58 = vpack.c.bf16 %v1639_v2, %v1638_v1 }
 0xb7b   : > { %6649 = vmatprep.subr.bf16.mxu0 %v7211_v3 }
 0xb7e   : > { %6651 = vmatpush3.bf16.msra.mxu0 %v6650_v9  ;;  %v6680_v9 = vpack.c.bf16 %v1643_v8, %v1642_v7 }
 0xb7f   : > { %6652 = vmatprep.subr.bf16.mxu0 %v7211_v3 }
 0xb82   : > { %6654 = vmatpush3.bf16.msra.mxu0 %v6653_v17  ;;  %v6686_v17 = vpack.c.bf16 %v1647_v15, %v1646_v14 }
 0xb83   : > { %6655 = vmatprep.subr.bf16.mxu0 %v7211_v3 }
 0xb86   : > { %6657 = vmatpush3.bf16.msra.mxu0 %v6656_v21 }
 0xb87   : > { %6658 = vmatprep.subr.bf16.mxu0 %v7211_v3 }
 0xb8a   : > { %6660 = vmatpush3.bf16.msra.mxu0 %v6659_v35 }
 0xb8b   : > { %6661 = vmatprep.subr.bf16.mxu0 %v7211_v3 }
 0xb8e   : > { %6663 = vmatpush3.bf16.msra.mxu0 %v6662_v41 }
 0xb8f   : > { %6664 = vmatprep.subr.bf16.mxu0 %v7211_v3 }
 0xb92   : > { %6666 = vmatpush3.bf16.msra.mxu0 %v6665_v47 }
 0xb93   : > { %6183 = vmatprep.subr.mxu0 %v7213_v11 }
 0xb95   : > { %6141 = vmatmul.mubr.f32.vlgmr.msra.gmra.mrb[6].mxu0 %v547_v51 }
 0xb96   : > { %6185 = vmatprep.mubr.msk.f32.mxu0 %vm7212_vm0, %v7213_v11 }
 0xc06   : > { %v1579_v22 = vpop.xlane.xlu1 %1578 }
 0xc07   : > { %v1581_v24 = vmul.f32 0.0078125, %v1579_v22 }
 0xc09   : > { %v1582_v25 = vsub.f32 %v1575_v53, %v1581_v24 }
 0xc0b   : > { %v1583_v26 = vmul.f32 %v1582_v25, %v1582_v25 }
 0xc0d   : > { %1584 = vadd.xlane.f32.xlu0 %v1583_v26 }
 0xc68   : > { %v1790_v21 = vpop.f32.mrb[6].mxu0 }
 0xc69   : > { %v6142_v22 = vpop.f32.mrb[7].mxu0 }
 0xc9a   : > { %v1585_v52 = vpop.xlane.xlu0 %1584 }
 0xc9b   : > { %v1586_v53 = vmul.f32 0.0078125, %v1585_v52 }
 0xc9d   : > { %v1587_v54 = vadd.f32 1e-05, %v1586_v53 }
 0xc9f   : > { %7054 = vrsqrt.f32 %v1587_v54 }
 0xca9   : > { %v7055_v56 = vpop.eup %7054 }
 0xcaa   : > { %v7821_v61 = vmul.f32 %v7055_v56, %v1582_v25 }
 0xcac   : > { %6106 = vmatmul.mubr.f32.vlgmr.msra.gmra.mrb[18].mxu1 %v7821_v61 }
 0xcad   : > { %6669 = vmatpush3.bf16.msra.mxu1 %v6668_v59  ;;  %6175 = vmatprep.mubr.msk.f32.mxu1 %vm7212_vm0, %v7213_v11 }
 0xcae   : > { %6670 = vmatprep.subr.bf16.mxu1 %v7211_v3 }
 0xcb1   : > { %6672 = vmatpush3.bf16.msra.mxu1 %v6671_v63 }
 0xcb2   : > { %6673 = vmatprep.subr.bf16.mxu1 %v7211_v3 }
 0xcb5   : > { %6675 = vmatpush3.bf16.msra.mxu1 %v6674_v58 }
 0xcb6   : > { %6676 = vmatprep.subr.bf16.mxu1 %v7211_v3 }
 0xcb9   : > { %6678 = vmatpush3.bf16.msra.mxu1 %v6677_v6 }
 0xcba   : > { %6679 = vmatprep.subr.bf16.mxu1 %v7211_v3 }
 0xcbd   : > { %6681 = vmatpush3.bf16.msra.mxu1 %v6680_v9 }
 0xcbe   : > { %6682 = vmatprep.subr.bf16.mxu1 %v7211_v3 }
 0xcc1   : > { %6684 = vmatpush3.bf16.msra.mxu1 %v6683_v13 }
 0xcc2   : > { %6685 = vmatprep.subr.bf16.mxu1 %v7211_v3 }
 0xcc5   : > { %6687 = vmatpush3.bf16.msra.mxu1 %v6686_v17 }
 0xcc6   : > { %6688 = vmatprep.subr.bf16.mxu1 %v7211_v3 }
 0xcc9   : > { %6690 = vmatpush3.bf16.msra.mxu1 %v6689_v60 }
 0xcca   : > { %6178 = vmatprep.subr.mxu1 %v7213_v11 }
 0xccc   : > { %6176 = vmatmul.mubr.f32.vlgmr.msra.gmra.mrb[20].mxu1 %v547_v51 }
 0xccd   : > { %6180 = vmatprep.mubr.msk.f32.mxu1 %vm7212_vm0, %v7213_v11 }
 0xcd2   : > { %6179 = vmatpush3.xpose.msk.msra.mxu1 %vm826_vm2, %v1790_v21 }
 0xcd3   : > { %6213 = vmatprep.subr.mxu1 %v7213_v11 }
 0xd7f   : > { %v7880_v24 = vpop.f32.mrb[18].mxu1 }
 0xd80   : > { %v6107_v25 = vpop.f32.mrb[19].mxu1  ;;  %6181 = vmatmul.mubr.msk.f32.vlgmr.msra.gmra.mrb[22].mxu1 %vm826_vm2, %v7880_v24 }
 0xd81   : > { %6215 = vmatprep.mubr.msk.f32.mxu1 %vm7212_vm0, %v7213_v11 }
 0xd9f   : > { %v7886_v26 = vpop.f32.mrb[20].mxu1 }
 0xda0   : > { %v6177_v27 = vpop.f32.mrb[21].mxu1  ;;  %6184 = vmatpush3.msra.mxu0 %v7886_v26 }
 0xda1   : > { %6188 = vmatprep.subr.mxu0 %v7213_v11 }
 0xe53   : > { %v1936_v28 = vpop.f32.mrb[22].mxu1 }
 0xe54   : > { %v1946_v29 = vsel %vm1945_vm10, -1e+09, %v1936_v28  ;;  %v6182_v32 = vpop.f32.mrb[23].mxu1 }
 0xe55   : > { %v1947_v33 = vsel %vm826_vm2, %v1946_v29, -inf }
 0xe56   : > { %1948 = vmax.xlane.f32.xlu1 %v1947_v33 }
 0xe67   : > { %2033 = vrot.lane.b32.xlu1 %v1790_v21, %s9162_s17 }
 0xee3   : > { %v1949_v35 = vpop.xlane.xlu1 %1948 }
 0xee4   : > { %v1950_v37 = vsub.f32 %v1946_v29, %v1949_v35 }
 0xee6   : > { %v1951_v34 = vmul.f32 1.442695, %v1950_v37 }
 0xee7   : > { %v2034_v39 = vpop.permute.xlu1 %2033 }
 0xee8   : > { %7056 = vpow2.f32 %v1951_v34 }
 0xef2   : > { %v7057_v31 = vpop.eup %7056 }
 0xef3   : > { %v1953_v16 = vsel %vm826_vm2, %v7057_v31, 0.0 }
 0xef4   : > { %1954 = vadd.xlane.f32.xlu1 %v1953_v16 }
 0xf05   : > { %2031 = vrot.lane.b32.xlu1 %v7880_v24, %s9162_s17 }
 0xf81   : > { %v1955_v23 = vpop.xlane.xlu1 %1954 }
 0xf82   : > { %7058 = vrcp.f32 %v1955_v23  ;;  %v1652_v23 = vld [vmem:[%s9115_s11 + $0x10] sm:$0xff] }
 0xf85   : > { %v2032_v42 = vpop.permute.xlu1 %2031 }
 0xf8c   : > { %v7059_v40 = vpop.eup %7058 }
 0xf8d   : > { %v7898_v41 = vmul.f32 %v7059_v40, %v7057_v31 }
 0xf8f   : > { %6186 = vmatmul.mubr.msk.f32.vlgmr.msra.gmra.mrb[8].mxu0 %vm826_vm2, %v7898_v41 }
 0xf90   : > { %6189 = vmatpush3.xpose.msk.msra.mxu0 %vm826_vm2, %v2034_v39  ;;  %6190 = vmatprep.mubr.msk.f32.mxu0 %vm7212_vm0, %v7213_v11  ;;  %v1651_v39 = vld [vmem:[%s9115_s11 + $0x8] sm:$0xff] }
 0xf91   : > { %6193 = vmatprep.subr.mxu0 %v7213_v11 }
 0xf93   : > { %6191 = vmatmul.mubr.msk.f32.vlgmr.msra.gmra.mrb[10].mxu0 %vm826_vm2, %v2032_v42  ;;  %v1653_v42 = vld [vmem:[%s9115_s11 + $0x18] sm:$0xff] }
 0xf94   : > { %6195 = vmatprep.mubr.msk.f32.mxu0 %vm7212_vm0, %v7213_v11 }
0x1062   : > { %v7909_v43 = vpop.f32.mrb[8].mxu0 }
0x1063   : > { %v6187_v45 = vpop.f32.mrb[9].mxu0 }
0x1064   : > { %v6695_v45 = vpack.c.bf16 %v1653_v42, %v1652_v23  ;;  %v2661_v23 = vld [vmem:[%s9116_s12 + $0xa0] sm:$0xff]  ;;  %v2666_v42 = vld [vmem:[%s9116_s12 + $0xc8] sm:$0xff] }
0x1066   : > { %v2105_v47 = vpop.f32.mrb[10].mxu0 }
0x1067   : > { %v2109_v48 = vsel %vm1945_vm10, -1e+09, %v2105_v47  ;;  %v6192_v49 = vpop.f32.mrb[11].mxu0 }
0x1068   : > { %v2110_v50 = vsel %vm826_vm2, %v2109_v48, -inf }
0x1069   : > { %2111 = vmax.xlane.f32.xlu0 %v2110_v50 }
0x107f   : > { %2122 = vrot.lane.b32.xlu0 %v7886_v26, %s9162_s17 }
0x1083   : > { %2200 = vrot.lane.b32.xlu0 %v1790_v21, %s9163_s25 }
0x1087   : > { %2198 = vrot.lane.b32.xlu0 %v7880_v24, %s9163_s25 }
0x10f6   : > { %v2112_v51 = vpop.xlane.xlu0 %2111 }
0x10f7   : > { %v2113_v52 = vsub.f32 %v2109_v48, %v2112_v51 }
0x10f9   : > { %v2114_v53 = vmul.f32 1.442695, %v2113_v52 }
0x10fa   : > { %v2123_v54 = vpop.permute.xlu0 %2122 }
0x10fb   : > { %7060 = vpow2.f32 %v2114_v53  ;;  %6194 = vmatpush3.msra.mxu0 %v2123_v54 }
0x10fc   : > { %6198 = vmatprep.subr.mxu0 %v7213_v11 }
0x10fe   : > { %v2201_v57 = vpop.permute.xlu0 %2200 }
0x1102   : > { %v2199_v63 = vpop.permute.xlu0 %2198 }
0x1105   : > { %v7061_v46 = vpop.eup %7060 }
0x1106   : > { %v2116_v55 = vsel %vm826_vm2, %v7061_v46, 0.0 }
0x1107   : > { %2117 = vadd.xlane.f32.xlu1 %v2116_v55 }
0x1118   : > { %2288 = vrot.lane.b32.xlu1 %v7886_v26, %s9163_s25 }
0x111c   : > { %2366 = vrot.lane.b32.xlu1 %v1790_v21, %s9164_s26 }
0x1194   : > { %v2118_v56 = vpop.xlane.xlu1 %2117 }
0x1195   : > { %7062 = vrcp.f32 %v2118_v56 }
0x1198   : > { %v2289_v1 = vpop.permute.xlu1 %2288 }
0x119c   : > { %v2367_v14 = vpop.permute.xlu1 %2366 }
0x119f   : > { %v7063_v59 = vpop.eup %7062 }
0x11a0   : > { %v7924_v62 = vmul.f32 %v7063_v59, %v7061_v46  ;;  %v2642_v59 = vld [vmem:[%s9116_s12 + $0x8] sm:$0xff] }
0x11a2   : > { %6196 = vmatmul.mubr.msk.f32.vlgmr.msra.gmra.mrb[12].mxu0 %vm826_vm2, %v7924_v62 }
0x11a3   : > { %6199 = vmatpush3.xpose.msk.msra.mxu0 %vm826_vm2, %v2201_v57  ;;  %6200 = vmatprep.mubr.msk.f32.mxu0 %vm7212_vm0, %v7213_v11  ;;  %v2641_v57 = vld [vmem:[%s9116_s12] sm:$0xff] }
0x11a4   : > { %6203 = vmatprep.subr.mxu0 %v7213_v11 }
0x11a6   : > { %6201 = vmatmul.mubr.msk.f32.vlgmr.msra.gmra.mrb[14].mxu0 %vm826_vm2, %v2199_v63 }
0x11a7   : > { %6204 = vmatpush3.msra.mxu0 %v2289_v1  ;;  %6205 = vmatprep.mubr.msk.f32.mxu0 %vm7212_vm0, %v7213_v11  ;;  %v2643_v1 = vld [vmem:[%s9116_s12 + $0x10] sm:$0xff] }
0x11a8   : > { %6208 = vmatprep.subr.mxu0 %v7213_v11 }
0x1275   : > { %v2194_v2 = vpop.f32.mrb[12].mxu0 }
0x1276   : > { %v6197_v58 = vpop.f32.mrb[13].mxu0 }
0x1277   : > { %v6699_v58 = vpack.c.bf16 %v2643_v1, %v2641_v57  ;;  %v2746_v57 = vld [vmem:[%s9117_s13] sm:$0xff]  ;;  %v2747_v1 = vld [vmem:[%s9117_s13 + $0x8] sm:$0xff] }
0x1279   : > { %v2272_v4 = vpop.f32.mrb[14].mxu0 }
0x127a   : > { %v2276_v5 = vsel %vm1945_vm10, -1e+09, %v2272_v4  ;;  %v6202_v6 = vpop.f32.mrb[15].mxu0 }
0x127b   : > { %v2277_v7 = vsel %vm826_vm2, %v2276_v5, -inf  ;;  %v2647_v6 = vld [vmem:[%s9116_s12 + $0x30] sm:$0xff] }
0x127c   : > { %2278 = vmax.xlane.f32.xlu0 %v2277_v7  ;;  %v2650_v7 = vld [vmem:[%s9116_s12 + $0x48] sm:$0xff] }
0x1309   : > { %v2279_v8 = vpop.xlane.xlu0 %2278 }
0x130a   : > { %v2280_v9 = vsub.f32 %v2276_v5, %v2279_v8  ;;  %v2645_v5 = vld [vmem:[%s9116_s12 + $0x20] sm:$0xff]  ;;  %v2652_v8 = vld [vmem:[%s9116_s12 + $0x58] sm:$0xff] }
0x130c   : > { %v2281_v10 = vmul.f32 1.442695, %v2280_v9  ;;  %v6703_v9 = vpack.c.bf16 %v2647_v6, %v2645_v5  ;;  %v2748_v5 = vld [vmem:[%s9117_s13 + $0x10] sm:$0xff]  ;;  %v2749_v6 = vld [vmem:[%s9117_s13 + $0x18] sm:$0xff] }
0x130e   : > { %7064 = vpow2.f32 %v2281_v10  ;;  %v6705_v10 = vpack.c.bf16 %v2652_v8, %v2650_v7  ;;  %v2766_v7 = vld [vmem:[%s9117_s13 + $0xa0] sm:$0xff]  ;;  %v2767_v8 = vld [vmem:[%s9117_s13 + $0xa8] sm:$0xff] }
0x1318   : > { %v7065_v12 = vpop.eup %7064 }
0x1319   : > { %v2283_v13 = vsel %vm826_vm2, %v7065_v12, 0.0 }
0x131a   : > { %2284 = vadd.xlane.f32.xlu1 %v2283_v13  ;;  %v2651_v13 = vld [vmem:[%s9116_s12 + $0x50] sm:$0xff] }
0x132b   : > { %2364 = vrot.lane.b32.xlu1 %v7880_v24, %s9164_s26 }
0x13a7   : > { %v2285_v15 = vpop.xlane.xlu1 %2284 }
0x13a8   : > { %7066 = vrcp.f32 %v2285_v15  ;;  %v2656_v15 = vld [vmem:[%s9116_s12 + $0x78] sm:$0xff] }
0x13ab   : > { %v2365_v20 = vpop.permute.xlu1 %2364 }
0x13b2   : > { %v7067_v17 = vpop.eup %7066 }
0x13b3   : > { %v7942_v18 = vmul.f32 %v7067_v17, %v7065_v12  ;;  %v2649_v12 = vld [vmem:[%s9116_s12 + $0x40] sm:$0xff] }
0x13b4   : > { %v6707_v17 = vpack.c.bf16 %v2651_v13, %v2649_v12  ;;  %v2750_v12 = vld [vmem:[%s9117_s13 + $0x20] sm:$0xff]  ;;  %v2751_v13 = vld [vmem:[%s9117_s13 + $0x28] sm:$0xff] }
0x13b5   : > { %6206 = vmatmul.mubr.msk.f32.vlgmr.msra.gmra.mrb[16].mxu0 %vm826_vm2, %v7942_v18 }
0x13b6   : > { %6209 = vmatpush3.xpose.msk.msra.mxu0 %vm826_vm2, %v2367_v14  ;;  %6210 = vmatprep.mubr.msk.f32.mxu0 %vm7212_vm0, %v7213_v11  ;;  %v2654_v14 = vld [vmem:[%s9116_s12 + $0x68] sm:$0xff] }
0x13b7   : > { %6691 = vmatprep.subr.bf16.mxu0 %v7211_v3 }
0x13b9   : > { %6211 = vmatmul.mubr.msk.f32.vlgmr.msra.gmra.mrb[18].mxu0 %vm826_vm2, %v2365_v20  ;;  %v6709_v20 = vpack.c.bf16 %v2656_v15, %v2654_v14  ;;  %v2768_v14 = vld [vmem:[%s9117_s13 + $0xb0] sm:$0xff]  ;;  %v2769_v15 = vld [vmem:[%s9117_s13 + $0xb8] sm:$0xff] }
0x13ba   : > { %6226 = vmatprep.mubr.msk.f32.mxu0 %vm7212_vm0, %v7213_v11 }
0x1488   : > { %v2360_v60 = vpop.f32.mrb[16].mxu0 }
0x1489   : > { %v6207_v21 = vpop.f32.mrb[17].mxu0 }
0x148a   : > { %v2655_v21 = vld [vmem:[%s9116_s12 + $0x70] sm:$0xff] }
0x148c   : > { %v2438_v22 = vpop.f32.mrb[18].mxu0 }
0x148d   : > { %v2442_v24 = vsel %vm1945_vm10, -1e+09, %v2438_v22  ;;  %v6212_v25 = vpop.f32.mrb[19].mxu0 }
0x148e   : > { %v2443_v27 = vsel %vm826_vm2, %v2442_v24, -inf }
0x148f   : > { %2444 = vmax.xlane.f32.xlu0 %v2443_v27 }
0x14a5   : > { %2454 = vrot.lane.b32.xlu0 %v7886_v26, %s9164_s26  ;;  %v1650_v26 = vld [vmem:[%s9115_s11] sm:$0xff] }
0x14a6   : > { %v6692_v40 = vpack.c.bf16 %v1651_v39, %v1650_v26  ;;  %v2664_v26 = vld [vmem:[%s9116_s12 + $0xb8] sm:$0xff] }
0x14a8   : > { %6693 = vmatpush3.bf16.msra.mxu0 %v6692_v40  ;;  %v2663_v40 = vld [vmem:[%s9116_s12 + $0xb0] sm:$0xff] }
0x14a9   : > { %2531 = vrot.lane.b32.xlu0 %v2194_v2, %s9165_s27  ;;  %6694 = vmatprep.subr.bf16.mxu0 %v7211_v3  ;;  %v2648_v2 = vld [vmem:[%s9116_s12 + $0x38] sm:$0xff] }
0x14ac   : > { %6696 = vmatpush3.bf16.msra.mxu0 %v6695_v45  ;;  %v6719_v45 = vpack.c.bf16 %v2663_v40, %v2661_v23  ;;  %v2775_v23 = vld [vmem:[%s9117_s13 + $0xe8] sm:$0xff] }
0x14ad   : > { %2535 = vrot.lane.b32.xlu0 %v2360_v60, %s9166_s29  ;;  %v2653_v60 = vld [vmem:[%s9116_s12 + $0x60] sm:$0xff] }
0x14ae   : > { %v6711_v22 = vpack.c.bf16 %v2655_v21, %v2653_v60  ;;  %v2752_v60 = vld [vmem:[%s9117_s13 + $0x30] sm:$0xff]  ;;  %v2753_v21 = vld [vmem:[%s9117_s13 + $0x38] sm:$0xff] }
0x151c   : > { %v2445_v28 = vpop.xlane.xlu0 %2444 }
0x151d   : > { %v2446_v29 = vsub.f32 %v2442_v24, %v2445_v28 }
0x151f   : > { %v2447_v32 = vmul.f32 1.442695, %v2446_v29  ;;  %v2658_v29 = vld [vmem:[%s9116_s12 + $0x88] sm:$0xff] }
0x1520   : > { %v2455_v33 = vpop.permute.xlu0 %2454 }
0x1521   : > { %7068 = vpow2.f32 %v2447_v32  ;;  %6214 = vmatpush3.msra.mxu1 %v2455_v33  ;;  %v2660_v32 = vld [vmem:[%s9116_s12 + $0x98] sm:$0xff] }
0x1522   : > { %v6713_v33 = vpack.c.bf16 %v2660_v32, %v2658_v29  ;;  %v2754_v29 = vld [vmem:[%s9117_s13 + $0x40] sm:$0xff]  ;;  %v2755_v32 = vld [vmem:[%s9117_s13 + $0x48] sm:$0xff] }
0x1524   : > { %v2532_v49 = vpop.permute.xlu0 %2531 }
0x1525   : > { %v2542_v51 = vsel %vm826_vm2, %v7909_v43, %v2532_v49  ;;  %v2644_v43 = vld [vmem:[%s9116_s12 + $0x18] sm:$0xff]  ;;  %v2667_v49 = vld [vmem:[%s9116_s12 + $0xd0] sm:$0xff] }
0x1526   : > { %v6697_v63 = vpack.c.bf16 %v2644_v43, %v2642_v59  ;;  %v2762_v59 = vld [vmem:[%s9117_s13 + $0x80] sm:$0xff]  ;;  %v2763_v43 = vld [vmem:[%s9117_s13 + $0x88] sm:$0xff] }
0x1528   : > { %v2536_v50 = vpop.permute.xlu0 %2535  ;;  %6698 = vmatprep.subr.bf16.mxu1 %v6697_v63  ;;  %v6729_v63 = vpack.c.bf16 %v2763_v43, %v2762_v59 }
0x1529   : > { %v2543_v52 = vsel %vm1500_vm7, %v2542_v51, %v2536_v50  ;;  %v2670_v51 = vld [vmem:[%s9116_s12 + $0xe8] sm:$0xff] }
0x152a   : > { %6730 = vmatprep.subr.bf16.mxu0 %v6729_v63 }
0x152b   : > { %v7069_v35 = vpop.eup %7068 }
0x152c   : > { %v2449_v37 = vsel %vm826_vm2, %v7069_v35, 0.0 }
0x152d   : > { %2450 = vadd.xlane.f32.xlu1 %v2449_v37  ;;  %v2659_v37 = vld [vmem:[%s9116_s12 + $0x90] sm:$0xff] }
0x15ba   : > { %v2451_v34 = vpop.xlane.xlu1 %2450 }
0x15bb   : > { %7070 = vrcp.f32 %v2451_v34 }
0x15c5   : > { %v7071_v31 = vpop.eup %7070 }
0x15c6   : > { %v7961_v16 = vmul.f32 %v7071_v31, %v7069_v35  ;;  %v2657_v35 = vld [vmem:[%s9116_s12 + $0x80] sm:$0xff]  ;;  %v2662_v31 = vld [vmem:[%s9116_s12 + $0xa8] sm:$0xff] }
0x15c7   : > { %v6715_v34 = vpack.c.bf16 %v2659_v37, %v2657_v35  ;;  %v6717_v39 = vpack.c.bf16 %v2664_v26, %v2662_v31  ;;  %v2773_v35 = vld [vmem:[%s9117_s13 + $0xd8] sm:$0xff]  ;;  %v6747_v37 = vpack.c.bf16 %v2755_v32, %v2754_v29  ;;  %v2756_v31 = vld [vmem:[%s9117_s13 + $0x50] sm:$0xff] }
0x15c8   : > { %6216 = vmatmul.mubr.msk.f32.vlgmr.msra.gmra.mrb[24].mxu1 %vm826_vm2, %v7961_v16  ;;  %v2757_v26 = vld [vmem:[%s9117_s13 + $0x58] sm:$0xff]  ;;  %v5365_v29 = vld [vmem:[%s9108_s4 + $0xb0] sm:$0xff] }
0x15c9   : > { %2737 = vmatprep.mubr.f32.mxu1 %v7213_v11  ;;  %6700 = vmatpush1.bf16.msra.mxu1 %v6699_v58  ;;  %v6731_v58 = vpack.c.bf16 %v2747_v1, %v2746_v57  ;;  %v6751_v40 = vpack.c.bf16 %v2757_v26, %v2756_v31  ;;  %v5366_v32 = vld [vmem:[%s9108_s4 + $0xb8] sm:$0xff] }
0x169b   : > { %v2526_v47 = vpop.f32.mrb[24].mxu1 }
0x169c   : > { %2539 = vrot.lane.b32.xlu0 %v2526_v47, %s9167_s16  ;;  %v6217_v48 = vpop.f32.mrb[25].mxu1  ;;  %v2668_v47 = vld [vmem:[%s9116_s12 + $0xd8] sm:$0xff] }
0x169d   : > { %v2665_v48 = vld [vmem:[%s9116_s12 + $0xc0] sm:$0xff]  ;;  %v6721_v50 = vpack.c.bf16 %v2668_v47, %v2666_v42  ;;  %v2759_v47 = vld [vmem:[%s9117_s13 + $0x68] sm:$0xff] }
0x170e   : > { %v2540_v53 = vpop.permute.xlu0 %2539 }
0x170f   : > { %v2544_v54 = vsel %vm1502_vm8, %v2543_v52, %v2540_v53  ;;  %v2672_v52 = vld [vmem:[%s9116_s12 + $0xf8] sm:$0xff]  ;;  %v6723_v53 = vpack.c.bf16 %v2667_v49, %v2665_v48 }
0x1710   : > { %6227 = vmatmul.mubr.msk.f32.vlgmr.msra.gmra.mrb[20].mxu0 %vm1504_vm9, %v2544_v54  ;;  %v6725_v54 = vpack.c.bf16 %v2672_v52, %v2670_v51 }
0x1711   : > { %6732 = vmatpush3.bf16.msra.mxu0 %v6731_v58 }
0x17e3   : > { %v2614_v46 = vpop.f32.mrb[20].mxu0 }
0x17e4   : > { %v2615_v55 = vadd.f32 %v2614_v46, %v7821_v61  ;;  %v6228_v56 = vpop.f32.mrb[21].mxu0  ;;  %v2646_v61 = vld [vmem:[%s9116_s12 + $0x28] sm:$0xff]  ;;  %v2669_v46 = vld [vmem:[%s9116_s12 + $0xe0] sm:$0xff] }
0x17e5   : > { %v6701_v4 = vpack.c.bf16 %v2648_v2, %v2646_v61  ;;  %v2764_v61 = vld [vmem:[%s9117_s13 + $0x90] sm:$0xff]  ;;  %v2765_v2 = vld [vmem:[%s9117_s13 + $0x98] sm:$0xff] }
0x17e6   : > { %2618 = vadd.xlane.f32.xlu1 %v2615_v55 }
0x17e7   : > { %6702 = vmatprep.subr.bf16.mxu1 %v6701_v4  ;;  %v6733_v4 = vpack.c.bf16 %v2765_v2, %v2764_v61 }
0x17e8   : > { %6704 = vmatpush1.bf16.msra.mxu1 %v6703_v9  ;;  %v6735_v9 = vpack.c.bf16 %v2749_v6, %v2748_v5  ;;  %v5359_v5 = vld [vmem:[%s9108_s4 + $0x80] sm:$0xff]  ;;  %v5360_v6 = vld [vmem:[%s9108_s4 + $0x88] sm:$0xff] }
0x17e9   : > { %6706 = vmatprep.subr.bf16.mxu1 %v6705_v10  ;;  %6734 = vmatprep.subr.bf16.mxu0 %v6733_v4  ;;  %v6737_v10 = vpack.c.bf16 %v2767_v8, %v2766_v7  ;;  %v5375_v7 = vld [vmem:[%s9109_s5 + $0x80] sm:$0xff]  ;;  %v6762_v8 = vpack.c.bf16 %v5360_v6, %v5359_v5 }
0x17ea   : > { %6736 = vmatpush3.bf16.msra.mxu0 %v6735_v9  ;;  %v5376_v9 = vld [vmem:[%s9109_s5 + $0x88] sm:$0xff] }
0x17eb   : > { %6738 = vmatprep.subr.bf16.mxu0 %v6737_v10  ;;  %v5361_v10 = vld [vmem:[%s9108_s4 + $0x90] sm:$0xff] }
0x17ec   : > { %6708 = vmatpush1.bf16.msra.mxu1 %v6707_v17  ;;  %v6739_v17 = vpack.c.bf16 %v2751_v13, %v2750_v12  ;;  %v5362_v12 = vld [vmem:[%s9108_s4 + $0x98] sm:$0xff]  ;;  %v6786_v13 = vpack.c.bf16 %v5376_v9, %v5375_v7  ;;  %v5392_v9 = vld [vmem:[%s9110_s6 + $0x88] sm:$0xff] }
0x17ed   : > { %6710 = vmatprep.subr.bf16.mxu1 %v6709_v20  ;;  %v6741_v20 = vpack.c.bf16 %v2769_v15, %v2768_v14  ;;  %v5377_v14 = vld [vmem:[%s9109_s5 + $0x90] sm:$0xff]  ;;  %v5378_v15 = vld [vmem:[%s9109_s5 + $0x98] sm:$0xff] }
0x17ee   : > { %6740 = vmatpush3.bf16.msra.mxu0 %v6739_v17  ;;  %v6765_v17 = vpack.c.bf16 %v5362_v12, %v5361_v10 }
0x17ef   : > { %6742 = vmatprep.subr.bf16.mxu0 %v6741_v20  ;;  %v6789_v20 = vpack.c.bf16 %v5378_v15, %v5377_v14  ;;  %v5393_v14 = vld [vmem:[%s9110_s6 + $0x90] sm:$0xff]  ;;  %v5394_v15 = vld [vmem:[%s9110_s6 + $0x98] sm:$0xff] }
0x17f0   : > { %6712 = vmatpush1.bf16.msra.mxu1 %v6711_v22  ;;  %v2770_v22 = vld [vmem:[%s9117_s13 + $0xc0] sm:$0xff] }
0x17f1   : > { %6714 = vmatprep.subr.bf16.mxu1 %v6713_v33  ;;  %v2772_v33 = vld [vmem:[%s9117_s13 + $0xd0] sm:$0xff] }
0x17f4   : > { %6716 = vmatpush1.bf16.msra.mxu1 %v6715_v34  ;;  %v6749_v34 = vpack.c.bf16 %v2773_v35, %v2772_v33  ;;  %v5381_v33 = vld [vmem:[%s9109_s5 + $0xb0] sm:$0xff]  ;;  %v5382_v35 = vld [vmem:[%s9109_s5 + $0xb8] sm:$0xff] }
0x17f5   : > { %6718 = vmatprep.subr.bf16.mxu1 %v6717_v39  ;;  %v2774_v39 = vld [vmem:[%s9117_s13 + $0xe0] sm:$0xff] }
0x17f6   : > { %v6753_v42 = vpack.c.bf16 %v2775_v23, %v2774_v39 }
0x17f8   : > { %6720 = vmatpush1.bf16.msra.mxu1 %v6719_v45  ;;  %v2758_v45 = vld [vmem:[%s9117_s13 + $0x60] sm:$0xff] }
0x17f9   : > { %6722 = vmatprep.subr.bf16.mxu1 %v6721_v50  ;;  %v6755_v48 = vpack.c.bf16 %v2759_v47, %v2758_v45  ;;  %v5383_v47 = vld [vmem:[%s9109_s5 + $0xc0] sm:$0xff] }
0x17fc   : > { %6724 = vmatpush1.bf16.msra.mxu1 %v6723_v53 }
0x17fd   : > { %6726 = vmatprep.subr.bf16.mxu1 %v6725_v54  ;;  %v2776_v54 = vld [vmem:[%s9117_s13 + $0xf0] sm:$0xff] }
0x1873   : > { %v2619_v24 = vpop.xlane.xlu1 %2618 }
0x1874   : > { %v2620_v25 = vmul.f32 0.0078125, %v2619_v24  ;;  %v2771_v24 = vld [vmem:[%s9117_s13 + $0xc8] sm:$0xff] }
0x1876   : > { %v8034_v27 = vsub.f32 %v2615_v55, %v2620_v25  ;;  %v2671_v55 = vld [vmem:[%s9116_s12 + $0xf0] sm:$0xff]  ;;  %v6743_v25 = vpack.c.bf16 %v2753_v21, %v2752_v60  ;;  %v5363_v60 = vld [vmem:[%s9108_s4 + $0xa0] sm:$0xff]  ;;  %v5364_v21 = vld [vmem:[%s9108_s4 + $0xa8] sm:$0xff] }
0x1877   : > { %v6727_v56 = vpack.c.bf16 %v2671_v55, %v2669_v46  ;;  %v2777_v46 = vld [vmem:[%s9117_s13 + $0xf8] sm:$0xff] }
0x1878   : > { %v2622_v28 = vmul.f32 %v8034_v27, %v8034_v27  ;;  %6744 = vmatpush3.bf16.msra.mxu0 %v6743_v25  ;;  %v6757_v55 = vpack.c.bf16 %v2777_v46, %v2776_v54  ;;  %v6768_v25 = vpack.c.bf16 %v5364_v21, %v5363_v60  ;;  %v5386_v54 = vld [vmem:[%s9109_s5 + $0xd8] sm:$0xff]  ;;  %v5371_v46 = vld [vmem:[%s9108_s4 + $0xe0] sm:$0xff]  ;;  %v5396_v60 = vld [vmem:[%s9110_s6 + $0xa8] sm:$0xff] }
0x1879   : > { %6728 = vmatpush1.bf16.msra.mxu1 %v6727_v56  ;;  %v2760_v56 = vld [vmem:[%s9117_s13 + $0x70] sm:$0xff] }
0x187a   : > { %2623 = vadd.xlane.f32.xlu0 %v2622_v28  ;;  %6761 = vmatprep.subr.bf16.mxu1 %v7211_v3  ;;  %v6745_v28 = vpack.c.bf16 %v2771_v24, %v2770_v22  ;;  %v5379_v22 = vld [vmem:[%s9109_s5 + $0xa0] sm:$0xff]  ;;  %v5380_v24 = vld [vmem:[%s9109_s5 + $0xa8] sm:$0xff] }
0x187c   : > { %6746 = vmatprep.subr.bf16.mxu0 %v6745_v28  ;;  %v6792_v28 = vpack.c.bf16 %v5380_v24, %v5379_v22  ;;  %v5397_v22 = vld [vmem:[%s9110_s6 + $0xb0] sm:$0xff]  ;;  %v5398_v24 = vld [vmem:[%s9110_s6 + $0xb8] sm:$0xff] }
0x187d   : > { %6748 = vmatpush3.bf16.msra.mxu0 %v6747_v37  ;;  %v6771_v37 = vpack.c.bf16 %v5366_v32, %v5365_v29  ;;  %v5400_v29 = vld [vmem:[%s9110_s6 + $0xc8] sm:$0xff] }
0x187e   : > { %6750 = vmatprep.subr.bf16.mxu0 %v6749_v34  ;;  %v6795_v34 = vpack.c.bf16 %v5382_v35, %v5381_v33  ;;  %v5401_v33 = vld [vmem:[%s9110_s6 + $0xd0] sm:$0xff]  ;;  %v5402_v35 = vld [vmem:[%s9110_s6 + $0xd8] sm:$0xff] }
0x1881   : > { %6752 = vmatpush3.bf16.msra.mxu0 %v6751_v40  ;;  %v5367_v40 = vld [vmem:[%s9108_s4 + $0xc0] sm:$0xff] }
0x1882   : > { %6754 = vmatprep.subr.bf16.mxu0 %v6753_v42  ;;  %v5368_v42 = vld [vmem:[%s9108_s4 + $0xc8] sm:$0xff] }
0x1883   : > { %v6774_v45 = vpack.c.bf16 %v5368_v42, %v5367_v40 }
0x1885   : > { %6756 = vmatpush3.bf16.msra.mxu0 %v6755_v48  ;;  %v5384_v48 = vld [vmem:[%s9109_s5 + $0xc8] sm:$0xff] }
0x1886   : > { %6758 = vmatprep.subr.bf16.mxu0 %v6757_v55 }
0x1907   : > { %v2624_v49 = vpop.xlane.xlu0 %2623 }
0x1908   : > { %v2625_v50 = vmul.f32 0.0078125, %v2624_v49  ;;  %v6798_v49 = vpack.c.bf16 %v5384_v48, %v5383_v47 }
0x190a   : > { %v2626_v51 = vadd.f32 1e-05, %v2625_v50  ;;  %v5369_v50 = vld [vmem:[%s9108_s4 + $0xd0] sm:$0xff] }
0x190c   : > { %7072 = vrsqrt.f32 %v2626_v51  ;;  %v5370_v51 = vld [vmem:[%s9108_s4 + $0xd8] sm:$0xff] }
0x1916   : > { %v7073_v52 = vpop.eup %7072 }
0x1917   : > { %v2628_v53 = vmul.f32 %v7073_v52, %v8034_v27  ;;  %v2761_v27 = vld [vmem:[%s9117_s13 + $0x78] sm:$0xff]  ;;  %v6777_v52 = vpack.c.bf16 %v5370_v51, %v5369_v50 }
0x1918   : > { %v6759_v59 = vpack.c.bf16 %v2761_v27, %v2760_v56  ;;  %v5372_v56 = vld [vmem:[%s9108_s4 + $0xe8] sm:$0xff]  ;;  %v5387_v27 = vld [vmem:[%s9109_s5 + $0xe0] sm:$0xff] }
0x1919   : > { %2738 = vmatmul.mubr.f32.vlgmr.msra.gmra.mrb[26].mxu1 %v2628_v53 }
0x191a   : > { %6261 = vmatprep.mubr.msk.f32.mxu1 %vm7212_vm0, %v7213_v11  ;;  %6760 = vmatpush3.bf16.msra.mxu0 %v6759_v59  ;;  %v5388_v59 = vld [vmem:[%s9109_s5 + $0xe8] sm:$0xff] }
0x191b   : > { %6785 = vmatprep.subr.bf16.mxu0 %v7211_v3  ;;  %6763 = vmatpush3.bf16.msra.mxu1 %v6762_v8  ;;  %v5391_v8 = vld [vmem:[%s9110_s6 + $0x80] sm:$0xff] }
0x191c   : > { %6764 = vmatprep.subr.bf16.mxu1 %v7211_v3  ;;  %v6810_v12 = vpack.c.bf16 %v5392_v9, %v5391_v8 }
0x191f   : > { %6766 = vmatpush3.bf16.msra.mxu1 %v6765_v17  ;;  %v6813_v17 = vpack.c.bf16 %v5394_v15, %v5393_v14 }
0x1920   : > { %6767 = vmatprep.subr.bf16.mxu1 %v7211_v3 }
0x1923   : > { %6769 = vmatpush3.bf16.msra.mxu1 %v6768_v25  ;;  %v6819_v25 = vpack.c.bf16 %v5398_v24, %v5397_v22 }
0x1924   : > { %6770 = vmatprep.subr.bf16.mxu1 %v7211_v3 }
0x1927   : > { %6772 = vmatpush3.bf16.msra.mxu1 %v6771_v37  ;;  %v6825_v37 = vpack.c.bf16 %v5402_v35, %v5401_v33 }
0x1928   : > { %6773 = vmatprep.subr.bf16.mxu1 %v7211_v3 }
0x192b   : > { %6775 = vmatpush3.bf16.msra.mxu1 %v6774_v45 }
0x192c   : > { %6776 = vmatprep.subr.bf16.mxu1 %v7211_v3 }
0x192f   : > { %6778 = vmatpush3.bf16.msra.mxu1 %v6777_v52 }
0x1930   : > { %6779 = vmatprep.subr.bf16.mxu1 %v7211_v3 }
0x19ec   : > { %v2739_v43 = vpop.f32.mrb[26].mxu1 }
0x19ed   : > { %v2741_v57 = vpop.f32.mrb[27].mxu1  ;;  %v2744_v1 = vmax.f32 %v2739_v43, 0.0  ;;  %v6780_v43 = vpack.c.bf16 %v5372_v56, %v5371_v46 }
0x19ee   : > { %v2745_v63 = vmax.f32 %v2741_v57, 0.0  ;;  %v6804_v57 = vpack.c.bf16 %v5388_v59, %v5387_v27 }
0x19ef   : > { %6781 = vmatpush3.bf16.msra.mxu1 %v6780_v43 }
0x19f0   : > { %2842 = vmatprep.mubr.f32.mxu0 %v2745_v63  ;;  %v5373_v63 = vld [vmem:[%s9108_s4 + $0xf0] sm:$0xff]  ;;  %6782 = vmatprep.subr.bf16.mxu1 %v7211_v3 }
0x19f1   : > { %2843 = vmatmul.mubr.f32.vlgmr.msra.gmra.mrb[22].mxu0 %v2744_v1  ;;  %v5374_v1 = vld [vmem:[%s9108_s4 + $0xf8] sm:$0xff] }
0x19f2   : > { %6296 = vmatprep.mubr.msk.f32.mxu0 %vm7212_vm0, %v7213_v11  ;;  %6787 = vmatpush3.bf16.msra.mxu0 %v6786_v13 }
0x19f3   : > { %6788 = vmatprep.subr.bf16.mxu0 %v7211_v3 }
0x19f6   : > { %6790 = vmatpush3.bf16.msra.mxu0 %v6789_v20  ;;  %v5395_v20 = vld [vmem:[%s9110_s6 + $0xa0] sm:$0xff] }
0x19f7   : > { %6791 = vmatprep.subr.bf16.mxu0 %v7211_v3  ;;  %v6816_v21 = vpack.c.bf16 %v5396_v60, %v5395_v20 }
0x19fa   : > { %6793 = vmatpush3.bf16.msra.mxu0 %v6792_v28  ;;  %v5399_v28 = vld [vmem:[%s9110_s6 + $0xc0] sm:$0xff] }
0x19fb   : > { %6794 = vmatprep.subr.bf16.mxu0 %v7211_v3  ;;  %v6822_v32 = vpack.c.bf16 %v5400_v29, %v5399_v28 }
0x19fe   : > { %6796 = vmatpush3.bf16.msra.mxu0 %v6795_v34  ;;  %v5403_v34 = vld [vmem:[%s9110_s6 + $0xe0] sm:$0xff] }
0x19ff   : > { %6797 = vmatprep.subr.bf16.mxu0 %v7211_v3 }
0x1a02   : > { %6799 = vmatpush3.bf16.msra.mxu0 %v6798_v49 }
0x1a03   : > { %6800 = vmatprep.subr.bf16.mxu0 %v7211_v3 }
0x1ac4   : > { %v5735_v61 = vpop.f32.mrb[22].mxu0 }
0x1ac5   : > { %v5736_v2 = vpop.f32.mrb[23].mxu0 }
0x1ac6   : > { %v5737_v58 = vadd.f32 %v5736_v2, %v5735_v61  ;;  %v5389_v61 = vld [vmem:[%s9109_s5 + $0xf0] sm:$0xff]  ;;  %v5390_v2 = vld [vmem:[%s9109_s5 + $0xf8] sm:$0xff] }
0x1ac8   : > { %v2845_v4 = vadd.f32 %v5737_v58, %v2628_v53  ;;  %v5385_v53 = vld [vmem:[%s9109_s5 + $0xd0] sm:$0xff]  ;;  %v6783_v58 = vpack.c.bf16 %v5374_v1, %v5373_v63 }
0x1ac9   : > { %v6801_v55 = vpack.c.bf16 %v5386_v54, %v5385_v53 }
0x1aca   : > { %2848 = vadd.xlane.f32.xlu1 %v2845_v4  ;;  %6784 = vmatpush3.bf16.msra.mxu1 %v6783_v58 }
0x1acb   : > { %6802 = vmatpush3.bf16.msra.mxu0 %v6801_v55  ;;  %6809 = vmatprep.subr.bf16.mxu1 %v7211_v3 }
0x1acc   : > { %6803 = vmatprep.subr.bf16.mxu0 %v7211_v3 }
0x1acf   : > { %6805 = vmatpush3.bf16.msra.mxu0 %v6804_v57 }
0x1ad0   : > { %6806 = vmatprep.subr.bf16.mxu0 %v7211_v3 }
0x1b57   : > { %v2849_v31 = vpop.xlane.xlu1 %2848 }
0x1b58   : > { %v2850_v26 = vmul.f32 0.0078125, %v2849_v31  ;;  %v5404_v31 = vld [vmem:[%s9110_s6 + $0xe8] sm:$0xff] }
0x1b5a   : > { %v2851_v39 = vsub.f32 %v2845_v4, %v2850_v26  ;;  %v6807_v4 = vpack.c.bf16 %v5390_v2, %v5389_v61  ;;  %v6828_v26 = vpack.c.bf16 %v5404_v31, %v5403_v34 }
0x1b5c   : > { %v2852_v23 = vmul.f32 %v2851_v39, %v2851_v39  ;;  %6808 = vmatpush3.bf16.msra.mxu0 %v6807_v4 }
0x1b5d   : > { %6334 = vmatprep.subr.mxu0 %v7213_v11 }
0x1b5e   : > { %2853 = vadd.xlane.f32.xlu1 %v2852_v23  ;;  %v5406_v23 = vld [vmem:[%s9110_s6 + $0xf8] sm:$0xff] }
0x1beb   : > { %v2854_v5 = vpop.xlane.xlu1 %2853 }
0x1bec   : > { %v2855_v6 = vmul.f32 0.0078125, %v2854_v5 }
0x1bee   : > { %v2856_v7 = vadd.f32 1e-05, %v2855_v6 }
0x1bf0   : > { %7074 = vrsqrt.f32 %v2856_v7 }
0x1bfa   : > { %v7075_v10 = vpop.eup %7074 }
0x1bfb   : > { %v8307_v13 = vmul.f32 %v7075_v10, %v2851_v39  ;;  %v5405_v39 = vld [vmem:[%s9110_s6 + $0xf0] sm:$0xff] }
0x1bfc   : > { %v6831_v40 = vpack.c.bf16 %v5406_v23, %v5405_v39 }
0x1bfd   : > { %6262 = vmatmul.mubr.f32.vlgmr.msra.gmra.mrb[28].mxu1 %v8307_v13  ;;  %6297 = vmatmul.mubr.f32.vlgmr.msra.gmra.mrb[24].mxu0 %v8307_v13 }
0x1bfe   : > { %6811 = vmatpush3.bf16.msra.mxu1 %v6810_v12  ;;  %6331 = vmatprep.mubr.msk.f32.mxu1 %vm7212_vm0, %v7213_v11 }
0x1bff   : > { %6812 = vmatprep.subr.bf16.mxu1 %v7211_v3  ;;  %6336 = vmatprep.mubr.msk.f32.mxu0 %vm7212_vm0, %v7213_v11 }
0x1c02   : > { %6814 = vmatpush3.bf16.msra.mxu1 %v6813_v17 }
0x1c03   : > { %6815 = vmatprep.subr.bf16.mxu1 %v7211_v3 }
0x1c06   : > { %6817 = vmatpush3.bf16.msra.mxu1 %v6816_v21 }
0x1c07   : > { %6818 = vmatprep.subr.bf16.mxu1 %v7211_v3 }
0x1c0a   : > { %6820 = vmatpush3.bf16.msra.mxu1 %v6819_v25 }
0x1c0b   : > { %6821 = vmatprep.subr.bf16.mxu1 %v7211_v3 }
0x1c0e   : > { %6823 = vmatpush3.bf16.msra.mxu1 %v6822_v32 }
0x1c0f   : > { %6824 = vmatprep.subr.bf16.mxu1 %v7211_v3 }
0x1c12   : > { %6826 = vmatpush3.bf16.msra.mxu1 %v6825_v37 }
0x1c13   : > { %6827 = vmatprep.subr.bf16.mxu1 %v7211_v3 }
0x1c16   : > { %6829 = vmatpush3.bf16.msra.mxu1 %v6828_v26 }
0x1c17   : > { %6830 = vmatprep.subr.bf16.mxu1 %v7211_v3 }
0x1c1a   : > { %6832 = vmatpush3.bf16.msra.mxu1 %v6831_v40 }
0x1c1b   : > { %6369 = vmatprep.subr.mxu1 %v7213_v11 }
0x1c1d   : > { %6332 = vmatmul.mubr.f32.vlgmr.msra.gmra.mrb[30].mxu1 %v8307_v13 }
0x1c1e   : > { %6371 = vmatprep.mubr.msk.f32.mxu1 %vm7212_vm0, %v7213_v11 }
0x1cd0   : > { %v8368_v42 = vpop.f32.mrb[28].mxu1  ;;  %v8370_v45 = vpop.f32.mrb[24].mxu0 }
0x1cd1   : > { %v6298_v47 = vpop.f32.mrb[25].mxu0  ;;  %6335 = vmatpush3.xpose.msk.msra.mxu0 %vm826_vm2, %v8370_v45  ;;  %3286 = vrot.lane.b32.xlu0 %v8368_v42, %s9162_s17  ;;  %v6263_v48 = vpop.f32.mrb[29].mxu1 }
0x1cd2   : > { %6339 = vmatprep.subr.mxu0 %v7213_v11 }
0x1cd4   : > { %6337 = vmatmul.mubr.msk.f32.vlgmr.msra.gmra.mrb[26].mxu0 %vm826_vm2, %v8368_v42 }
0x1cd5   : > { %6341 = vmatprep.mubr.msk.f32.mxu0 %vm7212_vm0, %v7213_v11 }
0x1cf0   : > { %v8381_v49 = vpop.f32.mrb[30].mxu1 }
0x1cf1   : > { %v6333_v50 = vpop.f32.mrb[31].mxu1  ;;  %6340 = vmatpush3.msra.mxu0 %v8381_v49 }
0x1cf2   : > { %6344 = vmatprep.subr.mxu0 %v7213_v11 }
0x1d43   : > { %v3287_v61 = vpop.permute.xlu0 %3286 }
0x1da7   : > { %v3197_v51 = vpop.f32.mrb[26].mxu0 }
0x1da8   : > { %v3201_v52 = vsel %vm7586_vm6, -1e+09, %v3197_v51  ;;  %v6338_v53 = vpop.f32.mrb[27].mxu0 }
0x1da9   : > { %v3202_v54 = vsel %vm826_vm2, %v3201_v52, -inf }
0x1daa   : > { %3203 = vmax.xlane.f32.xlu1 %v3202_v54 }
0x1e37   : > { %v3204_v46 = vpop.xlane.xlu1 %3203 }
0x1e38   : > { %v3205_v55 = vsub.f32 %v3201_v52, %v3204_v46 }
0x1e3a   : > { %v3206_v56 = vmul.f32 1.442695, %v3205_v55 }
0x1e3c   : > { %7076 = vpow2.f32 %v3206_v56 }
0x1e46   : > { %v7077_v27 = vpop.eup %7076 }
0x1e47   : > { %v3208_v59 = vsel %vm826_vm2, %v7077_v27, 0.0 }
0x1e48   : > { %3209 = vadd.xlane.f32.xlu1 %v3208_v59 }
0x1e59   : > { %3288 = vrot.lane.b32.xlu1 %v8370_v45, %s9162_s17 }
0x1ed5   : > { %v3210_v43 = vpop.xlane.xlu1 %3209 }
0x1ed6   : > { %7078 = vrcp.f32 %v3210_v43 }
0x1ed9   : > { %v3289_v1 = vpop.permute.xlu1 %3288 }
0x1ee0   : > { %v7079_v57 = vpop.eup %7078 }
0x1ee1   : > { %v8391_v63 = vmul.f32 %v7079_v57, %v7077_v27 }
0x1ee3   : > { %6342 = vmatmul.mubr.msk.f32.vlgmr.msra.gmra.mrb[28].mxu0 %vm826_vm2, %v8391_v63 }
0x1ee4   : > { %6345 = vmatpush3.xpose.msk.msra.mxu0 %vm826_vm2, %v3289_v1  ;;  %6346 = vmatprep.mubr.msk.f32.mxu0 %vm7212_vm0, %v7213_v11  ;;  %v5407_v1 = vld [vmem:[%s9111_s7 + $0x20] sm:$0xff] }
0x1ee5   : > { %6349 = vmatprep.subr.mxu0 %v7213_v11 }
0x1ee7   : > { %6347 = vmatmul.mubr.msk.f32.vlgmr.msra.gmra.mrb[30].mxu0 %vm826_vm2, %v3287_v61  ;;  %v5408_v61 = vld [vmem:[%s9111_s7 + $0x28] sm:$0xff] }
0x1ee8   : > { %6351 = vmatprep.mubr.msk.f32.mxu0 %vm7212_vm0, %v7213_v11 }
0x1fb6   : > { %v8402_v2 = vpop.f32.mrb[28].mxu0 }
0x1fb7   : > { %v6343_v58 = vpop.f32.mrb[29].mxu0 }
0x1fb8   : > { %v5409_v58 = vld [vmem:[%s9111_s7 + $0x30] sm:$0xff] }
0x1fba   : > { %v3360_v4 = vpop.f32.mrb[30].mxu0 }
0x1fbb   : > { %v3364_v5 = vsel %vm7586_vm6, -1e+09, %v3360_v4  ;;  %v6348_v6 = vpop.f32.mrb[31].mxu0  ;;  %v6834_v4 = vpack.c.bf16 %v5408_v61, %v5407_v1  ;;  %v5433_v1 = vld [vmem:[%s9112_s8 + $0xc8] sm:$0xff]  ;;  %v5450_v61 = vld [vmem:[%s9113_s9 + $0xd0] sm:$0xff] }
0x1fbc   : > { %v3365_v7 = vsel %vm826_vm2, %v3364_v5, -inf }
0x1fbd   : > { %3366 = vmax.xlane.f32.xlu1 %v3365_v7 }
0x1fce   : > { %3377 = vrot.lane.b32.xlu1 %v8381_v49, %s9162_s17 }
0x1fd2   : > { %3453 = vrot.lane.b32.xlu1 %v8368_v42, %s9163_s25 }
0x204a   : > { %v3367_v8 = vpop.xlane.xlu1 %3366 }
0x204b   : > { %v3368_v9 = vsub.f32 %v3364_v5, %v3367_v8  ;;  %v5410_v5 = vld [vmem:[%s9111_s7 + $0x38] sm:$0xff] }
0x204c   : > { %v6837_v6 = vpack.c.bf16 %v5410_v5, %v5409_v58 }
0x204d   : > { %v3369_v10 = vmul.f32 1.442695, %v3368_v9 }
0x204e   : > { %v3378_v12 = vpop.permute.xlu1 %3377 }
0x204f   : > { %7080 = vpow2.f32 %v3369_v10  ;;  %6350 = vmatpush3.msra.mxu0 %v3378_v12 }
0x2050   : > { %6354 = vmatprep.subr.mxu0 %v7213_v11 }
0x2052   : > { %v3454_v22 = vpop.permute.xlu1 %3453 }
0x2059   : > { %v7081_v14 = vpop.eup %7080 }
0x205a   : > { %v3371_v15 = vsel %vm826_vm2, %v7081_v14, 0.0 }
0x205b   : > { %3372 = vadd.xlane.f32.xlu0 %v3371_v15 }
0x2071   : > { %3455 = vrot.lane.b32.xlu0 %v8370_v45, %s9163_s25 }
0x20e8   : > { %v3373_v17 = vpop.xlane.xlu0 %3372 }
0x20e9   : > { %7082 = vrcp.f32 %v3373_v17 }
0x20ec   : > { %v3456_v21 = vpop.permute.xlu0 %3455 }
0x20f3   : > { %v7083_v20 = vpop.eup %7082 }
0x20f4   : > { %v8415_v60 = vmul.f32 %v7083_v20, %v7081_v14 }
0x20f6   : > { %6352 = vmatmul.mubr.msk.f32.vlgmr.msra.gmra.mrb[32].mxu0 %vm826_vm2, %v8415_v60 }
0x20f7   : > { %6355 = vmatpush3.xpose.msk.msra.mxu0 %vm826_vm2, %v3456_v21  ;;  %6356 = vmatprep.mubr.msk.f32.mxu0 %vm7212_vm0, %v7213_v11 }
0x20f8   : > { %6359 = vmatprep.subr.mxu0 %v7213_v11 }
0x20fa   : > { %6357 = vmatmul.mubr.msk.f32.vlgmr.msra.gmra.mrb[34].mxu0 %vm826_vm2, %v3454_v22 }
0x20fb   : > { %6361 = vmatprep.mubr.msk.f32.mxu0 %vm7212_vm0, %v7213_v11 }
0x21c9   : > { %v3449_v24 = vpop.f32.mrb[32].mxu0 }
0x21ca   : > { %v6353_v25 = vpop.f32.mrb[33].mxu0 }
0x21cb   : > { %v5424_v25 = vld [vmem:[%s9112_s8 + $0x80] sm:$0xff] }
0x21cd   : > { %v3527_v28 = vpop.f32.mrb[34].mxu0 }
0x21ce   : > { %v3531_v29 = vsel %vm7586_vm6, -1e+09, %v3527_v28  ;;  %v6358_v32 = vpop.f32.mrb[35].mxu0 }
0x21cf   : > { %v3532_v33 = vsel %vm826_vm2, %v3531_v29, -inf  ;;  %v5443_v32 = vld [vmem:[%s9113_s9 + $0x98] sm:$0xff] }
0x21d0   : > { %3533 = vmax.xlane.f32.xlu1 %v3532_v33 }
0x21e1   : > { %3543 = vrot.lane.b32.xlu1 %v8381_v49, %s9163_s25 }
0x21e5   : > { %3619 = vrot.lane.b32.xlu1 %v8368_v42, %s9164_s26 }
0x225d   : > { %v3534_v35 = vpop.xlane.xlu1 %3533 }
0x225e   : > { %v3535_v37 = vsub.f32 %v3531_v29, %v3534_v35  ;;  %v5425_v29 = vld [vmem:[%s9112_s8 + $0x88] sm:$0xff]  ;;  %v5426_v35 = vld [vmem:[%s9112_s8 + $0x90] sm:$0xff] }
0x225f   : > { %v6840_v33 = vpack.c.bf16 %v5425_v29, %v5424_v25 }
0x2260   : > { %v3536_v34 = vmul.f32 1.442695, %v3535_v37  ;;  %v5427_v37 = vld [vmem:[%s9112_s8 + $0x98] sm:$0xff] }
0x2261   : > { %v3544_v31 = vpop.permute.xlu1 %3543 }
0x2262   : > { %7084 = vpow2.f32 %v3536_v34  ;;  %6360 = vmatpush3.msra.mxu0 %v3544_v31  ;;  %v6843_v31 = vpack.c.bf16 %v5427_v37, %v5426_v35 }
0x2263   : > { %6364 = vmatprep.subr.mxu0 %v7213_v11 }
0x2265   : > { %v3620_v48 = vpop.permute.xlu1 %3619 }
0x226c   : > { %v7085_v26 = vpop.eup %7084 }
0x226d   : > { %v3538_v39 = vsel %vm826_vm2, %v7085_v26, 0.0 }
0x226e   : > { %3539 = vadd.xlane.f32.xlu0 %v3538_v39  ;;  %v5445_v39 = vld [vmem:[%s9113_s9 + $0xa8] sm:$0xff] }
0x2284   : > { %3621 = vrot.lane.b32.xlu0 %v8370_v45, %s9164_s26 }
0x22fb   : > { %v3540_v23 = vpop.xlane.xlu0 %3539 }
0x22fc   : > { %7086 = vrcp.f32 %v3540_v23  ;;  %v5428_v23 = vld [vmem:[%s9112_s8 + $0xa0] sm:$0xff] }
0x22ff   : > { %v3622_v42 = vpop.permute.xlu0 %3621 }
0x2306   : > { %v7087_v40 = vpop.eup %7086 }
0x2307   : > { %v8437_v47 = vmul.f32 %v7087_v40, %v7085_v26  ;;  %v5444_v26 = vld [vmem:[%s9113_s9 + $0xa0] sm:$0xff]  ;;  %v5429_v40 = vld [vmem:[%s9112_s8 + $0xa8] sm:$0xff] }
0x2309   : > { %6362 = vmatmul.mubr.msk.f32.vlgmr.msra.gmra.mrb[36].mxu0 %vm826_vm2, %v8437_v47 }
0x230a   : > { %6365 = vmatpush3.xpose.msk.msra.mxu0 %vm826_vm2, %v3622_v42  ;;  %6366 = vmatprep.mubr.msk.f32.mxu0 %vm7212_vm0, %v7213_v11  ;;  %v6870_v42 = vpack.c.bf16 %v5445_v39, %v5444_v26  ;;  %v5456_v39 = vld [vmem:[%s9114_s10 + $0x80] sm:$0xff] }
0x230b   : > { %6833 = vmatprep.subr.bf16.mxu0 %v7211_v3 }
0x230d   : > { %6367 = vmatmul.mubr.msk.f32.vlgmr.msra.gmra.mrb[38].mxu0 %vm826_vm2, %v3620_v48  ;;  %v6846_v48 = vpack.c.bf16 %v5429_v40, %v5428_v23  ;;  %v5457_v23 = vld [vmem:[%s9114_s10 + $0x88] sm:$0xff]  ;;  %v5458_v40 = vld [vmem:[%s9114_s10 + $0x90] sm:$0xff] }
0x230e   : > { %6382 = vmatprep.mubr.msk.f32.mxu0 %vm7212_vm0, %v7213_v11  ;;  %6835 = vmatpush3.bf16.msra.mxu0 %v6834_v4  ;;  %v5451_v4 = vld [vmem:[%s9113_s9 + $0xd8] sm:$0xff] }
0x230f   : > { %6836 = vmatprep.subr.bf16.mxu0 %v7211_v3  ;;  %v6879_v5 = vpack.c.bf16 %v5451_v4, %v5450_v61  ;;  %v5471_v4 = vld [vmem:[%s9114_s10 + $0xf8] sm:$0xff] }
0x2312   : > { %6838 = vmatpush3.bf16.msra.mxu0 %v6837_v6  ;;  %v5434_v6 = vld [vmem:[%s9112_s8 + $0xd0] sm:$0xff] }
0x2313   : > { %6863 = vmatprep.subr.bf16.mxu0 %v7211_v3 }
0x23dc   : > { %v3615_v45 = vpop.f32.mrb[36].mxu0 }
0x23dd   : > { %v6363_v50 = vpop.f32.mrb[37].mxu0 }
0x23de   : > { %v5447_v50 = vld [vmem:[%s9113_s9 + $0xb8] sm:$0xff] }
0x23e0   : > { %v3693_v51 = vpop.f32.mrb[38].mxu0 }
0x23e1   : > { %v3697_v52 = vsel %vm7586_vm6, -1e+09, %v3693_v51  ;;  %v6368_v53 = vpop.f32.mrb[39].mxu0  ;;  %v5430_v51 = vld [vmem:[%s9112_s8 + $0xb0] sm:$0xff] }
0x23e2   : > { %v3698_v54 = vsel %vm826_vm2, %v3697_v52, -inf }
0x23e3   : > { %3699 = vmax.xlane.f32.xlu1 %v3698_v54 }
0x23f4   : > { %3709 = vrot.lane.b32.xlu1 %v8381_v49, %s9164_s26 }
0x23f8   : > { %3790 = vrot.lane.b32.xlu1 %v3615_v45, %s9166_s29  ;;  %v5446_v45 = vld [vmem:[%s9113_s9 + $0xb0] sm:$0xff] }
0x23f9   : > { %v6873_v53 = vpack.c.bf16 %v5447_v50, %v5446_v45  ;;  %v5460_v50 = vld [vmem:[%s9114_s10 + $0xa0] sm:$0xff] }
0x2470   : > { %v3700_v46 = vpop.xlane.xlu1 %3699 }
0x2471   : > { %v3701_v55 = vsub.f32 %v3697_v52, %v3700_v46  ;;  %v5431_v52 = vld [vmem:[%s9112_s8 + $0xb8] sm:$0xff]  ;;  %v5448_v46 = vld [vmem:[%s9113_s9 + $0xc0] sm:$0xff] }
0x2472   : > { %v6849_v54 = vpack.c.bf16 %v5431_v52, %v5430_v51  ;;  %v5461_v51 = vld [vmem:[%s9114_s10 + $0xa8] sm:$0xff] }
0x2473   : > { %v3702_v56 = vmul.f32 1.442695, %v3701_v55  ;;  %v5449_v55 = vld [vmem:[%s9113_s9 + $0xc8] sm:$0xff]  ;;  %v6894_v52 = vpack.c.bf16 %v5461_v51, %v5460_v50 }
0x2474   : > { %v3710_v27 = vpop.permute.xlu1 %3709 }
0x2475   : > { %7088 = vpow2.f32 %v3702_v56  ;;  %6370 = vmatpush3.msra.mxu1 %v3710_v27  ;;  %v6876_v56 = vpack.c.bf16 %v5449_v55, %v5448_v46  ;;  %v5464_v55 = vld [vmem:[%s9114_s10 + $0xc0] sm:$0xff] }
0x2476   : > { %6839 = vmatprep.subr.bf16.mxu1 %v7211_v3 }
0x2478   : > { %v3791_v10 = vpop.permute.xlu1 %3790 }
0x247f   : > { %v7089_v59 = vpop.eup %7088 }
0x2480   : > { %v3704_v30 = vsel %vm826_vm2, %v7089_v59, 0.0 }
0x2481   : > { %3705 = vadd.xlane.f32.xlu0 %v3704_v30 }
0x2497   : > { %3786 = vrot.lane.b32.xlu0 %v3449_v24, %s9165_s27  ;;  %v5440_v24 = vld [vmem:[%s9113_s9 + $0x80] sm:$0xff] }
0x250e   : > { %v3706_v43 = vpop.xlane.xlu0 %3705 }
0x250f   : > { %7090 = vrcp.f32 %v3706_v43 }
0x2512   : > { %v3787_v9 = vpop.permute.xlu0 %3786 }
0x2513   : > { %v3797_v12 = vsel %vm826_vm2, %v8402_v2, %v3787_v9  ;;  %v5441_v2 = vld [vmem:[%s9113_s9 + $0x88] sm:$0xff] }
0x2514   : > { %v3798_v14 = vsel %vm1500_vm7, %v3797_v12, %v3791_v10  ;;  %v6864_v28 = vpack.c.bf16 %v5441_v2, %v5440_v24  ;;  %v5453_v10 = vld [vmem:[%s9113_s9 + $0xe8] sm:$0xff]  ;;  %v5436_v12 = vld [vmem:[%s9112_s8 + $0xe0] sm:$0xff]  ;;  %v5438_v24 = vld [vmem:[%s9112_s8 + $0xf0] sm:$0xff] }
0x2515   : > { %v5439_v2 = vld [vmem:[%s9112_s8 + $0xf8] sm:$0xff] }
0x2516   : > { %v6861_v25 = vpack.c.bf16 %v5439_v2, %v5438_v24 }
0x2519   : > { %v7091_v57 = vpop.eup %7090 }
0x251a   : > { %v8457_v49 = vmul.f32 %v7091_v57, %v7089_v59  ;;  %v5432_v57 = vld [vmem:[%s9112_s8 + $0xc0] sm:$0xff] }
0x251b   : > { %v6852_v58 = vpack.c.bf16 %v5433_v1, %v5432_v57  ;;  %v5468_v57 = vld [vmem:[%s9114_s10 + $0xe0] sm:$0xff]  ;;  %v5469_v1 = vld [vmem:[%s9114_s10 + $0xe8] sm:$0xff] }
0x251c   : > { %6372 = vmatmul.mubr.msk.f32.vlgmr.msra.gmra.mrb[32].mxu1 %vm826_vm2, %v8457_v49  ;;  %v6906_v61 = vpack.c.bf16 %v5469_v1, %v5468_v57 }
0x251d   : > { %6417 = vmatprep.mubr.msk.f32.mxu1 %vm7212_vm0, %v7213_v11  ;;  %6841 = vmatpush3.bf16.msra.mxu1 %v6840_v33 }
0x251e   : > { %6842 = vmatprep.subr.bf16.mxu1 %v7211_v3 }
0x2521   : > { %6844 = vmatpush3.bf16.msra.mxu1 %v6843_v31 }
0x2522   : > { %6845 = vmatprep.subr.bf16.mxu1 %v7211_v3 }
0x2525   : > { %6847 = vmatpush3.bf16.msra.mxu1 %v6846_v48  ;;  %v5459_v48 = vld [vmem:[%s9114_s10 + $0x98] sm:$0xff] }
0x2526   : > { %6848 = vmatprep.subr.bf16.mxu1 %v7211_v3  ;;  %v6891_v45 = vpack.c.bf16 %v5459_v48, %v5458_v40 }
0x2529   : > { %6850 = vmatpush3.bf16.msra.mxu1 %v6849_v54  ;;  %v5463_v54 = vld [vmem:[%s9114_s10 + $0xb8] sm:$0xff] }
0x252a   : > { %6851 = vmatprep.subr.bf16.mxu1 %v7211_v3 }
0x252d   : > { %6853 = vmatpush3.bf16.msra.mxu1 %v6852_v58  ;;  %v5470_v58 = vld [vmem:[%s9114_s10 + $0xf0] sm:$0xff] }
0x252e   : > { %6854 = vmatprep.subr.bf16.mxu1 %v7211_v3 }
0x25ef   : > { %v3781_v7 = vpop.f32.mrb[32].mxu1 }
0x25f0   : > { %3794 = vrot.lane.b32.xlu1 %v3781_v7, %s9167_s16  ;;  %v6373_v8 = vpop.f32.mrb[33].mxu1  ;;  %v5435_v7 = vld [vmem:[%s9112_s8 + $0xd8] sm:$0xff] }
0x25f1   : > { %v5452_v8 = vld [vmem:[%s9113_s9 + $0xe0] sm:$0xff]  ;;  %v6855_v9 = vpack.c.bf16 %v5435_v7, %v5434_v6 }
0x25f3   : > { %6856 = vmatpush3.bf16.msra.mxu1 %v6855_v9 }
0x25f4   : > { %6857 = vmatprep.subr.bf16.mxu1 %v7211_v3 }
0x2662   : > { %v3795_v15 = vpop.permute.xlu1 %3794 }
0x2663   : > { %v3799_v17 = vsel %vm1502_vm8, %v3798_v14, %v3795_v15  ;;  %v5437_v14 = vld [vmem:[%s9112_s8 + $0xe8] sm:$0xff]  ;;  %v6882_v15 = vpack.c.bf16 %v5453_v10, %v5452_v8 }
0x2664   : > { %6383 = vmatmul.mubr.msk.f32.vlgmr.msra.gmra.mrb[40].mxu0 %vm1504_vm9, %v3799_v17  ;;  %v5454_v17 = vld [vmem:[%s9113_s9 + $0xf0] sm:$0xff] }
0x2665   : > { %6452 = vmatprep.mubr.msk.f32.mxu0 %vm7212_vm0, %v7213_v11  ;;  %6865 = vmatpush3.bf16.msra.mxu0 %v6864_v28  ;;  %v7114_v28 = vld [vmem:[%s7807_s23] sm:$0xff] }
0x2666   : > { %6866 = vmatprep.subr.bf16.mxu0 %v7211_v3 }
0x2737   : > { %v3869_v20 = vpop.f32.mrb[40].mxu0 }
0x2738   : > { %v3870_v21 = vadd.f32 %v3869_v20, %v8307_v13  ;;  %v6384_v22 = vpop.f32.mrb[41].mxu0  ;;  %v5442_v13 = vld [vmem:[%s9113_s9 + $0x90] sm:$0xff]  ;;  %v5455_v20 = vld [vmem:[%s9113_s9 + $0xf8] sm:$0xff] }
0x2739   : > { %v6867_v34 = vpack.c.bf16 %v5443_v32, %v5442_v13  ;;  %v6885_v22 = vpack.c.bf16 %v5455_v20, %v5454_v17 }
0x273a   : > { %3873 = vadd.xlane.f32.xlu1 %v3870_v21 }
0x273b   : > { %6868 = vmatpush3.bf16.msra.mxu0 %v6867_v34 }
0x273c   : > { %6869 = vmatprep.subr.bf16.mxu0 %v7211_v3 }
0x273f   : > { %6871 = vmatpush3.bf16.msra.mxu0 %v6870_v42  ;;  %v6888_v42 = vpack.c.bf16 %v5457_v23, %v5456_v39 }
0x2740   : > { %6872 = vmatprep.subr.bf16.mxu0 %v7211_v3 }
0x2743   : > { %6874 = vmatpush3.bf16.msra.mxu0 %v6873_v53  ;;  %v5462_v53 = vld [vmem:[%s9114_s10 + $0xb0] sm:$0xff] }
0x2744   : > { %6875 = vmatprep.subr.bf16.mxu0 %v7211_v3  ;;  %v6897_v46 = vpack.c.bf16 %v5463_v54, %v5462_v53 }
0x2747   : > { %6877 = vmatpush3.bf16.msra.mxu0 %v6876_v56  ;;  %v5465_v56 = vld [vmem:[%s9114_s10 + $0xc8] sm:$0xff] }
0x2748   : > { %6878 = vmatprep.subr.bf16.mxu0 %v7211_v3 }
0x274b   : > { %6880 = vmatpush3.bf16.msra.mxu0 %v6879_v5  ;;  %v6909_v5 = vpack.c.bf16 %v5471_v4, %v5470_v58 }
0x274c   : > { %6881 = vmatprep.subr.bf16.mxu0 %v7211_v3 }
0x274f   : > { %6883 = vmatpush3.bf16.msra.mxu0 %v6882_v15 }
0x2750   : > { %6884 = vmatprep.subr.bf16.mxu0 %v7211_v3 }
0x2753   : > { %6886 = vmatpush3.bf16.msra.mxu0 %v6885_v22 }
0x2754   : > { %6490 = vmatprep.subr.mxu0 %v7213_v11 }
0x2756   : > { %6453 = vmatmul.mubr.f32.vlgmr.msra.gmra.mrb[42].mxu0 %v7114_v28 }
0x2757   : > { %6492 = vmatprep.mubr.msk.f32.mxu0 %vm7212_vm0, %v7213_v11 }
0x27c7   : > { %v3874_v27 = vpop.xlane.xlu1 %3873 }
0x27c8   : > { %v3875_v59 = vmul.f32 0.0078125, %v3874_v27  ;;  %v6900_v27 = vpack.c.bf16 %v5465_v56, %v5464_v55 }
0x27ca   : > { %v3876_v30 = vsub.f32 %v3870_v21, %v3875_v59  ;;  %v6858_v21 = vpack.c.bf16 %v5437_v14, %v5436_v12  ;;  %v5466_v59 = vld [vmem:[%s9114_s10 + $0xd0] sm:$0xff] }
0x27cc   : > { %v3877_v43 = vmul.f32 %v3876_v30, %v3876_v30  ;;  %6859 = vmatpush3.bf16.msra.mxu1 %v6858_v21 }
0x27cd   : > { %6860 = vmatprep.subr.bf16.mxu1 %v7211_v3 }
0x27ce   : > { %3878 = vadd.xlane.f32.xlu0 %v3877_v43 }
0x27d0   : > { %6862 = vmatpush3.bf16.msra.mxu1 %v6861_v25 }
0x27d1   : > { %6887 = vmatprep.subr.bf16.mxu1 %v7211_v3 }
0x2829   : > { %v8606_v37 = vpop.f32.mrb[42].mxu0 }
0x282a   : > { %v6454_v34 = vpop.f32.mrb[43].mxu0  ;;  %6491 = vmatpush3.xpose.msk.msra.mxu0 %vm826_vm2, %v8606_v37 }
0x282b   : > { %6495 = vmatprep.subr.mxu0 %v7213_v11 }
0x285b   : > { %v3879_v29 = vpop.xlane.xlu0 %3878 }
0x285c   : > { %v3880_v13 = vmul.f32 0.0078125, %v3879_v29 }
0x285e   : > { %v3881_v32 = vadd.f32 1e-05, %v3880_v13 }
0x2860   : > { %7092 = vrsqrt.f32 %v3881_v32 }
0x286a   : > { %v7093_v33 = vpop.eup %7092 }
0x286b   : > { %v8601_v35 = vmul.f32 %v7093_v33, %v3876_v30  ;;  %v5467_v30 = vld [vmem:[%s9114_s10 + $0xd8] sm:$0xff] }
0x286c   : > { %v6903_v43 = vpack.c.bf16 %v5467_v30, %v5466_v59 }
0x286d   : > { %6418 = vmatmul.mubr.f32.vlgmr.msra.gmra.mrb[34].mxu1 %v8601_v35 }
0x286e   : > { %6487 = vmatprep.mubr.msk.f32.mxu1 %vm7212_vm0, %v7213_v11  ;;  %6889 = vmatpush3.bf16.msra.mxu1 %v6888_v42 }
0x286f   : > { %6890 = vmatprep.subr.bf16.mxu1 %v7211_v3 }
0x2872   : > { %6892 = vmatpush3.bf16.msra.mxu1 %v6891_v45 }
0x2873   : > { %6893 = vmatprep.subr.bf16.mxu1 %v7211_v3 }
0x2876   : > { %6895 = vmatpush3.bf16.msra.mxu1 %v6894_v52 }
0x2877   : > { %6896 = vmatprep.subr.bf16.mxu1 %v7211_v3 }
0x287a   : > { %6898 = vmatpush3.bf16.msra.mxu1 %v6897_v46 }
0x287b   : > { %6899 = vmatprep.subr.bf16.mxu1 %v7211_v3 }
0x287e   : > { %6901 = vmatpush3.bf16.msra.mxu1 %v6900_v27 }
0x287f   : > { %6902 = vmatprep.subr.bf16.mxu1 %v7211_v3 }
0x2882   : > { %6904 = vmatpush3.bf16.msra.mxu1 %v6903_v43 }
0x2883   : > { %6905 = vmatprep.subr.bf16.mxu1 %v7211_v3 }
0x2886   : > { %6907 = vmatpush3.bf16.msra.mxu1 %v6906_v61 }
0x2887   : > { %6908 = vmatprep.subr.bf16.mxu1 %v7211_v3 }
0x288a   : > { %6910 = vmatpush3.bf16.msra.mxu1 %v6909_v5 }
0x288b   : > { %6525 = vmatprep.subr.mxu1 %v7213_v11 }
0x288d   : > { %6488 = vmatmul.mubr.f32.vlgmr.msra.gmra.mrb[36].mxu1 %v7114_v28 }
0x288e   : > { %6527 = vmatprep.mubr.msk.f32.mxu1 %vm7212_vm0, %v7213_v11 }
0x2940   : > { %v8611_v31 = vpop.f32.mrb[34].mxu1 }
0x2941   : > { %v6419_v26 = vpop.f32.mrb[35].mxu1  ;;  %6493 = vmatmul.mubr.msk.f32.vlgmr.msra.gmra.mrb[44].mxu0 %vm826_vm2, %v8611_v31 }
0x2942   : > { %6497 = vmatprep.mubr.msk.f32.mxu0 %vm7212_vm0, %v7213_v11 }
0x2960   : > { %v8683_v20 = vpop.f32.mrb[36].mxu1 }
0x2961   : > { %v6489_v21 = vpop.f32.mrb[37].mxu1  ;;  %6496 = vmatpush3.msra.mxu0 %v8683_v20 }
0x2962   : > { %6500 = vmatprep.subr.mxu0 %v7213_v11 }
0x2a14   : > { %v4234_v6 = vpop.f32.mrb[44].mxu0 }
0x2a15   : > { %v4238_v7 = vsel %vm1945_vm10, -1e+09, %v4234_v6  ;;  %v6494_v8 = vpop.f32.mrb[45].mxu0 }
0x2a16   : > { %v4239_v9 = vsel %vm826_vm2, %v4238_v7, -inf }
0x2a17   : > { %4240 = vmax.xlane.f32.xlu0 %v4239_v9 }
0x2a2d   : > { %4325 = vrot.lane.b32.xlu0 %v8606_v37, %s9162_s17 }
0x2aa4   : > { %v4241_v10 = vpop.xlane.xlu0 %4240 }
0x2aa5   : > { %v4242_v12 = vsub.f32 %v4238_v7, %v4241_v10 }
0x2aa7   : > { %v4243_v14 = vmul.f32 1.442695, %v4242_v12 }
0x2aa8   : > { %v4326_v25 = vpop.permute.xlu0 %4325 }
0x2aa9   : > { %7094 = vpow2.f32 %v4243_v14 }
0x2ab3   : > { %v7095_v15 = vpop.eup %7094 }
0x2ab4   : > { %v4245_v17 = vsel %vm826_vm2, %v7095_v15, 0.0 }
0x2ab5   : > { %4246 = vadd.xlane.f32.xlu1 %v4245_v17 }
0x2ac6   : > { %4323 = vrot.lane.b32.xlu1 %v8611_v31, %s9162_s17 }
0x2b42   : > { %v4247_v22 = vpop.xlane.xlu1 %4246 }
0x2b43   : > { %7096 = vrcp.f32 %v4247_v22 }
0x2b46   : > { %v4324_v28 = vpop.permute.xlu1 %4323 }
0x2b4d   : > { %v7097_v24 = vpop.eup %7096 }
0x2b4e   : > { %v8687_v2 = vmul.f32 %v7097_v24, %v7095_v15 }
0x2b50   : > { %6498 = vmatmul.mubr.msk.f32.vlgmr.msra.gmra.mrb[46].mxu0 %vm826_vm2, %v8687_v2 }
0x2b51   : > { %6501 = vmatpush3.xpose.msk.msra.mxu0 %vm826_vm2, %v4326_v25  ;;  %6502 = vmatprep.mubr.msk.f32.mxu0 %vm7212_vm0, %v7213_v11 }
0x2b52   : > { %6505 = vmatprep.subr.mxu0 %v7213_v11 }
0x2b54   : > { %6503 = vmatmul.mubr.msk.f32.vlgmr.msra.gmra.mrb[48].mxu0 %vm826_vm2, %v4324_v28 }
0x2b55   : > { %6507 = vmatprep.mubr.msk.f32.mxu0 %vm7212_vm0, %v7213_v11 }
0x2c23   : > { %v8698_v29 = vpop.f32.mrb[46].mxu0 }
0x2c24   : > { %v6499_v13 = vpop.f32.mrb[47].mxu0 }
0x2c27   : > { %v4397_v32 = vpop.f32.mrb[48].mxu0 }
0x2c28   : > { %v4401_v33 = vsel %vm1945_vm10, -1e+09, %v4397_v32  ;;  %v6504_v34 = vpop.f32.mrb[49].mxu0 }
0x2c29   : > { %v4402_v26 = vsel %vm826_vm2, %v4401_v33, -inf  ;;  %v5473_v34 = vld [vmem:[%s9115_s11 + $0x28] sm:$0xff] }
0x2c2a   : > { %4403 = vmax.xlane.f32.xlu1 %v4402_v26 }
0x2c3b   : > { %4492 = vrot.lane.b32.xlu1 %v8606_v37, %s9163_s25 }
0x2c3f   : > { %4490 = vrot.lane.b32.xlu1 %v8611_v31, %s9163_s25 }
0x2cb7   : > { %v4404_v39 = vpop.xlane.xlu1 %4403 }
0x2cb8   : > { %v4405_v23 = vsub.f32 %v4401_v33, %v4404_v39  ;;  %v5472_v33 = vld [vmem:[%s9115_s11 + $0x20] sm:$0xff]  ;;  %v5475_v39 = vld [vmem:[%s9115_s11 + $0x38] sm:$0xff] }
0x2cb9   : > { %v6912_v26 = vpack.c.bf16 %v5473_v34, %v5472_v33  ;;  %v5511_v33 = vld [vmem:[%s9116_s12 + $0x1b0] sm:$0xff]  ;;  %v5514_v34 = vld [vmem:[%s9116_s12 + $0x1c8] sm:$0xff] }
0x2cba   : > { %v4406_v40 = vmul.f32 1.442695, %v4405_v23 }
0x2cbb   : > { %v4493_v52 = vpop.permute.xlu1 %4492 }
0x2cbc   : > { %7098 = vpow2.f32 %v4406_v40 }
0x2cbf   : > { %v4491_v54 = vpop.permute.xlu1 %4490 }
0x2cc6   : > { %v7099_v42 = vpop.eup %7098 }
0x2cc7   : > { %v4408_v48 = vsel %vm826_vm2, %v7099_v42, 0.0 }
0x2cc8   : > { %4409 = vadd.xlane.f32.xlu0 %v4408_v48 }
0x2cde   : > { %4414 = vrot.lane.b32.xlu0 %v8683_v20, %s9162_s17 }
0x2d55   : > { %v4410_v45 = vpop.xlane.xlu0 %4409 }
0x2d56   : > { %7100 = vrcp.f32 %v4410_v45 }
0x2d59   : > { %v4415_v50 = vpop.permute.xlu0 %4414 }
0x2d5a   : > { %6506 = vmatpush3.msra.mxu0 %v4415_v50 }
0x2d5b   : > { %6510 = vmatprep.subr.mxu0 %v7213_v11 }
0x2d60   : > { %v7101_v51 = vpop.eup %7100 }
0x2d61   : > { %v8711_v53 = vmul.f32 %v7101_v51, %v7099_v42 }
0x2d63   : > { %6508 = vmatmul.mubr.msk.f32.vlgmr.msra.gmra.mrb[50].mxu0 %vm826_vm2, %v8711_v53 }
0x2d64   : > { %6511 = vmatpush3.xpose.msk.msra.mxu0 %vm826_vm2, %v4493_v52  ;;  %6512 = vmatprep.mubr.msk.f32.mxu0 %vm7212_vm0, %v7213_v11 }
0x2d65   : > { %6515 = vmatprep.subr.mxu0 %v7213_v11 }
0x2d67   : > { %6513 = vmatmul.mubr.msk.f32.vlgmr.msra.gmra.mrb[52].mxu0 %vm826_vm2, %v4491_v54 }
0x2d68   : > { %6517 = vmatprep.mubr.msk.f32.mxu0 %vm7212_vm0, %v7213_v11 }
0x2e36   : > { %v4486_v46 = vpop.f32.mrb[50].mxu0 }
0x2e37   : > { %v6509_v55 = vpop.f32.mrb[51].mxu0 }
0x2e3a   : > { %v4564_v56 = vpop.f32.mrb[52].mxu0 }
0x2e3b   : > { %v4568_v27 = vsel %vm1945_vm10, -1e+09, %v4564_v56  ;;  %v6514_v59 = vpop.f32.mrb[53].mxu0  ;;  %v5493_v56 = vld [vmem:[%s9116_s12 + $0x120] sm:$0xff] }
0x2e3c   : > { %v4569_v30 = vsel %vm826_vm2, %v4568_v27, -inf  ;;  %v5498_v59 = vld [vmem:[%s9116_s12 + $0x148] sm:$0xff] }
0x2e3d   : > { %4570 = vmax.xlane.f32.xlu0 %v4569_v30  ;;  %v5500_v30 = vld [vmem:[%s9116_s12 + $0x158] sm:$0xff] }
0x2e53   : > { %4580 = vrot.lane.b32.xlu0 %v8683_v20, %s9163_s25  ;;  %s9011_s25 = sand.u32 1, %s7201_s19  }
0x2e54   : > { %s5329_s18 = sshll.u32 %s9011_s25, 3  ;;  %s5178_s2 = scalar_lea.sflag [#allocation5], %s9011_s25 }
0x2e55   : > { %s531_s21 = scalar_lea.vmem [#allocation4], %s5329_s18 }
0x2e57   : > { %4656 = vrot.lane.b32.xlu0 %v8611_v31, %s9164_s26 }
0x2eca   : > { %v4571_v43 = vpop.xlane.xlu0 %4570 }
0x2ecb   : > { %v4572_v57 = vsub.f32 %v4568_v27, %v4571_v43  ;;  %v5495_v27 = vld [vmem:[%s9116_s12 + $0x130] sm:$0xff] }
0x2ecc   : > { %v6923_v43 = vpack.c.bf16 %v5495_v27, %v5493_v56  ;;  %v5542_v56 = vld [vmem:[%s9117_s13 + $0x1a8] sm:$0xff] }
0x2ecd   : > { %v4573_v1 = vmul.f32 1.442695, %v4572_v57  ;;  %v6925_v57 = vpack.c.bf16 %v5500_v30, %v5498_v59  ;;  %v5525_v30 = vld [vmem:[%s9117_s13 + $0x120] sm:$0xff] }
0x2ece   : > { %v4581_v61 = vpop.permute.xlu0 %4580 }
0x2ecf   : > { %7102 = vpow2.f32 %v4573_v1  ;;  %6516 = vmatpush3.msra.mxu0 %v4581_v61  ;;  %v5497_v1 = vld [vmem:[%s9116_s12 + $0x140] sm:$0xff]  ;;  %v5499_v61 = vld [vmem:[%s9116_s12 + $0x150] sm:$0xff] }
0x2ed0   : > { %6520 = vmatprep.subr.mxu0 %v7213_v11 }
0x2ed2   : > { %v4657_v8 = vpop.permute.xlu0 %4656 }
0x2ed9   : > { %v7103_v58 = vpop.eup %7102 }
0x2eda   : > { %v4575_v4 = vsel %vm826_vm2, %v7103_v58, 0.0 }
0x2edb   : > { %4576 = vadd.xlane.f32.xlu1 %v4575_v4  ;;  %v5504_v4 = vld [vmem:[%s9116_s12 + $0x178] sm:$0xff] }
0x2eec   : > { %4658 = vrot.lane.b32.xlu1 %v8606_v37, %s9164_s26 }
0x2f68   : > { %v4577_v5 = vpop.xlane.xlu1 %4576 }
0x2f69   : > { %7104 = vrcp.f32 %v4577_v5  ;;  %v6927_v5 = vpack.c.bf16 %v5499_v61, %v5497_v1  ;;  %v5544_v1 = vld [vmem:[%s9117_s13 + $0x1b8] sm:$0xff] }
0x2f6c   : > { %v4659_v31 = vpop.permute.xlu1 %4658 }
0x2f73   : > { %v7105_v6 = vpop.eup %7104 }
0x2f74   : > { %v8733_v7 = vmul.f32 %v7105_v6, %v7103_v58  ;;  %v5502_v58 = vld [vmem:[%s9116_s12 + $0x168] sm:$0xff] }
0x2f75   : > { %v6929_v6 = vpack.c.bf16 %v5504_v4, %v5502_v58  ;;  %v5527_v4 = vld [vmem:[%s9117_s13 + $0x130] sm:$0xff] }
0x2f76   : > { %6518 = vmatmul.mubr.msk.f32.vlgmr.msra.gmra.mrb[54].mxu0 %vm826_vm2, %v8733_v7 }
0x2f77   : > { %6521 = vmatpush3.xpose.msk.msra.mxu0 %vm826_vm2, %v4659_v31  ;;  %6522 = vmatprep.mubr.msk.f32.mxu0 %vm7212_vm0, %v7213_v11  ;;  %v5501_v31 = vld [vmem:[%s9116_s12 + $0x160] sm:$0xff] }
0x2f78   : > { %6911 = vmatprep.subr.bf16.mxu0 %v7211_v3 }
0x2f7a   : > { %6523 = vmatmul.mubr.msk.f32.vlgmr.msra.gmra.mrb[56].mxu0 %vm826_vm2, %v4657_v8  ;;  %v5503_v8 = vld [vmem:[%s9116_s12 + $0x170] sm:$0xff] }
0x2f7b   : > { %6538 = vmatprep.mubr.msk.f32.mxu0 %vm7212_vm0, %v7213_v11  ;;  %6913 = vmatpush3.bf16.msra.mxu0 %v6912_v26  ;;  %v5516_v26 = vld [vmem:[%s9116_s12 + $0x1d8] sm:$0xff] }
0x2f7c   : > { %6914 = vmatprep.subr.bf16.mxu0 %v7211_v3 }
0x3049   : > { %v4652_v37 = vpop.f32.mrb[54].mxu0 }
0x304a   : > { %v6519_v9 = vpop.f32.mrb[55].mxu0 }
0x304d   : > { %v4730_v10 = vpop.f32.mrb[56].mxu0 }
0x304e   : > { %v4734_v12 = vsel %vm1945_vm10, -1e+09, %v4730_v10  ;;  %v6524_v14 = vpop.f32.mrb[57].mxu0 }
0x304f   : > { %v4735_v15 = vsel %vm826_vm2, %v4734_v12, -inf }
0x3050   : > { %4736 = vmax.xlane.f32.xlu1 %v4735_v15  ;;  %v5506_v15 = vld [vmem:[%s9116_s12 + $0x188] sm:$0xff] }
0x3061   : > { %4823 = vrot.lane.b32.xlu1 %v4486_v46, %s9165_s27 }
0x3065   : > { %4827 = vrot.lane.b32.xlu1 %v4652_v37, %s9166_s29  ;;  %v6931_v37 = vpack.c.bf16 %v5503_v8, %v5501_v31  ;;  %v5546_v31 = vld [vmem:[%s9117_s13 + $0x1c8] sm:$0xff] }
0x30dd   : > { %v4737_v17 = vpop.xlane.xlu1 %4736 }
0x30de   : > { %v4738_v21 = vsub.f32 %v4734_v12, %v4737_v17  ;;  %v5508_v17 = vld [vmem:[%s9116_s12 + $0x198] sm:$0xff] }
0x30e0   : > { %v4739_v22 = vmul.f32 1.442695, %v4738_v21  ;;  %v6933_v21 = vpack.c.bf16 %v5508_v17, %v5506_v15  ;;  %v5548_v15 = vld [vmem:[%s9117_s13 + $0x1d8] sm:$0xff] }
0x30e1   : > { %v4824_v42 = vpop.permute.xlu1 %4823 }
0x30e2   : > { %7106 = vpow2.f32 %v4739_v22  ;;  %v4834_v45 = vsel %vm826_vm2, %v8698_v29, %v4824_v42  ;;  %v5505_v22 = vld [vmem:[%s9116_s12 + $0x180] sm:$0xff]  ;;  %v5520_v42 = vld [vmem:[%s9116_s12 + $0x1f8] sm:$0xff] }
0x30e5   : > { %v4828_v48 = vpop.permute.xlu1 %4827 }
0x30e6   : > { %v4835_v50 = vsel %vm1500_vm7, %v4834_v45, %v4828_v48 }
0x30ec   : > { %v7107_v24 = vpop.eup %7106 }
0x30ed   : > { %v4741_v25 = vsel %vm826_vm2, %v7107_v24, 0.0 }
0x30ee   : > { %4742 = vadd.xlane.f32.xlu0 %v4741_v25 }
0x3104   : > { %4746 = vrot.lane.b32.xlu0 %v8683_v20, %s9164_s26  ;;  %v5474_v20 = vld [vmem:[%s9115_s11 + $0x30] sm:$0xff]  ;;  %s5204_s26 = sshll.u32 %s531_s21, 4  ;;  %s9029_s26 = int_to_ptr.vmem [resolvable:$true] %s5204_s26 }
0x3105   : > { %v6915_v23 = vpack.c.bf16 %v5475_v39, %v5474_v20  ;;  %v5513_v39 = vld [vmem:[%s9116_s12 + $0x1c0] sm:$0xff]  ;;  %s7115_s30 = scalar_lea.vmem %s9029_s26, 128  ;;  %p7122_p0 = scmp.lt.s32.totalorder %s9029_s26, %s7120_s20 }
0x3106   : > { %p7116_p11 = scmp.ne.s32.totalorder %s9029_s26, %s7115_s30  ;;  %p7123_p1 = scmp.lt.s32.totalorder %s7121_s3, %s7115_s30 }
0x3107   : > { %6916 = vmatpush3.bf16.msra.mxu0 %v6915_v23  ;;  %v5515_v23 = vld [vmem:[%s9116_s12 + $0x1d0] sm:$0xff] }
0x3108   : > { %v6943_v48 = vpack.c.bf16 %v5515_v23, %v5513_v39  ;;  %p7117_p12 = pnand %p7116_p11, %p7344_p5  ;;  %p7124_p2 = por %p7123_p1, %p7122_p0 }
0x310a   : > { %p7118_p13 = pneg %p7117_p12 }
0x310c   : > { %p7125_p3 = pnand %p7124_p2, %p7118_p13 }
0x317b   : > { %v4743_v36 = vpop.xlane.xlu0 %4742 }
0x317c   : > { %7108 = vrcp.f32 %v4743_v36  ;;  %v5510_v36 = vld [vmem:[%s9116_s12 + $0x1a8] sm:$0xff] }
0x317f   : > { %v4747_v28 = vpop.permute.xlu0 %4746 }
0x3180   : > { %6526 = vmatpush3.msra.mxu1 %v4747_v28  ;;  %v5512_v28 = vld [vmem:[%s9116_s12 + $0x1b8] sm:$0xff] }
0x3186   : > { %v7109_v13 = vpop.eup %7108 }
0x3187   : > { %v4745_v32 = vmul.f32 %v7109_v13, %v7107_v24  ;;  %v5507_v24 = vld [vmem:[%s9116_s12 + $0x190] sm:$0xff]  ;;  %v6937_v13 = vpack.c.bf16 %v5512_v28, %v5510_v36  ;;  %v5550_v36 = vld [vmem:[%s9117_s13 + $0x1e8] sm:$0xff] }
0x3188   : > { %v6935_v25 = vpack.c.bf16 %v5507_v24, %v5505_v22  ;;  %v5531_v22 = vld [vmem:[%s9117_s13 + $0x150] sm:$0xff]  ;;  %v5532_v24 = vld [vmem:[%s9117_s13 + $0x158] sm:$0xff] }
0x3189   : > { %6528 = vmatmul.mubr.msk.f32.vlgmr.msra.gmra.mrb[38].mxu1 %vm826_vm2, %v4745_v32  ;;  %v6971_v28 = vpack.c.bf16 %v5532_v24, %v5531_v22 }
0x318a   : > { %5030 = vmatprep.mubr.f32.mxu1 %v7213_v11 }
0x325c   : > { %v4818_v11 = vpop.f32.mrb[38].mxu1 }
0x325d   : > { %4831 = vrot.lane.b32.xlu0 %v4818_v11, %s9167_s16  ;;  %v6529_v40 = vpop.f32.mrb[39].mxu1  ;;  %v6941_v11 = vpack.c.bf16 %v5516_v26, %v5514_v34 }
0x325e   : > { %v5518_v40 = vld [vmem:[%s9116_s12 + $0x1e8] sm:$0xff] }
0x325f   : > { %v6945_v45 = vpack.c.bf16 %v5520_v42, %v5518_v40  ;;  %v5551_v40 = vld [vmem:[%s9117_s13 + $0x1f0] sm:$0xff]  ;;  %v5552_v42 = vld [vmem:[%s9117_s13 + $0x1f8] sm:$0xff] }
0x32cf   : > { %v4832_v51 = vpop.permute.xlu0 %4831 }
0x32d0   : > { %v4836_v52 = vsel %vm1502_vm8, %v4835_v50, %v4832_v51  ;;  %v5517_v50 = vld [vmem:[%s9116_s12 + $0x1e0] sm:$0xff]  ;;  %v5519_v51 = vld [vmem:[%s9116_s12 + $0x1f0] sm:$0xff] }
0x32d1   : > { %6539 = vmatmul.mubr.msk.f32.vlgmr.msra.gmra.mrb[58].mxu0 %vm1504_vm9, %v4836_v52  ;;  %v6947_v52 = vpack.c.bf16 %v5519_v51, %v5517_v50  ;;  %v5536_v50 = vld [vmem:[%s9117_s13 + $0x178] sm:$0xff] }
0x33a4   : > { %v4906_v54 = vpop.f32.mrb[58].mxu0 }
0x33a5   : > { %v4907_v3 = vadd.f32 %v4906_v54, %v8601_v35  ;;  %v6540_v46 = vpop.f32.mrb[59].mxu0  ;;  %v5496_v35 = vld [vmem:[%s9116_s12 + $0x138] sm:$0xff]  ;;  %v5537_v54 = vld [vmem:[%s9117_s13 + $0x180] sm:$0xff] }
0x33a6   : > { %v5521_v46 = vld [vmem:[%s9117_s13 + $0x100] sm:$0xff] }
0x33a7   : > { %4910 = vadd.xlane.f32.xlu1 %v4907_v3 }
0x33b8   : > { %1590 = vrot.lane.b32.xlu1 %v7626_v0, %s9165_s27  ;;  %v5490_v0 = vld [vmem:[%s9116_s12 + $0x108] sm:$0xff] }
0x33bc   : > { %2632 = vrot.lane.b32.xlu1 %v7942_v18, %s9166_s29  ;;  %v5492_v18 = vld [vmem:[%s9116_s12 + $0x118] sm:$0xff] }
0x33c0   : > { %3884 = vrot.lane.b32.xlu1 %v8415_v60, %s9165_s27  ;;  %v5489_v60 = vld [vmem:[%s9116_s12 + $0x100] sm:$0xff] }
0x33c4   : > { %3887 = vrot.lane.b32.xlu1 %v8437_v47, %s9166_s29  ;;  %v6917_v47 = vpack.c.bf16 %v5492_v18, %v5490_v0  ;;  %v5522_v18 = vld [vmem:[%s9117_s13 + $0x108] sm:$0xff] }
0x33c6   : > { %6918 = vmatprep.subr.bf16.mxu1 %v6917_v47  ;;  %v5540_v47 = vld [vmem:[%s9117_s13 + $0x198] sm:$0xff] }
0x33c8   : > { %3890 = vrot.lane.b32.xlu1 %v8457_v49, %s9167_s16  ;;  %v5491_v49 = vld [vmem:[%s9116_s12 + $0x110] sm:$0xff] }
0x33c9   : > { %v6919_v29 = vpack.c.bf16 %v5491_v49, %v5489_v60  ;;  %v5539_v60 = vld [vmem:[%s9117_s13 + $0x190] sm:$0xff]  ;;  %v6951_v49 = vpack.c.bf16 %v5522_v18, %v5521_v46 }
0x33cb   : > { %6920 = vmatpush1.bf16.msra.mxu1 %v6919_v29  ;;  %v5524_v29 = vld [vmem:[%s9117_s13 + $0x118] sm:$0xff] }
0x33cc   : > { %4927 = vrot.lane.b32.xlu1 %v4745_v32, %s9167_s16  ;;  %v5509_v32 = vld [vmem:[%s9116_s12 + $0x1a0] sm:$0xff] }
0x33cd   : > { %v6939_v20 = vpack.c.bf16 %v5511_v33, %v5509_v32  ;;  %v5533_v32 = vld [vmem:[%s9117_s13 + $0x160] sm:$0xff]  ;;  %v5534_v33 = vld [vmem:[%s9117_s13 + $0x168] sm:$0xff] }
0x33ce   : > { %v6975_v34 = vpack.c.bf16 %v5534_v33, %v5533_v32 }
0x33d0   : > { %1596 = vrot.lane.b32.xlu1 %v7664_v38, %s9167_s16  ;;  %v5494_v38 = vld [vmem:[%s9116_s12 + $0x128] sm:$0xff] }
0x33d1   : > { %v6921_v55 = vpack.c.bf16 %v5496_v35, %v5494_v38  ;;  %v6953_v38 = vpack.c.bf16 %v5540_v47, %v5539_v60  ;;  %v5523_v35 = vld [vmem:[%s9117_s13 + $0x110] sm:$0xff] }
0x33d2   : > { %v6955_v27 = vpack.c.bf16 %v5524_v29, %v5523_v35 }
0x33d3   : > { %6922 = vmatprep.subr.bf16.mxu1 %v6921_v55  ;;  %v5541_v55 = vld [vmem:[%s9117_s13 + $0x1a0] sm:$0xff] }
0x33d4   : > { %6924 = vmatpush1.bf16.msra.mxu1 %v6923_v43  ;;  %v6957_v59 = vpack.c.bf16 %v5542_v56, %v5541_v55  ;;  %v5526_v43 = vld [vmem:[%s9117_s13 + $0x128] sm:$0xff] }
0x33d5   : > { %6926 = vmatprep.subr.bf16.mxu1 %v6925_v57  ;;  %v5543_v57 = vld [vmem:[%s9117_s13 + $0x1b0] sm:$0xff]  ;;  %v6959_v61 = vpack.c.bf16 %v5526_v43, %v5525_v30 }
0x33d6   : > { %v6961_v58 = vpack.c.bf16 %v5544_v1, %v5543_v57 }
0x33d8   : > { %6928 = vmatpush1.bf16.msra.mxu1 %v6927_v5  ;;  %v5528_v5 = vld [vmem:[%s9117_s13 + $0x138] sm:$0xff] }
0x33d9   : > { %6930 = vmatprep.subr.bf16.mxu1 %v6929_v6  ;;  %v5545_v6 = vld [vmem:[%s9117_s13 + $0x1c0] sm:$0xff]  ;;  %v6963_v8 = vpack.c.bf16 %v5528_v5, %v5527_v4 }
0x33dc   : > { %6932 = vmatpush1.bf16.msra.mxu1 %v6931_v37  ;;  %v6965_v37 = vpack.c.bf16 %v5546_v31, %v5545_v6 }
0x33dd   : > { %6934 = vmatprep.subr.bf16.mxu1 %v6933_v21 }
0x33e0   : > { %6936 = vmatpush1.bf16.msra.mxu1 %v6935_v25  ;;  %v5549_v25 = vld [vmem:[%s9117_s13 + $0x1e0] sm:$0xff] }
0x33e1   : > { %6938 = vmatprep.subr.bf16.mxu1 %v6937_v13  ;;  %v6973_v13 = vpack.c.bf16 %v5550_v36, %v5549_v25 }
0x33e4   : > { %6940 = vmatpush1.bf16.msra.mxu1 %v6939_v20 }
0x33e5   : > { %6942 = vmatprep.subr.bf16.mxu1 %v6941_v11 }
0x33e8   : > { %6944 = vmatpush1.bf16.msra.mxu1 %v6943_v48  ;;  %v6977_v48 = vpack.c.bf16 %v5552_v42, %v5551_v40 }
0x33e9   : > { %6946 = vmatprep.subr.bf16.mxu1 %v6945_v45  ;;  %v5535_v45 = vld [vmem:[%s9117_s13 + $0x170] sm:$0xff] }
0x33ea   : > { %v6979_v51 = vpack.c.bf16 %v5536_v50, %v5535_v45 }
0x33ec   : > { %6948 = vmatpush1.bf16.msra.mxu1 %v6947_v52 }
0x3434   : > { %v4911_v9 = vpop.xlane.xlu1 %4910 }
0x3435   : > { %v4912_v10 = vmul.f32 0.0078125, %v4911_v9  ;;  %v5529_v9 = vld [vmem:[%s9117_s13 + $0x140] sm:$0xff] }
0x3437   : > { %v8835_v12 = vsub.f32 %v4907_v3, %v4912_v10  ;;  %v5538_v3 = vld [vmem:[%s9117_s13 + $0x188] sm:$0xff] }
0x3438   : > { %v6949_v0 = vpack.c.bf16 %v5538_v3, %v5537_v54  ;;  %v5530_v10 = vld [vmem:[%s9117_s13 + $0x148] sm:$0xff]  ;;  %v1591_v47 = vpop.permute.xlu1 %1590 }
0x3439   : > { %v4914_v14 = vmul.f32 %v8835_v12, %v8835_v12  ;;  %v6967_v17 = vpack.c.bf16 %v5530_v10, %v5529_v9 }
0x343a   : > { %6950 = vmatprep.subr.bf16.mxu0 %v6949_v0 }
0x343b   : > { %4915 = vadd.xlane.f32.xlu0 %v4914_v14  ;;  %6952 = vmatpush3.bf16.msra.mxu0 %v6951_v49  ;;  %v5547_v14 = vld [vmem:[%s9117_s13 + $0x1d0] sm:$0xff] }
0x343c   : > { %6954 = vmatprep.subr.bf16.mxu0 %v6953_v38  ;;  %v6969_v21 = vpack.c.bf16 %v5548_v15, %v5547_v14  ;;  %v2633_v49 = vpop.permute.xlu1 %2632 }
0x343f   : > { %6956 = vmatpush3.bf16.msra.mxu0 %v6955_v27 }
0x3440   : > { %6958 = vmatprep.subr.bf16.mxu0 %v6957_v59  ;;  %v3885_v38 = vpop.permute.xlu1 %3884 }
0x3441   : > { %v3893_v30 = vsel %vm826_vm2, %v8391_v63, %v3885_v38 }
0x3443   : > { %6960 = vmatpush3.bf16.msra.mxu0 %v6959_v61 }
0x3444   : > { %6962 = vmatprep.subr.bf16.mxu0 %v6961_v58 }
0x3447   : > { %6964 = vmatpush3.bf16.msra.mxu0 %v6963_v8 }
0x3448   : > { %6966 = vmatprep.subr.bf16.mxu0 %v6965_v37 }
0x344b   : > { %6968 = vmatpush3.bf16.msra.mxu0 %v6967_v17 }
0x344c   : > { %6970 = vmatprep.subr.bf16.mxu0 %v6969_v21 }
0x344f   : > { %6972 = vmatpush3.bf16.msra.mxu0 %v6971_v28 }
0x3450   : > { %6974 = vmatprep.subr.bf16.mxu0 %v6973_v13 }
0x3453   : > { %6976 = vmatpush3.bf16.msra.mxu0 %v6975_v34 }
0x3454   : > { %6978 = vmatprep.subr.bf16.mxu0 %v6977_v48 }
0x3457   : > { %6980 = vmatpush3.bf16.msra.mxu0 %v6979_v51 }
0x34c8   : > { %v4916_v20 = vpop.xlane.xlu0 %4915 }
0x34c9   : > { %v4917_v26 = vmul.f32 0.0078125, %v4916_v20 }
0x34cb   : > { %v4918_v39 = vadd.f32 1e-05, %v4917_v26 }
0x34cd   : > { %7110 = vrsqrt.f32 %v4918_v39 }
0x34d7   : > { %v7111_v23 = vpop.eup %7110 }
0x34d8   : > { %v4920_v11 = vmul.f32 %v7111_v23, %v8835_v12 }
0x34da   : > { %5031 = vmatmul.mubr.f32.vlgmr.msra.gmra.mrb[40].mxu1 %v4920_v11 }
0x35ad   : > { %v5032_v12 = vpop.f32.mrb[40].mxu1 }
0x35ae   : > { %v5034_v52 = vpop.f32.mrb[41].mxu1  ;;  %v5037_v3 = vmax.f32 %v5032_v12, 0.0 }
0x35af   : > { %v5038_v54 = vmax.f32 %v5034_v52, 0.0 }
0x35b1   : > { %5136 = vmatprep.mubr.f32.mxu0 %v5038_v54 }
0x35b2   : > { %5137 = vmatmul.mubr.f32.vlgmr.msra.gmra.mrb[60].mxu0 %v5037_v3 }
0x3685   : > { %v5914_v46 = vpop.f32.mrb[60].mxu0 }
0x3686   : > { %v5915_v0 = vpop.f32.mrb[61].mxu0 }
0x3687   : > { %v5916_v18 = vadd.f32 %v5915_v0, %v5914_v46 }
0x3689   : > { %v5139_v60 = vadd.f32 %v5916_v18, %v4920_v11 }
0x368b   : > { %5142 = vadd.xlane.f32.xlu0 %v5139_v60 }
0x36a1   : > { %2629 = vrot.lane.b32.xlu0 %v7924_v62, %s9165_s27  ;;  %v3888_v62 = vpop.permute.xlu1 %3887 }
0x36a2   : > { %v3894_v43 = vsel %vm1500_vm7, %v3893_v30, %v3888_v62 }
0x36a5   : > { %2635 = vrot.lane.b32.xlu0 %v7961_v16, %s9167_s16  ;;  %v3891_v59 = vpop.permute.xlu1 %3890  ;;  %s7223_s16 = smov 96  }
0x36a9   : > { %4921 = vrot.lane.b32.xlu0 %v8711_v53, %s9165_s27  ;;  %s7221_s27 = smov 32   ;;  %v4928_v58 = vpop.permute.xlu1 %4927 }
0x36ad   : > { %4924 = vrot.lane.b32.xlu0 %v8733_v7, %s9166_s29  ;;  %v1597_v63 = vpop.permute.xlu1 %1596 }
0x36b1   : > { %1593 = vrot.lane.b32.xlu0 %v7644_v19, %s9166_s29  ;;  %s7222_s29 = smov 64  }
0x3718   : > { %v5143_v35 = vpop.xlane.xlu0 %5142 }
0x3719   : > { %v5144_v29 = vmul.f32 0.0078125, %v5143_v35 }
0x371b   : > { %v8994_v55 = vsub.f32 %v5139_v60, %v5144_v29 }
0x371c   : > { %v2630_v56 = vpop.permute.xlu0 %2629 }
0x371d   : > { %v2638_v16 = vsel %vm826_vm2, %v7898_v41, %v2630_v56  ;;  %v5146_v53 = vmul.f32 %v8994_v55, %v8994_v55  ;;  %v3895_v41 = vsel %vm1502_vm8, %v3894_v43, %v3891_v59 }
0x371e   : > { %v2639_v7 = vsel %vm1500_vm7, %v2638_v16, %v2633_v49 }
0x371f   : > { %5147 = vadd.xlane.f32.xlu0 %v5146_v53 }
0x3720   : > { %v2636_v27 = vpop.permute.xlu0 %2635 }
0x3721   : > { %v2640_v19 = vsel %vm1502_vm8, %v2639_v7, %v2636_v27 }
0x3722   : > { %5155 = vrot.lane.b32.xlu1 %v2640_v19, %s7221_s27 }
0x3724   : > { %v4922_v57 = vpop.permute.xlu0 %4921 }
0x3725   : > { %v4930_v1 = vsel %vm826_vm2, %v8687_v2, %v4922_v57  ;;  %v1599_v2 = vsel %vm826_vm2, %v7598_v44, %v1591_v47 }
0x3726   : > { %5159 = vrot.lane.b32.xlu1 %v3895_v41, %s7222_s29 }
0x3728   : > { %v4925_v61 = vpop.permute.xlu0 %4924 }
0x3729   : > { %v4931_v4 = vsel %vm1500_vm7, %v4930_v1, %v4925_v61 }
0x372a   : > { %v4932_v5 = vsel %vm1502_vm8, %v4931_v4, %v4928_v58 }
0x372b   : > { %5163 = vrot.lane.b32.xlu1 %v4932_v5, %s7223_s16 }
0x372c   : > { %v1594_v31 = vpop.permute.xlu0 %1593 }
0x372d   : > { %v1600_v8 = vsel %vm1500_vm7, %v1599_v2, %v1594_v31 }
0x372e   : > { %v1601_v9 = vsel %vm1502_vm8, %v1600_v8, %v1597_v63 }
0x3794   : > { %v5156_v6 = vpop.permute.xlu1 %5155 }
0x3795   : > { %v5166_v10 = vsel %vm1504_vm9, %v1601_v9, %v5156_v6 }
0x3798   : > { %v5160_v37 = vpop.permute.xlu1 %5159 }
0x3799   : > { %v5168_v14 = vsel %vm5167_vm11, %v5166_v10, %v5160_v37 }
0x379d   : > { %v5164_v15 = vpop.permute.xlu1 %5163 }
0x379e   : > { %v5170_v44 = vsel %vm5169_vm12, %v5168_v14, %v5164_v15 }
0x379f   : > { %5171 = vst [vmem:[%s531_s21] sm:$0xff] %v5170_v44 }
0x37a0   : > { %7128 = shalt.err (!%p7125_p3)
}
0x37a1   : > { %s7129_s17 = scalar_lea.hbm %s9027_s1, 128  ;;  %s7133_s16 = scalar_lea.hbm %s9168_s24, 256 }
0x37a2   : > { %p7130_p4 = scmp.ne.s32.totalorder %s9027_s1, %s7129_s17  ;;  %p7134_p9 = scmp.lt.u32.totalorder %s9027_s1, %s9168_s24 }
0x37a3   : > { %p7135_p10 = scmp.lt.u32.totalorder %s7133_s16, %s7129_s17  ;;  %p7137_p12 = scmp.lt.u32.totalorder %s7129_s17, %s9027_s1 }
0x37a4   : > { %p7131_p7 = pnand %p7130_p4, %p7344_p5 }
0x37a5   : > { %p7136_p11 = por %p7135_p10, %p7134_p9 }
0x37a6   : > { %p7132_p8 = pneg %p7131_p7 }
0x37a7   : > { %p7138_p13 = por %p7137_p12, %p7136_p11 }
0x37a9   : > { %p7139_p0 = pnand %p7138_p13, %p7132_p8 }
0x37ab   : > { %7142 = shalt.err (!%p7139_p0)
}
0x37ac   : > { %6982 = dma.vmem_to_hbm [thread:$0]  (%p7344_p5), %s9029_s26, 128, %s9027_s1, %s5178_s2   ;;  %v5148_v17 = vpop.xlane.xlu0 %5147 }
0x37ad   : > { %v5149_v21 = vmul.f32 0.0078125, %v5148_v17  ;;  %s524_s23 = scalar_lea.vmem [#allocation2], %s5329_s18  ;;  %s9169_s3 = sld [smem:[#allocation18_spill]] }
0x37ae   : > { %s5191_s30 = sshll.u32 %s524_s23, 4  ;;  %s5173_s26 = scalar_lea.sflag [#allocation3], %s9011_s25  ;;  %s9063_s30 = int_to_ptr.vmem [resolvable:$true] %s5191_s30 }
0x37af   : > { %v5150_v22 = vadd.f32 1e-05, %v5149_v21  ;;  %s7143_s1 = scalar_lea.vmem %s9063_s30, 128  ;;  %s7225_s18 = smov [#allocation2]  }
0x37b0   : > { %p7144_p1 = scmp.ne.s32.totalorder %s9063_s30, %s7143_s1  ;;  %s7147_s2 = sshll.u32 %s7225_s18, 4  ;;  %s7148_s2 = int_to_ptr.vmem [resolvable:$false] %s7147_s2 }
0x37b1   : > { %7112 = vrsqrt.f32 %v5150_v22  ;;  %s7149_s22 = scalar_lea.vmem %s7148_s2, 256  ;;  %p7150_p4 = scmp.lt.s32.totalorder %s9063_s30, %s7148_s2 }
0x37b2   : > { %p7145_p2 = pnand %p7144_p1, %p7344_p5  ;;  %p7151_p7 = scmp.lt.s32.totalorder %s7149_s22, %s7143_s1 }
0x37b3   : > { %s9061_s17 = scalar_lea.hbm %s9169_s3, %s5555_s14 }
0x37b4   : > { %p7146_p3 = pneg %p7145_p2  ;;  %p7152_p8 = por %p7151_p7, %p7150_p4 }
0x37b6   : > { %p7153_p9 = pnand %p7152_p8, %p7146_p3 }
0x37bb   : > { %v7113_v24 = vpop.eup %7112 }
0x37bc   : > { %v5152_v25 = vmul.f32 %v7113_v24, %v8994_v55 }
0x37be   : > { %5153 = vst [vmem:[%s524_s23] sm:$0xff] %v5152_v25 }
0x37bf   : > { %7156 = shalt.err (!%p7153_p9)
}
0x37c0   : > { %s7157_s25 = scalar_lea.hbm %s9061_s17, 128  ;;  %s7161_s29 = scalar_lea.hbm %s9169_s3, 256 }
0x37c1   : > { %p7158_p10 = scmp.ne.s32.totalorder %s9061_s17, %s7157_s25  ;;  %p7162_p13 = scmp.lt.u32.totalorder %s9061_s17, %s9169_s3 }
0x37c2   : > { %p7163_p0 = scmp.lt.u32.totalorder %s7161_s29, %s7157_s25  ;;  %p7165_p2 = scmp.lt.u32.totalorder %s7157_s25, %s9061_s17 }
0x37c3   : > { %p7159_p11 = pnand %p7158_p10, %p7344_p5 }
0x37c4   : > { %p7164_p1 = por %p7163_p0, %p7162_p13 }
0x37c5   : > { %p7160_p12 = pneg %p7159_p11 }
0x37c6   : > { %p7166_p3 = por %p7165_p2, %p7164_p1 }
0x37c8   : > { %p7167_p4 = pnand %p7166_p3, %p7160_p12 }
0x37ca   : > { %7170 = shalt.err (!%p7167_p4)
}
0x37cb   : > { %6981 = dma.vmem_to_hbm [thread:$0]  (%p7344_p5), %s9063_s30, 128, %s9061_s17, %s5173_s26  }
0x37cc PF: > { %s9170_s15 = sld [smem:[#allocation10_spill]]  ;;  %s9171_s23 = sld [smem:[#allocation8_spill]] }
0x37d2   : > { %p6992_p7 = scmp.ge.s32.totalorder %s9170_s15, 2  ;;  %s5216_s20 = sand.u32 1, %s9171_s23  }
0x37d3   : > { %s5217_s1 = scalar_lea.sflag [#allocation3], %s5216_s20 }
0x37d4   : > { %p6986_p8 = pnand %p6992_p7, %p7348_p6 }
0x37d6   : > { %7188 = dma.done.wait (!%p6986_p8), %s5217_s1, 128  }
0x37d7   : > { %7190 = vsyncadd (!%p6986_p8), %s5217_s1, 4294967168  ;;  %s5226_s18 = scalar_lea.sflag [#allocation5], %s5216_s20 }
0x37d8   : > { %7192 = dma.done.wait (!%p6986_p8), %s5226_s18, 128  }
0x37d9   : > { %7194 = vsyncadd (!%p6986_p8), %s5226_s18, 4294967168  ;;  %s9173_s21 = sld [smem:[#allocation11_spill]]  ;;  %s9174_s28 = sld [smem:[#allocation9_spill]] }
0x37da   : > { %s9175_s20 = sld [smem:[#allocation12_spill]]  ;;  %s9176_s18 = smov %s7201_s19 }
0x37df   : > { %p29_p5 = scmp.ge.s32.totalorder %s9173_s21, 4   ;;  %s9177_s19 = smov %s9174_s28 }
0x37e1   :  { %31 = sbr.rel (!%p29_p5) target bundleno = 12 (0xc), region = 147 }
0x37e8   :  { %5231 = vsyncpa [#allocation3], 1 }
0x37e9   :  { %5233 = vsyncpa [#allocation3 + $0x1], 1 }
0x37ea   :  { %5234 = vsyncpa [#allocation5], 1 }
0x37eb   :  { %5236 = vsyncpa [#allocation5 + $0x1], 1 }

</bundles_post_ra>
